<compile_context>
chip_gen: v7x
topology: tpu7x:2x2x1
jax: 0.10.0
libtpu: 0.0.40
codegen_flags: <defaults>
</compile_context>

<pallas_src>
import jax
import jax.numpy as jnp
from jax.experimental import pallas as pl
from jax.experimental.pallas import tpu as pltpu


def _widedeep_kernel(wide_ref, deep_ref, mean_ref, var_ref,
                     w1_ref, b1_ref, w2_ref, b2_ref, w3_ref, b3_ref,
                     w4_ref, b4_ref, w5_row_ref, b5_ref, out_ref):
    eps = 1e-5

    # --- wide branch: torch.sum(wide_out, dim=1, keepdim=True)  (XLU cross-lane reduce) ---
    wide_out = jnp.sum(wide_ref[...], axis=1, keepdims=True)                 # [TB, 1] f32

    # --- deep branch: eval-mode input normalization (f32) + MLP (bf16 MXU, f32 acc) ---
    x = (deep_ref[...] - mean_ref[...]) * jax.lax.rsqrt(var_ref[...] + eps)  # [TB, Dk] f32

    h = jnp.dot(x.astype(jnp.bfloat16), w1_ref[...],
                preferred_element_type=jnp.float32)
    h = jnp.maximum(h + b1_ref[...], 0.0)

    h = jnp.dot(h.astype(jnp.bfloat16), w2_ref[...],
                preferred_element_type=jnp.float32)
    h = jnp.maximum(h + b2_ref[...], 0.0)

    h = jnp.dot(h.astype(jnp.bfloat16), w3_ref[...],
                preferred_element_type=jnp.float32)
    h = jnp.maximum(h + b3_ref[...], 0.0)

    h = jnp.dot(h.astype(jnp.bfloat16), w4_ref[...],
                preferred_element_type=jnp.float32)
    h = jnp.maximum(h + b4_ref[...], 0.0)                                    # [TB, H4] f32

    # Final layer has N=1: do it as a VPU multiply + XLU reduce instead of an MXU pass.
    dnn_out = jnp.sum(h * w5_row_ref[...], axis=1, keepdims=True) + b5_ref[...]   # [TB, 1]

    # --- final: sigmoid(wide + deep) ---
    out_ref[...] = jax.nn.sigmoid(wide_out + dnn_out)


def widedeep_forward(wide_cat, deep_cat, norm_mean, norm_var, mlp_params, *, tb=128):
    """wide_cat: [B, Dw] f32, deep_cat: [B, Din] f32, norm_*: [1, Din] f32,
    mlp_params: [w1,b1,...,w5,b5] for Din->1024->512->256->128->1."""
    B, Dw = wide_cat.shape
    Din = deep_cat.shape[1]
    w1, b1, w2, b2, w3, b3, w4, b4, w5, b5 = mlp_params
    H1, H2, H3, H4 = w1.shape[1], w2.shape[1], w3.shape[1], w4.shape[1]

    # --- pad first-layer contraction dim to a multiple of 128 (aligned MXU K) ---
    Dk = ((Din + 127) // 128) * 128
    if Dk != Din:
        pad = Dk - Din
        deep_cat = jnp.pad(deep_cat, ((0, 0), (0, pad)))
        norm_mean = jnp.pad(norm_mean, ((0, 0), (0, pad)))
        norm_var = jnp.pad(norm_var, ((0, 0), (0, pad)), constant_values=1.0)
        w1 = jnp.pad(w1, ((0, pad), (0, 0)))   # zero rows -> padded columns contribute 0

    # --- pad batch to a multiple of the batch tile ---
    Bp = ((B + tb - 1) // tb) * tb
    if Bp != B:
        wide_cat = jnp.pad(wide_cat, ((0, Bp - B), (0, 0)))
        deep_cat = jnp.pad(deep_cat, ((0, Bp - B), (0, 0)))

    # --- bf16 weights for the MXU; final layer as an f32 row for the VPU/XLU reduce ---
    w1b = w1.astype(jnp.bfloat16)
    w2b = w2.astype(jnp.bfloat16)
    w3b = w3.astype(jnp.bfloat16)
    w4b = w4.astype(jnp.bfloat16)
    w5_row = w5.reshape(1, H4).astype(jnp.float32)

    def bspec(shape):   # batch-tiled operands
        return pl.BlockSpec(shape, lambda i: (i, 0))

    def cspec(shape):   # VMEM-resident operands (DMA'd once, reused every grid step)
        return pl.BlockSpec(shape, lambda i: (0, 0))

    grid = (Bp // tb,)

    matmul_flops = 2 * Bp * (Dk * H1 + H1 * H2 + H2 * H3 + H3 * H4 + H4)
    elem_flops = Bp * (3 * Dk + Dw + 4)
    weight_bytes = 2 * (Dk * H1 + H1 * H2 + H2 * H3 + H3 * H4) \
        + 4 * (2 * Dk + H1 + H2 + H3 + H4 + H4 + 1)
    cost = pl.CostEstimate(
        flops=int(matmul_flops + elem_flops),
        transcendentals=int(Bp + Dk),
        bytes_accessed=int(4 * Bp * (Dw + Dk + 1) + weight_bytes),
    )

    out = pl.pallas_call(
        _widedeep_kernel,
        out_shape=jax.ShapeDtypeStruct((Bp, 1), jnp.float32),
        grid_spec=pltpu.PrefetchScalarGridSpec(
            num_scalar_prefetch=0,
            grid=grid,
            in_specs=[
                bspec((tb, Dw)),            # wide_cat tile
                bspec((tb, Dk)),            # deep_cat tile
                cspec((1, Dk)),             # norm mean
                cspec((1, Dk)),             # norm var
                cspec((Dk, H1)), cspec((1, H1)),
                cspec((H1, H2)), cspec((1, H2)),
                cspec((H2, H3)), cspec((1, H3)),
                cspec((H3, H4)), cspec((1, H4)),
                cspec((1, H4)),             # w5 as a row
                cspec((1, 1)),              # b5
            ],
            out_specs=pl.BlockSpec((tb, 1), lambda i: (i, 0)),
        ),
        compiler_params=pltpu.CompilerParams(
            dimension_semantics=("parallel",),      # shard batch tiles across TCs (v7x)
            vmem_limit_bytes=16 * 1024 * 1024,      # actual footprint ~5 MiB + headroom
        ),
        cost_estimate=cost,
    )(wide_cat, deep_cat, norm_mean, norm_var,
      w1b, b1, w2b, b2, w3b, b3, w4b, b4, w5_row, b5)

    return out[:B]


def embedding_sum_concat(table, ids):
    """Glue for ms.EmbeddingSumConcat: per-field gather, sum-pool over ids, concat fields.

    table: [F, V, D]   ids: [B, F, K]   ->   [B, F*D]
    """
    # TODO(synk): ms.EmbeddingSumConcat's hashed sparse lookup + FTRL updater have no
    # Pallas equivalent; modeled as dense per-field tables gathered in plain JAX.
    F, V, D = table.shape
    B = ids.shape[0]
    f_idx = jnp.arange(F)[None, :, None]                 # [1, F, 1]
    gathered = table[f_idx, ids, :]                      # [B, F, K, D]
    pooled = gathered.sum(axis=2)                        # [B, F, D]  (sum pooling)
    return pooled.reshape(B, F * D)                      # concat fields


if __name__ == "__main__":
    key = jax.random.PRNGKey(0)
    keys = jax.random.split(key, 10)

    # small synthetic shapes consistent with the module
    B = 8
    wide_dim, deep_dim = 10, 10          # wide_embedding_dim / deep_embedding_dim
    F_wide, F_deep = 4, 4                # feature_count of each EmbeddingSumConcat
    K = 3                                # multi-hot ids per field
    V = 100                              # vocab per field
    hidden = [1024, 512, 256, 128]       # dnn_hidden_units (module defaults)

    # sparse categorical feature ids (stand-in for metaspore's sparse input format)
    wide_ids = jax.random.randint(keys[0], (B, F_wide, K), 0, V)
    deep_ids = jax.random.randint(keys[1], (B, F_deep, K), 0, V)

    # embedding tables: NormalTensorInitializer(var=0.01) -> std = 0.1
    wide_table = 0.1 * jax.random.normal(keys[2], (F_wide, V, wide_dim), jnp.float32)
    deep_table = 0.1 * jax.random.normal(keys[3], (F_deep, V, deep_dim), jnp.float32)

    wide_cat = embedding_sum_concat(wide_table, wide_ids)      # [8, 40]
    deep_cat = embedding_sum_concat(deep_table, deep_ids)      # [8, 40]

    # TODO(synk): input_norm=True (ms.nn.Normalization) modeled as eval-mode per-feature
    # normalization with fixed mean/var (running-stat updates not replicated).
    in_dim = F_deep * deep_dim
    norm_mean = 0.05 * jax.random.normal(keys[4], (1, in_dim), jnp.float32)
    norm_var = 1.0 + 0.1 * jax.random.uniform(keys[5], (1, in_dim), dtype=jnp.float32)

    # MLP params: Linear layers In->1024->512->256->128->1, ReLU between, no final activation
    dims = [in_dim] + hidden + [1]
    wkeys = jax.random.split(keys[6], len(dims) - 1)
    mlp_params = []
    for i, (din, dout) in enumerate(zip(dims[:-1], dims[1:])):
        w = jax.random.normal(wkeys[i], (din, dout), jnp.float32) * (2.0 / din) ** 0.5
        b = 0.01 * jax.random.normal(jax.random.fold_in(wkeys[i], 1), (1, dout), jnp.float32)
        mlp_params += [w, b]

    out = widedeep_forward(wide_cat, deep_cat, norm_mean, norm_var, mlp_params)
    out = jax.block_until_ready(out)

    # pure-JAX f32 reference check (kernel matmuls run in bf16 -> loosened tolerance)
    def ref_forward():
        wide_out = jnp.sum(wide_cat, axis=1, keepdims=True)
        x = (deep_cat - norm_mean) * jax.lax.rsqrt(norm_var + 1e-5)
        p = mlp_params
        h = jnp.maximum(x @ p[0] + p[1], 0.0)
        h = jnp.maximum(h @ p[2] + p[3], 0.0)
        h = jnp.maximum(h @ p[4] + p[5], 0.0)
        h = jnp.maximum(h @ p[6] + p[7], 0.0)
        dnn_out = h @ p[8] + p[9]
        return jax.nn.sigmoid(wide_out + dnn_out)

    ref = ref_forward()
    assert out.shape == (B, 1)
    assert jnp.allclose(out, ref, atol=2e-2, rtol=2e-2), (out, ref)
    print("KERNEL_OK")
</pallas_src>

<mosaic_0001>
module attributes {stable_mosaic.version = 11 : i64} {
  func.func @_widedeep_kernel(%arg0: i32, %arg1: memref<128x40xf32, #tpu.memory_space<vmem>>, %arg2: memref<128x128xf32, #tpu.memory_space<vmem>>, %arg3: memref<1x128xf32, #tpu.memory_space<vmem>>, %arg4: memref<1x128xf32, #tpu.memory_space<vmem>>, %arg5: memref<128x1024xbf16, #tpu.memory_space<vmem>>, %arg6: memref<1x1024xf32, #tpu.memory_space<vmem>>, %arg7: memref<1024x512xbf16, #tpu.memory_space<vmem>>, %arg8: memref<1x512xf32, #tpu.memory_space<vmem>>, %arg9: memref<512x256xbf16, #tpu.memory_space<vmem>>, %arg10: memref<1x256xf32, #tpu.memory_space<vmem>>, %arg11: memref<256x128xbf16, #tpu.memory_space<vmem>>, %arg12: memref<1x128xf32, #tpu.memory_space<vmem>>, %arg13: memref<1x128xf32, #tpu.memory_space<vmem>>, %arg14: memref<1x1xf32, #tpu.memory_space<vmem>>, %arg15: memref<128x1xf32, #tpu.memory_space<vmem>>) attributes {dimension_semantics = [#tpu.dimension_semantics<parallel>], iteration_bounds = array<i64: 1>, scalar_prefetch = 0 : i64, scratch_operands = 0 : i64, tpu.core_type = #tpu.core_type<tc>, window_params = [{transform_indices = @transform_0, window_bounds = array<i64: 128, 40>}, {transform_indices = @transform_1, window_bounds = array<i64: 128, 128>}, {pipeline_mode = #tpu.pipeline_mode<synchronous>, transform_indices = @transform_2, window_bounds = array<i64: 1, 128>}, {pipeline_mode = #tpu.pipeline_mode<synchronous>, transform_indices = @transform_3, window_bounds = array<i64: 1, 128>}, {pipeline_mode = #tpu.pipeline_mode<synchronous>, transform_indices = @transform_4, window_bounds = array<i64: 128, 1024>}, {pipeline_mode = #tpu.pipeline_mode<synchronous>, transform_indices = @transform_5, window_bounds = array<i64: 1, 1024>}, {pipeline_mode = #tpu.pipeline_mode<synchronous>, transform_indices = @transform_6, window_bounds = array<i64: 1024, 512>}, {pipeline_mode = #tpu.pipeline_mode<synchronous>, transform_indices = @transform_7, window_bounds = array<i64: 1, 512>}, {pipeline_mode = #tpu.pipeline_mode<synchronous>, transform_indices = @transform_8, window_bounds = array<i64: 512, 256>}, {pipeline_mode = #tpu.pipeline_mode<synchronous>, transform_indices = @transform_9, window_bounds = array<i64: 1, 256>}, {pipeline_mode = #tpu.pipeline_mode<synchronous>, transform_indices = @transform_10, window_bounds = array<i64: 256, 128>}, {pipeline_mode = #tpu.pipeline_mode<synchronous>, transform_indices = @transform_11, window_bounds = array<i64: 1, 128>}, {pipeline_mode = #tpu.pipeline_mode<synchronous>, transform_indices = @transform_12, window_bounds = array<i64: 1, 128>}, {pipeline_mode = #tpu.pipeline_mode<synchronous>, transform_indices = @transform_13, window_bounds = array<i64: 1, 1>}, {transform_indices = @transform_14, window_bounds = array<i64: 128, 1>}]} {
    %c0 = arith.constant 0 : index
    %c0_0 = arith.constant 0 : index
    %0 = vector.load %arg1[%c0, %c0_0] : memref<128x40xf32, #tpu.memory_space<vmem>>, vector<128x40xf32>
    %cst = arith.constant dense<0.000000e+00> : vector<128xf32>
    %1 = vector.multi_reduction <add>, %0, %cst [1] : vector<128x40xf32> to vector<128xf32>
    %2 = vector.shape_cast %1 : vector<128xf32> to vector<128x1xf32>
    %c0_1 = arith.constant 0 : index
    %c0_2 = arith.constant 0 : index
    %3 = vector.load %arg2[%c0_1, %c0_2] : memref<128x128xf32, #tpu.memory_space<vmem>>, vector<128x128xf32>
    %c0_3 = arith.constant 0 : index
    %c0_4 = arith.constant 0 : index
    %4 = vector.load %arg3[%c0_3, %c0_4] : memref<1x128xf32, #tpu.memory_space<vmem>>, vector<1x128xf32>
    %5 = vector.broadcast %4 : vector<1x128xf32> to vector<128x128xf32>
    %6 = arith.subf %3, %5 : vector<128x128xf32>
    %c0_5 = arith.constant 0 : index
    %c0_6 = arith.constant 0 : index
    %7 = vector.load %arg4[%c0_5, %c0_6] : memref<1x128xf32, #tpu.memory_space<vmem>>, vector<1x128xf32>
    %cst_7 = arith.constant 9.99999974E-6 : f32
    %8 = vector.broadcast %cst_7 : f32 to vector<1x128xf32>
    %9 = arith.addf %7, %8 : vector<1x128xf32>
    %10 = math.rsqrt %9 : vector<1x128xf32>
    %11 = vector.broadcast %10 : vector<1x128xf32> to vector<128x128xf32>
    %12 = arith.mulf %6, %11 : vector<128x128xf32>
    %13 = arith.truncf %12 : vector<128x128xf32> to vector<128x128xbf16>
    %c0_8 = arith.constant 0 : index
    %c0_9 = arith.constant 0 : index
    %14 = vector.load %arg5[%c0_8, %c0_9] : memref<128x1024xbf16, #tpu.memory_space<vmem>>, vector<128x1024xbf16>
    %cst_10 = arith.constant dense<0.000000e+00> : vector<128x1024xf32>
    %15 = tpu.matmul %13, %14, %cst_10 {dimension_numbers = #tpu.dot_dimension_numbers<[1], [0], [0], [1], [0, 0, 1, 1], [], []>} : vector<128x128xbf16>, vector<128x1024xbf16>, vector<128x1024xf32> -> vector<128x1024xf32>
    %c0_11 = arith.constant 0 : index
    %c0_12 = arith.constant 0 : index
    %16 = vector.load %arg6[%c0_11, %c0_12] : memref<1x1024xf32, #tpu.memory_space<vmem>>, vector<1x1024xf32>
    %17 = vector.broadcast %16 : vector<1x1024xf32> to vector<128x1024xf32>
    %18 = arith.addf %15, %17 : vector<128x1024xf32>
    %cst_13 = arith.constant 0.000000e+00 : f32
    %19 = vector.broadcast %cst_13 : f32 to vector<128x1024xf32>
    %20 = arith.maximumf %18, %19 : vector<128x1024xf32>
    %21 = arith.truncf %20 : vector<128x1024xf32> to vector<128x1024xbf16>
    %c0_14 = arith.constant 0 : index
    %c0_15 = arith.constant 0 : index
    %22 = vector.load %arg7[%c0_14, %c0_15] : memref<1024x512xbf16, #tpu.memory_space<vmem>>, vector<1024x512xbf16>
    %cst_16 = arith.constant dense<0.000000e+00> : vector<128x512xf32>
    %23 = tpu.matmul %21, %22, %cst_16 {dimension_numbers = #tpu.dot_dimension_numbers<[1], [0], [0], [1], [0, 0, 1, 1], [], []>} : vector<128x1024xbf16>, vector<1024x512xbf16>, vector<128x512xf32> -> vector<128x512xf32>
    %c0_17 = arith.constant 0 : index
    %c0_18 = arith.constant 0 : index
    %24 = vector.load %arg8[%c0_17, %c0_18] : memref<1x512xf32, #tpu.memory_space<vmem>>, vector<1x512xf32>
    %25 = vector.broadcast %24 : vector<1x512xf32> to vector<128x512xf32>
    %26 = arith.addf %23, %25 : vector<128x512xf32>
    %cst_19 = arith.constant 0.000000e+00 : f32
    %27 = vector.broadcast %cst_19 : f32 to vector<128x512xf32>
    %28 = arith.maximumf %26, %27 : vector<128x512xf32>
    %29 = arith.truncf %28 : vector<128x512xf32> to vector<128x512xbf16>
    %c0_20 = arith.constant 0 : index
    %c0_21 = arith.constant 0 : index
    %30 = vector.load %arg9[%c0_20, %c0_21] : memref<512x256xbf16, #tpu.memory_space<vmem>>, vector<512x256xbf16>
    %cst_22 = arith.constant dense<0.000000e+00> : vector<128x256xf32>
    %31 = tpu.matmul %29, %30, %cst_22 {dimension_numbers = #tpu.dot_dimension_numbers<[1], [0], [0], [1], [0, 0, 1, 1], [], []>} : vector<128x512xbf16>, vector<512x256xbf16>, vector<128x256xf32> -> vector<128x256xf32>
    %c0_23 = arith.constant 0 : index
    %c0_24 = arith.constant 0 : index
    %32 = vector.load %arg10[%c0_23, %c0_24] : memref<1x256xf32, #tpu.memory_space<vmem>>, vector<1x256xf32>
    %33 = vector.broadcast %32 : vector<1x256xf32> to vector<128x256xf32>
    %34 = arith.addf %31, %33 : vector<128x256xf32>
    %cst_25 = arith.constant 0.000000e+00 : f32
    %35 = vector.broadcast %cst_25 : f32 to vector<128x256xf32>
    %36 = arith.maximumf %34, %35 : vector<128x256xf32>
    %37 = arith.truncf %36 : vector<128x256xf32> to vector<128x256xbf16>
    %c0_26 = arith.constant 0 : index
    %c0_27 = arith.constant 0 : index
    %38 = vector.load %arg11[%c0_26, %c0_27] : memref<256x128xbf16, #tpu.memory_space<vmem>>, vector<256x128xbf16>
    %cst_28 = arith.constant dense<0.000000e+00> : vector<128x128xf32>
    %39 = tpu.matmul %37, %38, %cst_28 {dimension_numbers = #tpu.dot_dimension_numbers<[1], [0], [0], [1], [0, 0, 1, 1], [], []>} : vector<128x256xbf16>, vector<256x128xbf16>, vector<128x128xf32> -> vector<128x128xf32>
    %c0_29 = arith.constant 0 : index
    %c0_30 = arith.constant 0 : index
    %40 = vector.load %arg12[%c0_29, %c0_30] : memref<1x128xf32, #tpu.memory_space<vmem>>, vector<1x128xf32>
    %41 = vector.broadcast %40 : vector<1x128xf32> to vector<128x128xf32>
    %42 = arith.addf %39, %41 : vector<128x128xf32>
    %cst_31 = arith.constant 0.000000e+00 : f32
    %43 = vector.broadcast %cst_31 : f32 to vector<128x128xf32>
    %44 = arith.maximumf %42, %43 : vector<128x128xf32>
    %c0_32 = arith.constant 0 : index
    %c0_33 = arith.constant 0 : index
    %45 = vector.load %arg13[%c0_32, %c0_33] : memref<1x128xf32, #tpu.memory_space<vmem>>, vector<1x128xf32>
    %46 = vector.broadcast %45 : vector<1x128xf32> to vector<128x128xf32>
    %47 = arith.mulf %44, %46 : vector<128x128xf32>
    %cst_34 = arith.constant dense<0.000000e+00> : vector<128xf32>
    %48 = vector.multi_reduction <add>, %47, %cst_34 [1] : vector<128x128xf32> to vector<128xf32>
    %49 = vector.shape_cast %48 : vector<128xf32> to vector<128x1xf32>
    %c0_35 = arith.constant 0 : index
    %c0_36 = arith.constant 0 : index
    %50 = vector.load %arg14[%c0_35, %c0_36] : memref<1x1xf32, #tpu.memory_space<vmem>>, vector<1x1xf32>
    %51 = vector.broadcast %50 : vector<1x1xf32> to vector<128x1xf32>
    %52 = arith.addf %49, %51 : vector<128x1xf32>
    %53 = arith.addf %2, %52 : vector<128x1xf32>
    %54 = arith.negf %53 : vector<128x1xf32>
    %55 = math.exp %54 : vector<128x1xf32>
    %cst_37 = arith.constant 1.000000e+00 : f32
    %56 = vector.broadcast %cst_37 : f32 to vector<128x1xf32>
    %57 = arith.addf %56, %55 : vector<128x1xf32>
    %58 = arith.divf %56, %57 : vector<128x1xf32>
    %c0_38 = arith.constant 0 : index
    %c0_39 = arith.constant 0 : index
    %59 = vector.load %arg15[%c0_38, %c0_39] : memref<128x1xf32, #tpu.memory_space<vmem>>, vector<128x1xf32>
    tpu.vector_store %arg15[%c0_38, %c0_39], %58 {strides = array<i32>} : memref<128x1xf32, #tpu.memory_space<vmem>>, vector<128x1xf32>,
    return
  }
  func.func @transform_0(%arg0: i32) -> (i32, i32) {
    %c0_i32 = arith.constant 0 : i32
    %c0_i32_0 = arith.constant 0 : i32
    return %arg0, %c0_i32 : i32, i32
  }
  func.func @transform_1(%arg0: i32) -> (i32, i32) {
    %c0_i32 = arith.constant 0 : i32
    %c0_i32_0 = arith.constant 0 : i32
    return %arg0, %c0_i32 : i32, i32
  }
  func.func @transform_2(%arg0: i32) -> (i32, i32) {
    %c0_i32 = arith.constant 0 : i32
    %c0_i32_0 = arith.constant 0 : i32
    %c0_i32_1 = arith.constant 0 : i32
    return %c0_i32, %c0_i32_0 : i32, i32
  }
  func.func @transform_3(%arg0: i32) -> (i32, i32) {
    %c0_i32 = arith.constant 0 : i32
    %c0_i32_0 = arith.constant 0 : i32
    %c0_i32_1 = arith.constant 0 : i32
    return %c0_i32, %c0_i32_0 : i32, i32
  }
  func.func @transform_4(%arg0: i32) -> (i32, i32) {
    %c0_i32 = arith.constant 0 : i32
    %c0_i32_0 = arith.constant 0 : i32
    %c0_i32_1 = arith.constant 0 : i32
    return %c0_i32, %c0_i32_0 : i32, i32
  }
  func.func @transform_5(%arg0: i32) -> (i32, i32) {
    %c0_i32 = arith.constant 0 : i32
    %c0_i32_0 = arith.constant 0 : i32
    %c0_i32_1 = arith.constant 0 : i32
    return %c0_i32, %c0_i32_0 : i32, i32
  }
  func.func @transform_6(%arg0: i32) -> (i32, i32) {
    %c0_i32 = arith.constant 0 : i32
    %c0_i32_0 = arith.constant 0 : i32
    %c0_i32_1 = arith.constant 0 : i32
    return %c0_i32, %c0_i32_0 : i32, i32
  }
  func.func @transform_7(%arg0: i32) -> (i32, i32) {
    %c0_i32 = arith.constant 0 : i32
    %c0_i32_0 = arith.constant 0 : i32
    %c0_i32_1 = arith.constant 0 : i32
    return %c0_i32, %c0_i32_0 : i32, i32
  }
  func.func @transform_8(%arg0: i32) -> (i32, i32) {
    %c0_i32 = arith.constant 0 : i32
    %c0_i32_0 = arith.constant 0 : i32
    %c0_i32_1 = arith.constant 0 : i32
    return %c0_i32, %c0_i32_0 : i32, i32
  }
  func.func @transform_9(%arg0: i32) -> (i32, i32) {
    %c0_i32 = arith.constant 0 : i32
    %c0_i32_0 = arith.constant 0 : i32
    %c0_i32_1 = arith.constant 0 : i32
    return %c0_i32, %c0_i32_0 : i32, i32
  }
  func.func @transform_10(%arg0: i32) -> (i32, i32) {
    %c0_i32 = arith.constant 0 : i32
    %c0_i32_0 = arith.constant 0 : i32
    %c0_i32_1 = arith.constant 0 : i32
    return %c0_i32, %c0_i32_0 : i32, i32
  }
  func.func @transform_11(%arg0: i32) -> (i32, i32) {
    %c0_i32 = arith.constant 0 : i32
    %c0_i32_0 = arith.constant 0 : i32
    %c0_i32_1 = arith.constant 0 : i32
    return %c0_i32, %c0_i32_0 : i32, i32
  }
  func.func @transform_12(%arg0: i32) -> (i32, i32) {
    %c0_i32 = arith.constant 0 : i32
    %c0_i32_0 = arith.constant 0 : i32
    %c0_i32_1 = arith.constant 0 : i32
    return %c0_i32, %c0_i32_0 : i32, i32
  }
  func.func @transform_13(%arg0: i32) -> (i32, i32) {
    %c0_i32 = arith.constant 0 : i32
    %c0_i32_0 = arith.constant 0 : i32
    %c0_i32_1 = arith.constant 0 : i32
    return %c0_i32, %c0_i32_0 : i32, i32
  }
  func.func @transform_14(%arg0: i32) -> (i32, i32) {
    %c0_i32 = arith.constant 0 : i32
    %c0_i32_0 = arith.constant 0 : i32
    return %arg0, %c0_i32 : i32, i32
  }
}

</mosaic_0001>

<bundles_post_ra>
// kernel: tpu_custom_call.1
= control target key start
LH: loop header
LB: loop body
LE: loop exit
PB: predicated region body
PF: predicated region fallthrough
CT: control target
= control target key end

     0   :  { %s7571_s0 = inlined_call_operand.vmem [shape: f32[128,40], index: 0, kind: input, shape index: {}]   ;;  %s7572_s1 = inlined_call_operand.vmem [shape: f32[128,128], index: 1, kind: input, shape index: {}]   ;;  %s7573_s2 = inlined_call_operand.vmem [shape: f32[1,128], index: 2, kind: input, shape index: {}]   ;;  %s7574_s3 = inlined_call_operand.vmem [shape: f32[1,128], index: 3, kind: input, shape index: {}]   ;;  %s7575_s4 = inlined_call_operand.hbm [shape: bf16[128,1024], index: 4, kind: input, shape index: {}]   ;;  %s7576_s5 = inlined_call_operand.vmem [shape: f32[1,1024], index: 5, kind: input, shape index: {}]   ;;  %s7577_s6 = inlined_call_operand.hbm [shape: bf16[1024,512], index: 6, kind: input, shape index: {}]   ;;  %s7578_s7 = inlined_call_operand.vmem [shape: f32[1,512], index: 7, kind: input, shape index: {}]   ;;  %s7579_s8 = inlined_call_operand.hbm [shape: bf16[512,256], index: 8, kind: input, shape index: {}]   ;;  %s7580_s9 = inlined_call_operand.vmem [shape: f32[1,256], index: 9, kind: input, shape index: {}]   ;;  %s7581_s10 = inlined_call_operand.hbm [shape: bf16[256,128], index: 10, kind: input, shape index: {}]   ;;  %s7582_s11 = inlined_call_operand.vmem [shape: f32[1,128], index: 11, kind: input, shape index: {}]   ;;  %s7583_s12 = inlined_call_operand.vmem [shape: f32[1,128], index: 12, kind: input, shape index: {}]   ;;  %s7584_s13 = inlined_call_operand.<no memory space> [shape: f32[1,1], index: 13, kind: input, shape index: {}]   ;;  %s7585_s14 = inlined_call_operand.vmem [shape: f32[128,1], index: 14, kind: output, shape index: {}]  }
   0x1   :  { %v19_v0 = vstv %s7584_s13 }
   0x2   :  { %20 = vst [vmem:[#allocation2] sm:$0x1] %v19_v0 }
   0x3   :  { %21 = vsyncpa [#allocation4], 0 }
   0x4   :  { %22 = vsyncpa [#allocation6], 0 }
   0x5   :  { %23 = vsyncpa [#allocation9], 0  ;;  %s6492_s15 = smov [#allocation5]   ;;  %s6398_s19 = scalar_lea.hbm %s7577_s6, 32768 }
   0x6   :  { %s51_s16 = sshll.u32 %s6492_s15, 4  ;;  %p6399_p0 = scmp.ne.s32.totalorder %s7577_s6, %s6398_s19  ;;  %s52_s16 = int_to_ptr.vmem [resolvable:$true] %s51_s16 }
   0x7   :  { %p6402_p1 = scmp.lt.u32.totalorder %s6398_s19, %s7577_s6 }
   0x9   :  { %p6404_p2 = pnand %p6402_p1, %p6399_p0 }
   0xb   :  { %6407 = shalt.err (!%p6404_p2)
}
   0xc   :  { %s6408_s13 = scalar_lea.vmem %s52_s16, 32768  ;;  %p6413_p4 = scmp.lt.s32.totalorder %s52_s16, %s52_s16 }
   0xd   :  { %p6409_p3 = scmp.ne.s32.totalorder %s52_s16, %s6408_s13  ;;  %p6414_p5 = scmp.lt.s32.totalorder %s6408_s13, %s6408_s13 }
   0xf   :  { %p6415_p6 = por %p6414_p5, %p6413_p4 }
  0x11   :  { %p6416_p7 = pnand %p6415_p6, %p6409_p3 }
  0x13   :  { %6419 = shalt.err (!%p6416_p7)
}
  0x14   :  { %s6493_s24 = smov 256   ;;  %s6494_s25 = smov 16  }
  0x15   :  { %57 = dma.hbm_to_vmem [thread:$0]  %s7577_s6, 32768, %s52_s16, [#allocation6], %s6493_s24, %s6493_s24, %s6494_s25  }
  0x16   :  { %s6495_s28 = smov [#allocation3]   ;;  %s6420_s17 = scalar_lea.hbm %s7575_s4, 8192 }
  0x17   :  { %s37_s29 = sshll.u32 %s6495_s28, 4  ;;  %p6421_p8 = scmp.ne.s32.totalorder %s7575_s4, %s6420_s17  ;;  %s38_s29 = int_to_ptr.vmem [resolvable:$true] %s37_s29 }
  0x18   :  { %p6424_p9 = scmp.lt.u32.totalorder %s6420_s17, %s7575_s4 }
  0x1a   :  { %p6426_p10 = pnand %p6424_p9, %p6421_p8 }
  0x1c   :  { %6429 = shalt.err (!%p6426_p10)
}
  0x1d   :  { %s6430_s22 = scalar_lea.vmem %s38_s29, 8192  ;;  %p6435_p12 = scmp.lt.s32.totalorder %s38_s29, %s38_s29 }
  0x1e   :  { %p6431_p11 = scmp.ne.s32.totalorder %s38_s29, %s6430_s22  ;;  %p6436_p13 = scmp.lt.s32.totalorder %s6430_s22, %s6430_s22 }
  0x20   :  { %p6437_p0 = por %p6436_p13, %p6435_p12 }
  0x22   :  { %p6438_p1 = pnand %p6437_p0, %p6431_p11 }
  0x24   :  { %6441 = shalt.err (!%p6438_p1)
}
  0x25   :  { %s6496_s6 = smov 512   ;;  %s6497_s16 = smov 32  }
  0x26   :  { %43 = dma.hbm_to_vmem [thread:$0]  %s7575_s4, 8192, %s38_s29, [#allocation4], %s6496_s6, %s6496_s6, %s6497_s16  }
  0x27   :  { %s6498_s24 = smov [#allocation7]   ;;  %s6442_s28 = scalar_lea.hbm %s7579_s8, 8192 }
  0x28   :  { %s65_s25 = sshll.u32 %s6498_s24, 4  ;;  %p6443_p2 = scmp.ne.s32.totalorder %s7579_s8, %s6442_s28  ;;  %s66_s25 = int_to_ptr.vmem [resolvable:$true] %s65_s25 }
  0x29   :  { %p6446_p3 = scmp.lt.u32.totalorder %s6442_s28, %s7579_s8 }
  0x2b   :  { %p6448_p4 = pnand %p6446_p3, %p6443_p2 }
  0x2d   :  { %6451 = shalt.err (!%p6448_p4)
}
  0x2e   :  { %s6452_s19 = scalar_lea.vmem %s66_s25, 8192  ;;  %p6457_p6 = scmp.lt.s32.totalorder %s66_s25, %s66_s25 }
  0x2f   :  { %p6453_p5 = scmp.ne.s32.totalorder %s66_s25, %s6452_s19  ;;  %p6458_p7 = scmp.lt.s32.totalorder %s6452_s19, %s6452_s19 }
  0x31   :  { %p6459_p8 = por %p6458_p7, %p6457_p6 }
  0x33   :  { %p6460_p9 = pnand %p6459_p8, %p6453_p5 }
  0x35   :  { %6463 = shalt.err (!%p6460_p9)
}
  0x36   :  { %s6499_s4 = smov 128   ;;  %s6500_s29 = smov 8  }
  0x37   :  { %71 = dma.hbm_to_vmem [thread:$0]  %s7579_s8, 8192, %s66_s25, [#allocation6], %s6499_s4, %s6499_s4, %s6500_s29  }
  0x38   :  { %s6501_s22 = smov [#allocation8]   ;;  %s6464_s13 = scalar_lea.hbm %s7581_s10, 2048 }
  0x39   :  { %s79_s6 = sshll.u32 %s6501_s22, 4  ;;  %p6465_p10 = scmp.ne.s32.totalorder %s7581_s10, %s6464_s13  ;;  %s80_s6 = int_to_ptr.vmem [resolvable:$true] %s79_s6 }
  0x3a   :  { %p6468_p11 = scmp.lt.u32.totalorder %s6464_s13, %s7581_s10 }
  0x3c   :  { %p6470_p12 = pnand %p6468_p11, %p6465_p10 }
  0x3e   :  { %6473 = shalt.err (!%p6470_p12)
}
  0x3f   :  { %s6474_s30 = scalar_lea.vmem %s80_s6, 2048  ;;  %p6479_p0 = scmp.lt.s32.totalorder %s80_s6, %s80_s6 }
  0x40   :  { %p6475_p13 = scmp.ne.s32.totalorder %s80_s6, %s6474_s30  ;;  %p6480_p1 = scmp.lt.s32.totalorder %s6474_s30, %s6474_s30 }
  0x42   :  { %p6481_p2 = por %p6480_p1, %p6479_p0 }
  0x44   :  { %p6482_p3 = pnand %p6481_p2, %p6475_p13 }
  0x46   :  { %6485 = shalt.err (!%p6482_p3)
}
  0x47   :  { %s6502_s8 = smov 64   ;;  %s6503_s25 = smov 4  }
  0x48   :  { %85 = dma.hbm_to_vmem [thread:$0]  %s7581_s10, 2048, %s80_s6, [#allocation9], %s6502_s8, %s6502_s8, %s6503_s25  }
  0x49   :  { %6486 = dma.done.wait [#allocation4], 8192  }
  0x4a   :  { %6487 = vsyncadd [#allocation4], 4294959104 }
  0x4b   :  { %6488 = dma.done.wait [#allocation6], 40960  }
  0x4c   :  { %6489 = vsyncadd [#allocation6], 4294926336 }
  0x4d   :  { %6490 = dma.done.wait [#allocation9], 2048  }
  0x4e   :  { %6491 = vsyncadd [#allocation9], 4294965248  ;;  %v6504_v1 = vmov 0   ;;  %v242_v2 = vld [vmem:[#allocation3] sm:$0xff]  ;;  %v209_v15 = vld [vmem:[%s7574_s3] sm:$0x1]  ;;  %v213_v21 = vlaneseq }
  0x4f   :  { %700 = vmatprep.mubr.bf16.mxu0 %v6504_v1  ;;  %740 = vmatprep.mubr.bf16.mxu1 %v6504_v1  ;;  %v246_v3 = vld [vmem:[#allocation3 + $0x20] sm:$0xff]  ;;  %v210_v16 = vadd.f32 1e-05, %v209_v15  ;;  %v6650_v36 = vld [vmem:[%s7573_s2] ss:$0 sm:$0xff]  ;;  %v243_v49 = vld [vmem:[#allocation3 + $0x8] sm:$0xff] }
  0x50   :  { %v250_v4 = vld [vmem:[#allocation3 + $0x40] sm:$0xff]  ;;  %v5004_v5 = vcombine.high %v242_v2, %v246_v3  ;;  %v5003_v6 = vcombine.low %v242_v2, %v246_v3  ;;  %v6636_v26 = vshrl.u32 %v213_v21, 7  ;;  %v244_v50 = vld [vmem:[#allocation3 + $0x10] sm:$0xff]  ;;  %v247_v54 = vld [vmem:[#allocation3 + $0x28] sm:$0xff]  ;;  %vm121_vm0 = vcmask 326656  }
  0x51   :  { %v254_v7 = vld [vmem:[#allocation3 + $0x60] sm:$0xff]  ;;  %6331 = vrsqrt.f32 %v210_v16  ;;  %v248_v51 = vld [vmem:[#allocation3 + $0x30] sm:$0xff]  ;;  %v5006_v63 = vcombine.high %v243_v49, %v247_v54  ;;  %v251_v0 = vld [vmem:[#allocation3 + $0x48] sm:$0xff]  ;;  %vm4978_vm1 = vcmask 7168  }
  0x52   :  { %v5012_v8 = vcombine.high %v250_v4, %v254_v7  ;;  %v258_v9 = vld [vmem:[#allocation3 + $0x80] sm:$0xff]  ;;  %668 = vmatprep.subr.bf16.mxu0 %v5004_v5  ;;  %5486 = vmatprep.subr.bf16.mxu1 %v5004_v5  ;;  %v5011_v11 = vcombine.low %v250_v4, %v254_v7  ;;  %v6639_v31 = vsub.s32 0, %v6636_v26  ;;  %v172_v56 = vld [vmem:[%s7572_s1 + $0x10] sm:$0xff]  ;;  %v173_v57 = vld [vmem:[%s7572_s1 + $0x18] sm:$0xff]  ;;  %v5008_v62 = vcombine.high %v244_v50, %v248_v51 }
  0x53   :  { %v262_v10 = vld [vmem:[#allocation3 + $0xa0] sm:$0xff]  ;;  %669 = vmatpush1.bf16.msra.mxu0 %v5003_v6  ;;  %5494 = vmatpush1.bf16.msra.mxu1 %v5003_v6  ;;  %v180_v60 = vld [vmem:[%s7572_s1 + $0x50] sm:$0xff]  ;;  %v181_v61 = vld [vmem:[%s7572_s1 + $0x58] sm:$0xff]  ;;  %v195_v3 = vsub.f32 %v172_v56, %v6650_v36  ;;  %v196_v4 = vsub.f32 %v173_v57, %v6650_v36  ;;  %v5007_v16 = vcombine.low %v244_v50, %v248_v51 }
  0x54   :  { %670 = vmatprep.subr.bf16.mxu0 %v5012_v8  ;;  %v5020_v12 = vcombine.high %v258_v9, %v262_v10  ;;  %v266_v13 = vld [vmem:[#allocation3 + $0xc0] sm:$0xff]  ;;  %5487 = vmatprep.subr.bf16.mxu1 %v5012_v8  ;;  %v5019_v17 = vcombine.low %v258_v9, %v262_v10  ;;  %v255_v5 = vld [vmem:[#allocation3 + $0x68] sm:$0xff]  ;;  %v203_v7 = vsub.f32 %v180_v60, %v6650_v36  ;;  %v252_v9 = vld [vmem:[#allocation3 + $0x50] sm:$0xff] }
  0x55   :  { %v270_v14 = vld [vmem:[#allocation3 + $0xe0] sm:$0xff]  ;;  %v204_v8 = vsub.f32 %v181_v61, %v6650_v36  ;;  %v256_v10 = vld [vmem:[#allocation3 + $0x70] sm:$0xff]  ;;  %v259_v15 = vld [vmem:[#allocation3 + $0x88] sm:$0xff] }
  0x56   :  { %v5028_v18 = vcombine.high %v266_v13, %v270_v14  ;;  %v274_v19 = vld [vmem:[#allocation3 + $0x100] sm:$0xff]  ;;  %v5027_v22 = vcombine.low %v266_v13, %v270_v14  ;;  %v5014_v14 = vcombine.high %v251_v0, %v255_v5  ;;  %v276_v57 = vld [vmem:[#allocation3 + $0x110] sm:$0xff] }
  0x57   :  { %671 = vmatpush1.bf16.msra.mxu0 %v5011_v11  ;;  %5495 = vmatpush1.bf16.msra.mxu1 %v5011_v11  ;;  %v278_v20 = vld [vmem:[#allocation3 + $0x120] sm:$0xff]  ;;  %v5005_v11 = vcombine.low %v243_v49, %v247_v54  ;;  %v275_v49 = vld [vmem:[#allocation3 + $0x108] sm:$0xff]  ;;  %v185_v61 = vld [vmem:[%s7572_s1 + $0x78] sm:$0xff] }
  0x58   :  { %672 = vmatprep.subr.bf16.mxu0 %v5020_v12  ;;  %5488 = vmatprep.subr.bf16.mxu1 %v5020_v12  ;;  %v5036_v23 = vcombine.high %v274_v19, %v278_v20  ;;  %v282_v24 = vld [vmem:[#allocation3 + $0x140] sm:$0xff]  ;;  %v5035_v27 = vcombine.low %v274_v19, %v278_v20  ;;  %v263_v19 = vld [vmem:[#allocation3 + $0xa8] sm:$0xff]  ;;  %v5016_v20 = vcombine.high %v252_v9, %v256_v10 }
  0x59   :  { %v286_v25 = vld [vmem:[#allocation3 + $0x160] sm:$0xff]  ;;  %v184_v60 = vld [vmem:[%s7572_s1 + $0x70] sm:$0xff] }
  0x5a   :  { %v5044_v28 = vcombine.high %v282_v24, %v286_v25  ;;  %v290_v29 = vld [vmem:[#allocation3 + $0x180] sm:$0xff]  ;;  %v5043_v33 = vcombine.low %v282_v24, %v286_v25  ;;  %v264_v24 = vld [vmem:[#allocation3 + $0xb0] sm:$0xff]  ;;  %v5013_v25 = vcombine.low %v251_v0, %v255_v5 }
  0x5b   :  { %673 = vmatpush1.bf16.msra.mxu0 %v5019_v17  ;;  %5496 = vmatpush1.bf16.msra.mxu1 %v5019_v17  ;;  %v294_v30 = vld [vmem:[#allocation3 + $0x1a0] sm:$0xff]  ;;  %v6332_v32 = vpop.eup %6331 }
  0x5c   :  { %674 = vmatprep.subr.bf16.mxu0 %v5028_v18  ;;  %5489 = vmatprep.subr.bf16.mxu1 %v5028_v18  ;;  %v170_v34 = vld [vmem:[%s7572_s1] sm:$0xff]  ;;  %v171_v35 = vld [vmem:[%s7572_s1 + $0x8] sm:$0xff]  ;;  %v5052_v37 = vcombine.high %v290_v29, %v294_v30  ;;  %v6661_v44 = vrot.slane %v6332_v32, %v6639_v31  ;;  %v5051_v45 = vcombine.low %v290_v29, %v294_v30 }
  0x5d   :  { %v178_v38 = vld [vmem:[%s7572_s1 + $0x40] sm:$0xff]  ;;  %v179_v39 = vld [vmem:[%s7572_s1 + $0x48] sm:$0xff]  ;;  %v193_v42 = vsub.f32 %v170_v34, %v6650_v36  ;;  %v194_v43 = vsub.f32 %v171_v35, %v6650_v36  ;;  %v5022_v29 = vcombine.high %v259_v15, %v263_v19  ;;  %v5015_v32 = vcombine.low %v252_v9, %v256_v10 }
  0x5e   :  { %v298_v40 = vld [vmem:[#allocation3 + $0x1c0] sm:$0xff]  ;;  %v201_v46 = vsub.f32 %v178_v38, %v6650_v36  ;;  %v202_v47 = vsub.f32 %v179_v39, %v6650_v36  ;;  %v220_v17 = vmul.f32 %v6661_v44, %v195_v3  ;;  %v221_v18 = vmul.f32 %v6661_v44, %v196_v4  ;;  %v267_v30 = vld [vmem:[#allocation3 + $0xc8] sm:$0xff] }
  0x5f   :  { %675 = vmatpush1.bf16.msra.mxu0 %v5027_v22  ;;  %5497 = vmatpush1.bf16.msra.mxu1 %v5027_v22  ;;  %v302_v41 = vld [vmem:[#allocation3 + $0x1e0] sm:$0xff]  ;;  %v218_v52 = vmul.f32 %v6661_v44, %v193_v42  ;;  %v219_v53 = vmul.f32 %v6661_v44, %v194_v43  ;;  %v228_v21 = vmul.f32 %v6661_v44, %v203_v7  ;;  %v268_v42 = vld [vmem:[#allocation3 + $0xd0] sm:$0xff]  ;;  %v287_v7 = vld [vmem:[#allocation3 + $0x168] sm:$0xff] }
  0x60   :  { %676 = vmatprep.subr.bf16.mxu0 %v5036_v23  ;;  %5490 = vmatprep.subr.bf16.mxu1 %v5036_v23  ;;  %v5060_v48 = vcombine.high %v298_v40, %v302_v41  ;;  %v5059_v55 = vcombine.low %v298_v40, %v302_v41  ;;  %v226_v58 = vmul.f32 %v6661_v44, %v201_v46  ;;  %v174_v12 = vld [vmem:[%s7572_s1 + $0x20] sm:$0xff]  ;;  %v175_v13 = vld [vmem:[%s7572_s1 + $0x28] sm:$0xff]  ;;  %v260_v23 = vld [vmem:[#allocation3 + $0x90] sm:$0xff] }
  0x61   :  { %v227_v59 = vmul.f32 %v6661_v44, %v202_v47  ;;  %v6681_v2 = vpack.c.bf16 %v219_v53, %v218_v52  ;;  %v229_v22 = vmul.f32 %v6661_v44, %v204_v8  ;;  %v197_v34 = vsub.f32 %v174_v12, %v6650_v36  ;;  %v272_v43 = vld [vmem:[#allocation3 + $0xf0] sm:$0xff]  ;;  %v279_v53 = vld [vmem:[#allocation3 + $0x128] sm:$0xff] }
  0x62   :  { %v198_v35 = vsub.f32 %v175_v13, %v6650_v36  ;;  %v5024_v38 = vcombine.high %v260_v23, %v264_v24  ;;  %v176_v46 = vld [vmem:[%s7572_s1 + $0x30] sm:$0xff]  ;;  %v177_v47 = vld [vmem:[%s7572_s1 + $0x38] sm:$0xff]  ;;  %v5023_v50 = vcombine.low %v260_v23, %v264_v24  ;;  %v5032_v54 = vcombine.high %v268_v42, %v272_v43 }
  0x63   :  { %677 = vmatpush1.bf16.msra.mxu0 %v5035_v27  ;;  %5498 = vmatpush1.bf16.msra.mxu1 %v5035_v27  ;;  %v6685_v6 = vpack.c.bf16 %v227_v59, %v226_v58  ;;  %v182_v27 = vld [vmem:[%s7572_s1 + $0x60] sm:$0xff]  ;;  %v6713_v39 = vpack.c.bf16 %v229_v22, %v228_v21  ;;  %v222_v51 = vmul.f32 %v6661_v44, %v197_v34  ;;  %v280_v58 = vld [vmem:[#allocation3 + $0x130] sm:$0xff] }
  0x64   :  { %678 = vmatprep.subr.bf16.mxu0 %v5044_v28  ;;  %5491 = vmatprep.subr.bf16.mxu1 %v5044_v28  ;;  %v183_v28 = vld [vmem:[%s7572_s1 + $0x68] sm:$0xff]  ;;  %v205_v40 = vsub.f32 %v182_v27, %v6650_v36  ;;  %v223_v52 = vmul.f32 %v6661_v44, %v198_v35  ;;  %v5031_v0 = vcombine.low %v268_v42, %v272_v43  ;;  %v284_v12 = vld [vmem:[#allocation3 + $0x150] sm:$0xff]  ;;  %v245_v42 = vld [vmem:[#allocation3 + $0x18] sm:$0xff] }
  0x65   :  { %v206_v41 = vsub.f32 %v183_v28, %v6650_v36  ;;  %v199_v4 = vsub.f32 %v176_v46, %v6650_v36  ;;  %v200_v5 = vsub.f32 %v177_v47, %v6650_v36  ;;  %v5040_v8 = vcombine.high %v276_v57, %v280_v58  ;;  %v288_v13 = vld [vmem:[#allocation3 + $0x170] sm:$0xff]  ;;  %v299_v28 = vld [vmem:[#allocation3 + $0x1c8] sm:$0xff] }
  0x66   :  { %v6737_v3 = vpack.c.bf16 %v223_v52, %v222_v51  ;;  %v207_v10 = vsub.f32 %v184_v60, %v6650_v36  ;;  %v5048_v21 = vcombine.high %v284_v12, %v288_v13  ;;  %v292_v23 = vld [vmem:[#allocation3 + $0x190] sm:$0xff]  ;;  %v257_v51 = vld [vmem:[#allocation3 + $0x78] sm:$0xff] }
  0x67   :  { %679 = vmatpush1.bf16.msra.mxu0 %v5043_v33  ;;  %5499 = vmatpush1.bf16.msra.mxu1 %v5043_v33  ;;  %v6709_v33 = vpack.c.bf16 %v221_v18, %v220_v17  ;;  %v231_v56 = vmul.f32 %v6661_v44, %v206_v41  ;;  %v5039_v17 = vcombine.low %v276_v57, %v280_v58  ;;  %v296_v24 = vld [vmem:[#allocation3 + $0x1b0] sm:$0xff]  ;;  %v269_v60 = vld [vmem:[#allocation3 + $0xd8] sm:$0xff] }
  0x68   :  { %680 = vmatprep.subr.bf16.mxu0 %v5052_v37  ;;  %5492 = vmatprep.subr.bf16.mxu1 %v5052_v37  ;;  %v271_v37 = vld [vmem:[#allocation3 + $0xe8] sm:$0xff]  ;;  %v224_v18 = vmul.f32 %v6661_v44, %v199_v4  ;;  %v5056_v34 = vcombine.high %v292_v23, %v296_v24  ;;  %v5055_v41 = vcombine.low %v292_v23, %v296_v24  ;;  %v5835_v52 = vld [vmem:[#allocation5] ss:$16 sps:$4 sm:$0xff]   ;;  %v301_v24 = vld [vmem:[#allocation3 + $0x1d8] sm:$0xff] }
  0x69   :  { %v5029_v59 = vcombine.low %v267_v30, %v271_v37  ;;  %v5841_v58 = vld [vmem:[#allocation5 + $0x20] ss:$16 sps:$4 sm:$0xff]  }
  0x6b   :  { %681 = vmatpush1.bf16.msra.mxu0 %v5051_v45  ;;  %5500 = vmatpush1.bf16.msra.mxu1 %v5051_v45  ;;  %v5021_v45 = vcombine.low %v259_v15, %v263_v19  ;;  %v225_v19 = vmul.f32 %v6661_v44, %v200_v5  ;;  %v277_v5 = vld [vmem:[#allocation3 + $0x118] sm:$0xff] }
  0x6c   :  { %682 = vmatprep.subr.bf16.mxu0 %v5060_v48  ;;  %5493 = vmatprep.subr.bf16.mxu1 %v5060_v48  ;;  %v5030_v48 = vcombine.high %v267_v30, %v271_v37  ;;  %v300_v37 = vld [vmem:[#allocation3 + $0x1d0] sm:$0xff] }
  0x6d   :  { %v6753_v30 = vpack.c.bf16 %v225_v19, %v224_v18  ;;  %v293_v19 = vld [vmem:[#allocation3 + $0x198] sm:$0xff] }
  0x6f   :  { %683 = vmatpush1.bf16.msra.mxu0 %v5059_v55  ;;  %5501 = vmatpush1.bf16.msra.mxu1 %v5059_v55  ;;  %v230_v55 = vmul.f32 %v6661_v44, %v205_v40 }
  0x70   :  { %894 = vmatprep.subr.bf16.mxu0 %v5008_v62  ;;  %781 = vmatprep.subr.bf16.mxu1 %v5006_v63  ;;  %v5038_v62 = vcombine.high %v275_v49, %v279_v53  ;;  %v283_v63 = vld [vmem:[#allocation3 + $0x148] sm:$0xff] }
  0x71   :  { %v6741_v9 = vpack.c.bf16 %v231_v56, %v230_v55  ;;  %v5046_v15 = vcombine.high %v283_v63, %v287_v7  ;;  %v265_v55 = vld [vmem:[#allocation3 + $0xb8] sm:$0xff]  ;;  %v5843_v56 = vld [vmem:[#allocation5 + $0x24] ss:$16 sps:$4 sm:$0xff]  }
  0x72   :  { %701 = vmatmul.mubr.bf16.vlgmr.msra.gmra.mrb[0].mxu0 %v6681_v2  ;;  %741 = vmatmul.mubr.bf16.vlgmr.msra.gmra.mrb[0].mxu1 %v6685_v6 }
  0x73   :  { %710 = vmatprep.mubr.bf16.mxu0 %v6504_v1  ;;  %782 = vmatpush1.bf16.msra.mxu1 %v5005_v11  ;;  %v208_v11 = vsub.f32 %v185_v61, %v6650_v36  ;;  %v232_v36 = vmul.f32 %v6661_v44, %v207_v10  ;;  %v273_v61 = vld [vmem:[#allocation3 + $0xf8] sm:$0xff] }
  0x74   :  { %750 = vmatprep.mubr.bf16.mxu1 %v6504_v1  ;;  %783 = vmatprep.subr.bf16.mxu1 %v5014_v14  ;;  %v5037_v14 = vcombine.low %v275_v49, %v279_v53  ;;  %v5837_v49 = vld [vmem:[#allocation5 + $0x4] ss:$16 sps:$4 sm:$0xff]   ;;  %v5034_v10 = vcombine.high %v269_v60, %v273_v61 }
  0x75   :  { %895 = vmatpush1.bf16.msra.mxu0 %v5007_v16  ;;  %v291_v16 = vld [vmem:[#allocation3 + $0x188] sm:$0xff]  ;;  %v233_v22 = vmul.f32 %v6661_v44, %v208_v11  ;;  %v304_v44 = vld [vmem:[#allocation3 + $0x1f0] sm:$0xff] }
  0x76   :  { %896 = vmatprep.subr.bf16.mxu0 %v5016_v20  ;;  %v295_v20 = vld [vmem:[#allocation3 + $0x1a8] sm:$0xff]  ;;  %v5064_v43 = vcombine.high %v300_v37, %v304_v44  ;;  %v5063_v47 = vcombine.low %v300_v37, %v304_v44  ;;  %v5853_v11 = vld [vmem:[#allocation5 + $0x60] ss:$16 sps:$4 sm:$0xff]  }
  0x77   :  { %784 = vmatpush1.bf16.msra.mxu1 %v5013_v25  ;;  %v5045_v25 = vcombine.low %v283_v63, %v287_v7  ;;  %v5054_v27 = vcombine.high %v291_v16, %v295_v20  ;;  %v6755_v35 = vpack.c.bf16 %v233_v22, %v232_v36  ;;  %v281_v7 = vld [vmem:[#allocation3 + $0x138] sm:$0xff]  ;;  %v5865_v22 = vld [vmem:[#allocation5 + $0xa0] ss:$16 sps:$4 sm:$0xff]  }
  0x78   :  { %785 = vmatprep.subr.bf16.mxu1 %v5022_v29  ;;  %v5047_v29 = vcombine.low %v284_v12, %v288_v13  ;;  %v5033_v12 = vcombine.low %v269_v60, %v273_v61  ;;  %v285_v13 = vld [vmem:[#allocation3 + $0x158] sm:$0xff]  ;;  %v5041_v18 = vcombine.low %v277_v5, %v281_v7  ;;  %v5933_v60 = vld [vmem:[#allocation5 + $0x204] ss:$16 sps:$4 sm:$0xff]  }
  0x79   :  { %897 = vmatpush1.bf16.msra.mxu0 %v5015_v32  ;;  %v303_v32 = vld [vmem:[#allocation3 + $0x1e8] sm:$0xff] }
  0x7a   :  { %711 = vmatmul.mubr.bf16.gmra.mrb[4].mxu0 %v6709_v33  ;;  %898 = vmatprep.subr.bf16.mxu0 %v5024_v38  ;;  %v5053_v38 = vcombine.low %v291_v16, %v295_v20  ;;  %v5062_v40 = vcombine.high %v299_v28, %v303_v32  ;;  %v5061_v46 = vcombine.low %v299_v28, %v303_v32  ;;  %v297_v20 = vld [vmem:[#allocation3 + $0x1b8] sm:$0xff] }
  0x7b   :  { %720 = vmatprep.mubr.bf16.mxu0 %v6504_v1  ;;  %751 = vmatmul.mubr.bf16.gmra.mrb[4].mxu1 %v6713_v39  ;;  %v5042_v16 = vcombine.high %v277_v5, %v281_v7  ;;  %v5058_v28 = vcombine.high %v293_v19, %v297_v20  ;;  %v5057_v32 = vcombine.low %v293_v19, %v297_v20  ;;  %v5840_v44 = vld [vmem:[#allocation5 + $0xc] ss:$16 sps:$4 sm:$0xff]   ;;  %v5844_v61 = vld [vmem:[#allocation5 + $0x28] ss:$16 sps:$4 sm:$0xff]  }
  0x7c   :  { %786 = vmatpush1.bf16.msra.mxu1 %v5021_v45  ;;  %760 = vmatprep.mubr.bf16.mxu1 %v6504_v1  ;;  %v249_v45 = vld [vmem:[#allocation3 + $0x38] sm:$0xff] }
  0x7d   :  { %787 = vmatprep.subr.bf16.mxu1 %v5030_v48  ;;  %899 = vmatpush1.bf16.msra.mxu0 %v5023_v50  ;;  %v5010_v48 = vcombine.high %v245_v42, %v249_v45  ;;  %v253_v50 = vld [vmem:[#allocation3 + $0x58] sm:$0xff]  ;;  %v5009_v53 = vcombine.low %v245_v42, %v249_v45  ;;  %v5883_v42 = vld [vmem:[#allocation5 + $0x100] ss:$16 sps:$4 sm:$0xff]  }
  0x7e   :  { %900 = vmatprep.subr.bf16.mxu0 %v5032_v54  ;;  %v261_v54 = vld [vmem:[#allocation3 + $0x98] sm:$0xff]  ;;  %v5018_v57 = vcombine.high %v253_v50, %v257_v51  ;;  %v5889_v45 = vld [vmem:[#allocation5 + $0x120] ss:$16 sps:$4 sm:$0xff]  }
  0x7f   :  { %v5026_v63 = vcombine.high %v261_v54, %v265_v55  ;;  %v5025_v4 = vcombine.low %v261_v54, %v265_v55  ;;  %v5921_v54 = vld [vmem:[#allocation5 + $0x1c4] ss:$16 sps:$4 sm:$0xff]   ;;  %v5919_v55 = vld [vmem:[#allocation5 + $0x1c0] ss:$16 sps:$4 sm:$0xff]   ;;  %v5864_v5 = vld [vmem:[#allocation5 + $0x8c] ss:$16 sps:$4 sm:$0xff]  }
  0x80   :  { %788 = vmatpush1.bf16.msra.mxu1 %v5029_v59  ;;  %v5017_v59 = vcombine.low %v253_v50, %v257_v51  ;;  %v5909_v50 = vld [vmem:[#allocation5 + $0x184] ss:$16 sps:$4 sm:$0xff]   ;;  %v5907_v51 = vld [vmem:[#allocation5 + $0x180] ss:$16 sps:$4 sm:$0xff]   ;;  %v5870_v7 = vld [vmem:[#allocation5 + $0xac] ss:$16 sps:$4 sm:$0xff]  }
  0x81   :  { %789 = vmatprep.subr.bf16.mxu1 %v5038_v62  ;;  %901 = vmatpush1.bf16.msra.mxu0 %v5031_v0  ;;  %v5849_v62 = vld [vmem:[#allocation5 + $0x44] ss:$16 sps:$4 sm:$0xff]   ;;  %v5847_v0 = vld [vmem:[#allocation5 + $0x40] ss:$16 sps:$4 sm:$0xff]   ;;  %v5912_v19 = vld [vmem:[#allocation5 + $0x18c] ss:$16 sps:$4 sm:$0xff]  }
  0x82   :  { %721 = vmatmul.mubr.bf16.gmra.mrb[8].mxu0 %v6737_v3  ;;  %902 = vmatprep.subr.bf16.mxu0 %v5040_v8  ;;  %v5855_v8 = vld [vmem:[#allocation5 + $0x64] ss:$16 sps:$4 sm:$0xff]   ;;  %v5910_v20 = vld [vmem:[#allocation5 + $0x188] ss:$16 sps:$4 sm:$0xff]  }
  0x83   :  { %730 = vmatprep.mubr.bf16.mxu0 %v6504_v1  ;;  %761 = vmatmul.mubr.bf16.gmra.mrb[8].mxu1 %v6741_v9 }
  0x84   :  { %790 = vmatpush1.bf16.msra.mxu1 %v5037_v14  ;;  %770 = vmatprep.mubr.bf16.mxu1 %v6504_v1  ;;  %v289_v14 = vld [vmem:[#allocation3 + $0x178] sm:$0xff] }
  0x85   :  { %791 = vmatprep.subr.bf16.mxu1 %v5046_v15  ;;  %903 = vmatpush1.bf16.msra.mxu0 %v5039_v17  ;;  %v5861_v15 = vld [vmem:[#allocation5 + $0x84] ss:$16 sps:$4 sm:$0xff]   ;;  %v5859_v17 = vld [vmem:[#allocation5 + $0x80] ss:$16 sps:$4 sm:$0xff]   ;;  %v5050_v36 = vcombine.high %v285_v13, %v289_v14  ;;  %v5049_v23 = vcombine.low %v285_v13, %v289_v14  ;;  %v5888_v13 = vld [vmem:[#allocation5 + $0x10c] ss:$16 sps:$4 sm:$0xff]  }
  0x86   :  { %904 = vmatprep.subr.bf16.mxu0 %v5048_v21  ;;  %v5867_v21 = vld [vmem:[#allocation5 + $0xa4] ss:$16 sps:$4 sm:$0xff]   ;;  %v5886_v14 = vld [vmem:[#allocation5 + $0x108] ss:$16 sps:$4 sm:$0xff]  }
  0x88   :  { %792 = vmatpush1.bf16.msra.mxu1 %v5045_v25  ;;  %v305_v25 = vld [vmem:[#allocation3 + $0x1f8] sm:$0xff] }
  0x89   :  { %793 = vmatprep.subr.bf16.mxu1 %v5054_v27  ;;  %905 = vmatpush1.bf16.msra.mxu0 %v5047_v29  ;;  %v5873_v27 = vld [vmem:[#allocation5 + $0xc4] ss:$16 sps:$4 sm:$0xff]   ;;  %v5871_v29 = vld [vmem:[#allocation5 + $0xc0] ss:$16 sps:$4 sm:$0xff]   ;;  %v5066_v37 = vcombine.high %v301_v24, %v305_v25 }
  0x8a   :  { %731 = vmatmul.mubr.bf16.gmra.mrb[12].mxu0 %v6753_v30  ;;  %906 = vmatprep.subr.bf16.mxu0 %v5056_v34  ;;  %v5879_v34 = vld [vmem:[#allocation5 + $0xe4] ss:$16 sps:$4 sm:$0xff]  }
  0x8b   :  { %771 = vmatmul.mubr.bf16.gmra.mrb[12].mxu1 %v6755_v35  ;;  %926 = vmatprep.mubr.bf16.mxu0 %v6504_v1 }
  0x8c   :  { %794 = vmatpush1.bf16.msra.mxu1 %v5053_v38  ;;  %813 = vmatprep.mubr.bf16.mxu1 %v6504_v1  ;;  %v5877_v38 = vld [vmem:[#allocation5 + $0xe0] ss:$16 sps:$4 sm:$0xff]  }
  0x8d   :  { %795 = vmatprep.subr.bf16.mxu1 %v5062_v40  ;;  %907 = vmatpush1.bf16.msra.mxu0 %v5055_v41  ;;  %v5065_v40 = vcombine.low %v301_v24, %v305_v25  ;;  %v5885_v41 = vld [vmem:[#allocation5 + $0x104] ss:$16 sps:$4 sm:$0xff]   ;;  %v5936_v24 = vld [vmem:[#allocation5 + $0x20c] ss:$16 sps:$4 sm:$0xff]  }
  0x8e   :  { %908 = vmatprep.subr.bf16.mxu0 %v5064_v43  ;;  %v5891_v43 = vld [vmem:[#allocation5 + $0x124] ss:$16 sps:$4 sm:$0xff]  }
  0x90   :  { %796 = vmatpush1.bf16.msra.mxu1 %v5061_v46  ;;  %v5897_v46 = vld [vmem:[#allocation5 + $0x144] ss:$16 sps:$4 sm:$0xff]  }
  0x91   :  { %909 = vmatpush1.bf16.msra.mxu0 %v5063_v47  ;;  %1007 = vmatprep.subr.bf16.mxu1 %v5010_v48  ;;  %v5895_v47 = vld [vmem:[#allocation5 + $0x140] ss:$16 sps:$4 sm:$0xff]   ;;  %v5903_v48 = vld [vmem:[#allocation5 + $0x164] ss:$16 sps:$4 sm:$0xff]  }
  0x92   :  { %2870 = vmatprep.subr.bf16.mxu0 %v5837_v49  ;;  %v5901_v49 = vld [vmem:[#allocation5 + $0x160] ss:$16 sps:$4 sm:$0xff]  }
  0x93   :  { %814 = vmatmul.mubr.bf16.vlgmr.msra.gmra.mrb[16].mxu1 %v6681_v2 }
  0x94   :  { %823 = vmatprep.mubr.bf16.mxu1 %v6504_v1  ;;  %927 = vmatmul.mubr.bf16.vlgmr.msra.gmra.mrb[16].mxu0 %v6681_v2 }
  0x95   :  { %1008 = vmatpush1.bf16.msra.mxu1 %v5009_v53  ;;  %936 = vmatprep.mubr.bf16.mxu0 %v6504_v1  ;;  %v5913_v53 = vld [vmem:[#allocation5 + $0x1a0] ss:$16 sps:$4 sm:$0xff]  }
  0x96   :  { %1009 = vmatprep.subr.bf16.mxu1 %v5018_v57  ;;  %2871 = vmatpush1.bf16.msra.mxu0 %v5835_v52  ;;  %v5915_v52 = vld [vmem:[#allocation5 + $0x1a4] ss:$16 sps:$4 sm:$0xff]   ;;  %v5838_v57 = vld [vmem:[#allocation5 + $0x8] ss:$16 sps:$4 sm:$0xff]  }
  0x97   :  { %2872 = vmatprep.subr.bf16.mxu0 %v5843_v56  ;;  %v5927_v56 = vld [vmem:[#allocation5 + $0x1e4] ss:$16 sps:$4 sm:$0xff]  }
  0x99   :  { %1010 = vmatpush1.bf16.msra.mxu1 %v5017_v59  ;;  %v5846_v59 = vld [vmem:[#allocation5 + $0x2c] ss:$16 sps:$4 sm:$0xff]  }
  0x9a   :  { %1011 = vmatprep.subr.bf16.mxu1 %v5026_v63  ;;  %2873 = vmatpush1.bf16.msra.mxu0 %v5841_v58  ;;  %v5925_v58 = vld [vmem:[#allocation5 + $0x1e0] ss:$16 sps:$4 sm:$0xff]   ;;  %v5850_v63 = vld [vmem:[#allocation5 + $0x48] ss:$16 sps:$4 sm:$0xff]  }
  0x9b   :  { %824 = vmatmul.mubr.bf16.gmra.mrb[20].mxu1 %v6709_v33  ;;  %2874 = vmatprep.subr.bf16.mxu0 %v5849_v62  ;;  %v5852_v62 = vld [vmem:[#allocation5 + $0x4c] ss:$16 sps:$4 sm:$0xff]  }
  0x9c   :  { %833 = vmatprep.mubr.bf16.mxu1 %v6504_v1  ;;  %937 = vmatmul.mubr.bf16.gmra.mrb[20].mxu0 %v6709_v33 }
  0x9d   :  { %1012 = vmatpush1.bf16.msra.mxu1 %v5025_v4  ;;  %946 = vmatprep.mubr.bf16.mxu0 %v6504_v1  ;;  %v5856_v4 = vld [vmem:[#allocation5 + $0x68] ss:$16 sps:$4 sm:$0xff]  }
  0x9e   :  { %1013 = vmatprep.subr.bf16.mxu1 %v5034_v10  ;;  %2875 = vmatpush1.bf16.msra.mxu0 %v5847_v0  ;;  %v5858_v0 = vld [vmem:[#allocation5 + $0x6c] ss:$16 sps:$4 sm:$0xff]  }
  0x9f   :  { %2876 = vmatprep.subr.bf16.mxu0 %v5855_v8  ;;  %v5868_v8 = vld [vmem:[#allocation5 + $0xa8] ss:$16 sps:$4 sm:$0xff]   ;;  %v5876_v10 = vld [vmem:[#allocation5 + $0xcc] ss:$16 sps:$4 sm:$0xff]  }
  0xa1   :  { %1014 = vmatpush1.bf16.msra.mxu1 %v5033_v12  ;;  %v5880_v12 = vld [vmem:[#allocation5 + $0xe8] ss:$16 sps:$4 sm:$0xff]  }
  0xa2   :  { %1015 = vmatprep.subr.bf16.mxu1 %v5042_v16  ;;  %2877 = vmatpush1.bf16.msra.mxu0 %v5853_v11  ;;  %v5874_v11 = vld [vmem:[#allocation5 + $0xc8] ss:$16 sps:$4 sm:$0xff]   ;;  %v5900_v16 = vld [vmem:[#allocation5 + $0x14c] ss:$16 sps:$4 sm:$0xff]  }
  0xa3   :  { %834 = vmatmul.mubr.bf16.gmra.mrb[24].mxu1 %v6737_v3  ;;  %2878 = vmatprep.subr.bf16.mxu0 %v5861_v15  ;;  %v5892_v15 = vld [vmem:[#allocation5 + $0x128] ss:$16 sps:$4 sm:$0xff]  }
  0xa4   :  { %843 = vmatprep.mubr.bf16.mxu1 %v6504_v1  ;;  %947 = vmatmul.mubr.bf16.gmra.mrb[24].mxu0 %v6737_v3 }
  0xa5   :  { %1016 = vmatpush1.bf16.msra.mxu1 %v5041_v18  ;;  %956 = vmatprep.mubr.bf16.mxu0 %v6504_v1  ;;  %v5904_v18 = vld [vmem:[#allocation5 + $0x168] ss:$16 sps:$4 sm:$0xff]  }
  0xa6   :  { %1017 = vmatprep.subr.bf16.mxu1 %v5050_v36  ;;  %2879 = vmatpush1.bf16.msra.mxu0 %v5859_v17  ;;  %v5898_v17 = vld [vmem:[#allocation5 + $0x148] ss:$16 sps:$4 sm:$0xff]   ;;  %v5924_v36 = vld [vmem:[#allocation5 + $0x1cc] ss:$16 sps:$4 sm:$0xff]  }
  0xa7   :  { %2880 = vmatprep.subr.bf16.mxu0 %v5867_v21  ;;  %v5916_v21 = vld [vmem:[#allocation5 + $0x1a8] ss:$16 sps:$4 sm:$0xff]  }
  0xa9   :  { %1018 = vmatpush1.bf16.msra.mxu1 %v5049_v23  ;;  %v5928_v23 = vld [vmem:[#allocation5 + $0x1e8] ss:$16 sps:$4 sm:$0xff]  }
  0xaa   :  { %1019 = vmatprep.subr.bf16.mxu1 %v5058_v28  ;;  %2881 = vmatpush1.bf16.msra.mxu0 %v5865_v22  ;;  %v5922_v22 = vld [vmem:[#allocation5 + $0x1c8] ss:$16 sps:$4 sm:$0xff]  }
  0xab   :  { %844 = vmatmul.mubr.bf16.gmra.mrb[28].mxu1 %v6753_v30  ;;  %2882 = vmatprep.subr.bf16.mxu0 %v5873_v27 }
  0xac   :  { %853 = vmatprep.mubr.bf16.mxu1 %v6504_v1  ;;  %957 = vmatmul.mubr.bf16.gmra.mrb[28].mxu0 %v6753_v30 }
  0xad   :  { %1020 = vmatpush1.bf16.msra.mxu1 %v5057_v32  ;;  %966 = vmatprep.mubr.bf16.mxu0 %v6504_v1 }
  0xae   :  { %1021 = vmatprep.subr.bf16.mxu1 %v5066_v37  ;;  %2883 = vmatpush1.bf16.msra.mxu0 %v5871_v29 }
  0xaf   :  { %2884 = vmatprep.subr.bf16.mxu0 %v5879_v34 }
  0xb1   :  { %1022 = vmatpush1.bf16.msra.mxu1 %v5065_v40 }
  0xb2   :  { %3322 = vmatprep.subr.bf16.mxu1 %v5840_v44  ;;  %2885 = vmatpush1.bf16.msra.mxu0 %v5877_v38 }
  0xb3   :  { %854 = vmatmul.mubr.bf16.gmra.mrb[32].mxu1 %v6685_v6  ;;  %2886 = vmatprep.subr.bf16.mxu0 %v5885_v41 }
  0xb4   :  { %863 = vmatprep.mubr.bf16.mxu1 %v6504_v1  ;;  %967 = vmatmul.mubr.bf16.gmra.mrb[32].mxu0 %v6685_v6 }
  0xb5   :  { %976 = vmatprep.mubr.bf16.mxu0 %v6504_v1 }
  0xb6   :  { %2887 = vmatpush1.bf16.msra.mxu0 %v5883_v42 }
  0xb7   :  { %2888 = vmatprep.subr.bf16.mxu0 %v5891_v43 }
  0xba   :  { %2889 = vmatpush1.bf16.msra.mxu0 %v5889_v45 }
  0xbb   :  { %864 = vmatmul.mubr.bf16.gmra.mrb[36].mxu1 %v6713_v39  ;;  %2890 = vmatprep.subr.bf16.mxu0 %v5897_v46 }
  0xbc   :  { %873 = vmatprep.mubr.bf16.mxu1 %v6504_v1  ;;  %977 = vmatmul.mubr.bf16.gmra.mrb[36].mxu0 %v6713_v39 }
  0xbd   :  { %986 = vmatprep.mubr.bf16.mxu0 %v6504_v1 }
  0xbe   :  { %2891 = vmatpush1.bf16.msra.mxu0 %v5895_v47 }
  0xbf   :  { %2892 = vmatprep.subr.bf16.mxu0 %v5903_v48 }
  0xc2   :  { %2893 = vmatpush1.bf16.msra.mxu0 %v5901_v49 }
  0xc3   :  { %874 = vmatmul.mubr.bf16.gmra.mrb[40].mxu1 %v6741_v9  ;;  %2894 = vmatprep.subr.bf16.mxu0 %v5909_v50 }
  0xc4   :  { %883 = vmatprep.mubr.bf16.mxu1 %v6504_v1  ;;  %987 = vmatmul.mubr.bf16.gmra.mrb[40].mxu0 %v6741_v9 }
  0xc5   :  { %996 = vmatprep.mubr.bf16.mxu0 %v6504_v1 }
  0xc6   :  { %2895 = vmatpush1.bf16.msra.mxu0 %v5907_v51 }
  0xc7   :  { %2896 = vmatprep.subr.bf16.mxu0 %v5915_v52 }
  0xca   :  { %2897 = vmatpush1.bf16.msra.mxu0 %v5913_v53 }
  0xcb   :  { %884 = vmatmul.mubr.bf16.gmra.mrb[44].mxu1 %v6755_v35  ;;  %2898 = vmatprep.subr.bf16.mxu0 %v5921_v54 }
  0xcc   :  { %1039 = vmatprep.mubr.bf16.mxu1 %v6504_v1  ;;  %997 = vmatmul.mubr.bf16.gmra.mrb[44].mxu0 %v6755_v35 }
  0xce   :  { %2899 = vmatpush1.bf16.msra.mxu0 %v5919_v55 }
  0xcf   :  { %2900 = vmatprep.subr.bf16.mxu0 %v5927_v56 }
  0xd2   :  { %2901 = vmatpush1.bf16.msra.mxu0 %v5925_v58 }
  0xd3   :  { %1040 = vmatmul.mubr.bf16.vlgmr.msra.gmra.mrb[48].mxu1 %v6681_v2  ;;  %2983 = vmatprep.subr.bf16.mxu0 %v5933_v60  ;;  %v5862_v2 = vld [vmem:[#allocation5 + $0x88] ss:$16 sps:$4 sm:$0xff]   ;;  %v5931_v60 = vld [vmem:[#allocation5 + $0x200] ss:$16 sps:$4 sm:$0xff]  }
  0xd4   :  { %3323 = vmatpush1.bf16.msra.mxu1 %v5838_v57  ;;  %1049 = vmatprep.mubr.bf16.mxu1 %v6504_v1 }
  0xd5   :  { %3324 = vmatprep.subr.bf16.mxu1 %v5846_v59 }
  0xd8   :  { %3325 = vmatpush1.bf16.msra.mxu1 %v5844_v61  ;;  %v5934_v61 = vld [vmem:[#allocation5 + $0x208] ss:$16 sps:$4 sm:$0xff]  }
  0xd9   :  { %3326 = vmatprep.subr.bf16.mxu1 %v5852_v62 }
  0xdb   :  { %1050 = vmatmul.mubr.bf16.gmra.mrb[52].mxu1 %v6709_v33  ;;  %v5882_v33 = vld [vmem:[#allocation5 + $0xec] ss:$16 sps:$4 sm:$0xff]  }
  0xdc   :  { %3327 = vmatpush1.bf16.msra.mxu1 %v5850_v63  ;;  %1059 = vmatprep.mubr.bf16.mxu1 %v6504_v1 }
  0xdd   :  { %3328 = vmatprep.subr.bf16.mxu1 %v5858_v0 }
  0xe0   :  { %3329 = vmatpush1.bf16.msra.mxu1 %v5856_v4  ;;  %v5939_v4 = vld [vmem:[#allocation5 + $0x224] ss:$16 sps:$4 sm:$0xff]  }
  0xe1   :  { %3330 = vmatprep.subr.bf16.mxu1 %v5864_v5  ;;  %v5942_v5 = vld [vmem:[#allocation5 + $0x22c] ss:$16 sps:$4 sm:$0xff]  }
  0xe3   :  { %1060 = vmatmul.mubr.bf16.gmra.mrb[56].mxu1 %v6737_v3  ;;  %v5894_v3 = vld [vmem:[#allocation5 + $0x12c] ss:$16 sps:$4 sm:$0xff]  }
  0xe4   :  { %3331 = vmatpush1.bf16.msra.mxu1 %v5862_v2  ;;  %1069 = vmatprep.mubr.bf16.mxu1 %v6504_v1 }
  0xe5   :  { %3332 = vmatprep.subr.bf16.mxu1 %v5870_v7 }
  0xe8   :  { %3333 = vmatpush1.bf16.msra.mxu1 %v5868_v8 }
  0xe9   :  { %3334 = vmatprep.subr.bf16.mxu1 %v5876_v10 }
  0xeb   :  { %1070 = vmatmul.mubr.bf16.gmra.mrb[60].mxu1 %v6753_v30  ;;  %v5906_v30 = vld [vmem:[#allocation5 + $0x16c] ss:$16 sps:$4 sm:$0xff]  }
  0xec   :  { %3335 = vmatpush1.bf16.msra.mxu1 %v5874_v11  ;;  %1079 = vmatprep.mubr.bf16.mxu1 %v6504_v1 }
  0xed   :  { %3336 = vmatprep.subr.bf16.mxu1 %v5882_v33 }
  0xf0   :  { %3337 = vmatpush1.bf16.msra.mxu1 %v5880_v12 }
  0xf1   :  { %3338 = vmatprep.subr.bf16.mxu1 %v5888_v13 }
  0xf3   :  { %1080 = vmatmul.mubr.bf16.gmra.mrb[64].mxu1 %v6685_v6  ;;  %v5918_v6 = vld [vmem:[#allocation5 + $0x1ac] ss:$16 sps:$4 sm:$0xff]  }
  0xf4   :  { %3339 = vmatpush1.bf16.msra.mxu1 %v5886_v14  ;;  %1089 = vmatprep.mubr.bf16.mxu1 %v6504_v1  ;;  %v5937_v14 = vld [vmem:[#allocation5 + $0x220] ss:$16 sps:$4 sm:$0xff]  }
  0xf5   :  { %3340 = vmatprep.subr.bf16.mxu1 %v5894_v3 }
  0xf8   :  { %3341 = vmatpush1.bf16.msra.mxu1 %v5892_v15 }
  0xf9   :  { %3342 = vmatprep.subr.bf16.mxu1 %v5900_v16 }
  0xfb   :  { %1090 = vmatmul.mubr.bf16.gmra.mrb[68].mxu1 %v6713_v39  ;;  %v5930_v39 = vld [vmem:[#allocation5 + $0x1ec] ss:$16 sps:$4 sm:$0xff]  }
  0xfc   :  { %3343 = vmatpush1.bf16.msra.mxu1 %v5898_v17  ;;  %1099 = vmatprep.mubr.bf16.mxu1 %v6504_v1  ;;  %v5940_v17 = vld [vmem:[#allocation5 + $0x228] ss:$16 sps:$4 sm:$0xff]  }
  0xfd   :  { %3344 = vmatprep.subr.bf16.mxu1 %v5906_v30  ;;  %v5945_v30 = vld [vmem:[#allocation5 + $0x244] ss:$16 sps:$4 sm:$0xff]  }
 0x100   :  { %3345 = vmatpush1.bf16.msra.mxu1 %v5904_v18 }
 0x101   :  { %3346 = vmatprep.subr.bf16.mxu1 %v5912_v19 }
 0x103   :  { %1100 = vmatmul.mubr.bf16.gmra.mrb[72].mxu1 %v6741_v9  ;;  %v6810_v9 = vld [vmem:[%s7576_s5] sm:$0xff] }
 0x104   :  { %3347 = vmatpush1.bf16.msra.mxu1 %v5910_v20  ;;  %1109 = vmatprep.mubr.bf16.mxu1 %v6504_v1  ;;  %v6813_v1 = vsub.s32 1, %v6636_v26  ;;  %v6817_v25 = vrot.slane %v6810_v9, %v6639_v31 }
 0x105   :  { %3348 = vmatprep.subr.bf16.mxu1 %v5918_v6 }
 0x108   :  { %3349 = vmatpush1.bf16.msra.mxu1 %v5916_v21 }
 0x109   :  { %3350 = vmatprep.subr.bf16.mxu1 %v5924_v36  ;;  %v5948_v36 = vld [vmem:[#allocation5 + $0x24c] ss:$16 sps:$4 sm:$0xff]  }
 0x10b   :  { %1110 = vmatmul.mubr.bf16.gmra.mrb[76].mxu1 %v6755_v35  ;;  %v6821_v35 = vrot.slane %v6810_v9, %v6813_v1 }
 0x10c   :  { %3351 = vmatpush1.bf16.msra.mxu1 %v5922_v22 }
 0x10d   :  { %3352 = vmatprep.subr.bf16.mxu1 %v5930_v39 }
 0x110   :  { %3353 = vmatpush1.bf16.msra.mxu1 %v5928_v23 }
 0x111   :  { %3435 = vmatprep.subr.bf16.mxu1 %v5936_v24 }
 0x145   :  { %v702_v27 = vpop.f32.mrb[0].mxu0  ;;  %v742_v32 = vpop.f32.mrb[0].mxu1 }
 0x146   :  { %v703_v28 = vadd.f32 %v702_v27, %v6817_v25  ;;  %v704_v29 = vpop.f32.mrb[1].mxu0  ;;  %v743_v44 = vadd.f32 %v742_v32, %v6817_v25  ;;  %v744_v38 = vpop.f32.mrb[1].mxu1 }
 0x147   :  { %v705_v34 = vadd.f32 %v704_v29, %v6821_v35  ;;  %v706_v37 = vpop.f32.mrb[2].mxu0  ;;  %v745_v42 = vadd.f32 %v744_v38, %v6821_v35  ;;  %v746_v43 = vpop.f32.mrb[2].mxu1 }
 0x148   :  { %v707_v40 = vadd.f32 %v706_v37, %v6817_v25  ;;  %v708_v41 = vpop.f32.mrb[3].mxu0  ;;  %v1184_v46 = vmax.f32 %v743_v44, 0.0  ;;  %v747_v47 = vadd.f32 %v746_v43, %v6817_v25  ;;  %v748_v48 = vpop.f32.mrb[3].mxu1  ;;  %v1120_v49 = vmax.f32 %v703_v28, 0.0  ;;  %v5943_v37 = vld [vmem:[#allocation5 + $0x240] ss:$16 sps:$4 sm:$0xff]  }
 0x149   :  { %v709_v45 = vadd.f32 %v708_v41, %v6821_v35  ;;  %v1185_v51 = vmax.f32 %v745_v42, 0.0  ;;  %v749_v52 = vadd.f32 %v748_v48, %v6821_v35  ;;  %v1121_v53 = vmax.f32 %v705_v34, 0.0  ;;  %v5946_v44 = vld [vmem:[#allocation5 + $0x248] ss:$16 sps:$4 sm:$0xff]   ;;  %v5951_v42 = vld [vmem:[#allocation5 + $0x264] ss:$16 sps:$4 sm:$0xff]  }
 0x14a   :  { %v1128_v50 = vmax.f32 %v707_v40, 0.0  ;;  %v1192_v55 = vmax.f32 %v747_v47, 0.0  ;;  %v5954_v43 = vld [vmem:[#allocation5 + $0x26c] ss:$16 sps:$4 sm:$0xff]  }
 0x14b   :  { %v1129_v54 = vmax.f32 %v709_v45, 0.0  ;;  %v1193_v57 = vmax.f32 %v749_v52, 0.0 }
 0x14c   :  { %v1248_v56 = vpack.c.bf16 %v1128_v50, %v1120_v49  ;;  %v6831_v62 = vpack.c.bf16 %v1192_v55, %v1184_v46 }
 0x14d   :  { %v1249_v58 = vpack.c.bf16 %v1129_v54, %v1121_v53  ;;  %v712_v59 = vpop.f32.mrb[4].mxu0  ;;  %v6834_v2 = vpack.c.bf16 %v1193_v57, %v1185_v51  ;;  %v5949_v53 = vld [vmem:[#allocation5 + $0x260] ss:$16 sps:$4 sm:$0xff]   ;;  %v5952_v57 = vld [vmem:[#allocation5 + $0x268] ss:$16 sps:$4 sm:$0xff]  }
 0x14e   :  { %v713_v63 = vadd.f32 %v712_v59, %v6817_v25  ;;  %v714_v0 = vpop.f32.mrb[5].mxu0  ;;  %v752_v7 = vpop.f32.mrb[4].mxu1 }
 0x14f   :  { %v715_v8 = vadd.f32 %v714_v0, %v6821_v35  ;;  %v716_v10 = vpop.f32.mrb[6].mxu0  ;;  %2902 = vmatprep.mubr.bf16.mxu0 %v1249_v58  ;;  %3354 = vmatprep.mubr.bf16.mxu1 %v1249_v58  ;;  %v753_v11 = vadd.f32 %v752_v7, %v6817_v25  ;;  %v754_v33 = vpop.f32.mrb[5].mxu1  ;;  %v5957_v58 = vld [vmem:[#allocation5 + $0x284] ss:$16 sps:$4 sm:$0xff]  }
 0x150   :  { %v717_v12 = vadd.f32 %v716_v10, %v6817_v25  ;;  %v718_v13 = vpop.f32.mrb[7].mxu0  ;;  %2903 = vmatmul.mubr.bf16.vlgmr.msra.gmra.mrb[48].mxu0 %v1248_v56  ;;  %3355 = vmatmul.mubr.bf16.vlgmr.msra.gmra.mrb[80].mxu1 %v1248_v56  ;;  %v755_v3 = vadd.f32 %v754_v33, %v6821_v35  ;;  %v756_v15 = vpop.f32.mrb[6].mxu1  ;;  %v1136_v6 = vmax.f32 %v713_v63, 0.0 }
 0x151   :  { %v719_v16 = vadd.f32 %v718_v13, %v6821_v35  ;;  %2984 = vmatpush1.bf16.msra.mxu0 %v5931_v60  ;;  %3436 = vmatpush1.bf16.msra.mxu1 %v5934_v61  ;;  %v1200_v18 = vmax.f32 %v753_v11, 0.0  ;;  %v757_v19 = vadd.f32 %v756_v15, %v6817_v25  ;;  %v758_v20 = vpop.f32.mrb[7].mxu1  ;;  %v1137_v23 = vmax.f32 %v715_v8, 0.0  ;;  %v5958_v15 = vld [vmem:[#allocation5 + $0x288] ss:$16 sps:$4 sm:$0xff]  }
 0x152   :  { %v1144_v21 = vmax.f32 %v717_v12, 0.0  ;;  %2985 = vmatprep.subr.bf16.mxu0 %v5939_v4  ;;  %3437 = vmatprep.subr.bf16.mxu1 %v5942_v5  ;;  %v1201_v22 = vmax.f32 %v755_v3, 0.0  ;;  %v759_v39 = vadd.f32 %v758_v20, %v6821_v35  ;;  %v5960_v4 = vld [vmem:[#allocation5 + $0x28c] ss:$16 sps:$4 sm:$0xff]   ;;  %v5955_v3 = vld [vmem:[#allocation5 + $0x280] ss:$16 sps:$4 sm:$0xff]  }
 0x153   :  { %v1145_v24 = vmax.f32 %v719_v16, 0.0  ;;  %v1208_v27 = vmax.f32 %v757_v19, 0.0  ;;  %v5966_v19 = vld [vmem:[#allocation5 + $0x2ac] ss:$16 sps:$4 sm:$0xff]  }
 0x154   :  { %v1256_v28 = vpack.c.bf16 %v1144_v21, %v1136_v6  ;;  %v1209_v29 = vmax.f32 %v759_v39, 0.0 }
 0x155   :  { %v1257_v32 = vpack.c.bf16 %v1145_v24, %v1137_v23  ;;  %2986 = vmatpush1.bf16.msra.mxu0 %v5937_v14  ;;  %v722_v34 = vpop.f32.mrb[8].mxu0  ;;  %3438 = vmatpush1.bf16.msra.mxu1 %v5940_v17  ;;  %v6843_v38 = vpack.c.bf16 %v1208_v27, %v1200_v18  ;;  %v5963_v18 = vld [vmem:[#allocation5 + $0x2a4] ss:$16 sps:$4 sm:$0xff]   ;;  %v318_v24 = vsub.s32 2, %v6636_v26 }
 0x156   :  { %v723_v40 = vadd.f32 %v722_v34, %v6817_v25  ;;  %v724_v41 = vpop.f32.mrb[9].mxu0  ;;  %2987 = vmatprep.subr.bf16.mxu0 %v5945_v30  ;;  %3439 = vmatprep.subr.bf16.mxu1 %v5948_v36  ;;  %v6846_v45 = vpack.c.bf16 %v1209_v29, %v1201_v22  ;;  %v762_v46 = vpop.f32.mrb[8].mxu1  ;;  %v5961_v22 = vld [vmem:[#allocation5 + $0x2a0] ss:$16 sps:$4 sm:$0xff]   ;;  %v5964_v29 = vld [vmem:[#allocation5 + $0x2a8] ss:$16 sps:$4 sm:$0xff]  }
 0x157   :  { %v725_v47 = vadd.f32 %v724_v41, %v6821_v35  ;;  %v726_v48 = vpop.f32.mrb[10].mxu0  ;;  %2912 = vmatprep.mubr.bf16.mxu0 %v1257_v32  ;;  %3364 = vmatprep.mubr.bf16.mxu1 %v1257_v32  ;;  %v763_v49 = vadd.f32 %v762_v46, %v6817_v25  ;;  %v764_v50 = vpop.f32.mrb[9].mxu1  ;;  %v5969_v41 = vld [vmem:[#allocation5 + $0x2c4] ss:$16 sps:$4 sm:$0xff]  }
 0x158   :  { %v727_v51 = vadd.f32 %v726_v48, %v6817_v25  ;;  %v728_v52 = vpop.f32.mrb[11].mxu0  ;;  %2913 = vmatmul.mubr.bf16.gmra.mrb[52].mxu0 %v1256_v28  ;;  %3365 = vmatmul.mubr.bf16.gmra.mrb[84].mxu1 %v1256_v28  ;;  %v765_v54 = vadd.f32 %v764_v50, %v6821_v35  ;;  %v766_v55 = vpop.f32.mrb[10].mxu1  ;;  %v1152_v63 = vmax.f32 %v723_v40, 0.0  ;;  %v5972_v50 = vld [vmem:[#allocation5 + $0x2cc] ss:$16 sps:$4 sm:$0xff]  }
 0x159   :  { %v729_v56 = vadd.f32 %v728_v52, %v6821_v35  ;;  %2988 = vmatpush1.bf16.msra.mxu0 %v5943_v37  ;;  %3440 = vmatpush1.bf16.msra.mxu1 %v5946_v44  ;;  %v1216_v59 = vmax.f32 %v763_v49, 0.0  ;;  %v767_v60 = vadd.f32 %v766_v55, %v6817_v25  ;;  %v768_v61 = vpop.f32.mrb[11].mxu1  ;;  %v1153_v8 = vmax.f32 %v725_v47, 0.0 }
 0x15a   :  { %v1160_v0 = vmax.f32 %v727_v51, 0.0  ;;  %2989 = vmatprep.subr.bf16.mxu0 %v5951_v42  ;;  %3441 = vmatprep.subr.bf16.mxu1 %v5954_v43  ;;  %v1217_v5 = vmax.f32 %v765_v54, 0.0  ;;  %v769_v7 = vadd.f32 %v768_v61, %v6821_v35  ;;  %v322_v37 = vsub.s32 3, %v6636_v26  ;;  %v5970_v61 = vld [vmem:[#allocation5 + $0x2c8] ss:$16 sps:$4 sm:$0xff]  }
 0x15b   :  { %v1161_v10 = vmax.f32 %v729_v56, 0.0  ;;  %v1224_v11 = vmax.f32 %v767_v60, 0.0  ;;  %v326_v44 = vsub.s32 4, %v6636_v26  ;;  %v330_v47 = vsub.s32 5, %v6636_v26 }
 0x15c   :  { %v1264_v33 = vpack.c.bf16 %v1160_v0, %v1152_v63  ;;  %v1225_v12 = vmax.f32 %v769_v7, 0.0  ;;  %v6874_v56 = vrot.slane %v6810_v9, %v318_v24 }
 0x15d   :  { %v1265_v13 = vpack.c.bf16 %v1161_v10, %v1153_v8  ;;  %2990 = vmatpush1.bf16.msra.mxu0 %v5949_v53  ;;  %v732_v14 = vpop.f32.mrb[12].mxu0  ;;  %3442 = vmatpush1.bf16.msra.mxu1 %v5952_v57  ;;  %v6855_v16 = vpack.c.bf16 %v1224_v11, %v1216_v59  ;;  %v6882_v59 = vrot.slane %v6810_v9, %v326_v44  ;;  %v5978_v8 = vld [vmem:[#allocation5 + $0x2ec] ss:$16 sps:$4 sm:$0xff]  }
 0x15e   :  { %v733_v17 = vadd.f32 %v732_v14, %v6817_v25  ;;  %v734_v30 = vpop.f32.mrb[13].mxu0  ;;  %2991 = vmatprep.subr.bf16.mxu0 %v5957_v58  ;;  %3443 = vmatprep.subr.bf16.mxu1 %v5960_v4  ;;  %v6858_v20 = vpack.c.bf16 %v1225_v12, %v1217_v5  ;;  %v772_v6 = vpop.f32.mrb[12].mxu1  ;;  %v6879_v58 = vrot.slane %v6810_v9, %v322_v37  ;;  %v5975_v4 = vld [vmem:[#allocation5 + $0x2e4] ss:$16 sps:$4 sm:$0xff]   ;;  %v5973_v12 = vld [vmem:[#allocation5 + $0x2e0] ss:$16 sps:$4 sm:$0xff]  }
 0x15f   :  { %v735_v21 = vadd.f32 %v734_v30, %v6821_v35  ;;  %v736_v36 = vpop.f32.mrb[14].mxu0  ;;  %2922 = vmatprep.mubr.bf16.mxu0 %v1265_v13  ;;  %3374 = vmatprep.mubr.bf16.mxu1 %v1265_v13  ;;  %v773_v39 = vadd.f32 %v772_v6, %v6817_v25  ;;  %v774_v23 = vpop.f32.mrb[13].mxu1  ;;  %v6887_v0 = vrot.slane %v6810_v9, %v330_v47  ;;  %v5976_v13 = vld [vmem:[#allocation5 + $0x2e8] ss:$16 sps:$4 sm:$0xff]   ;;  %v5987_v47 = vld [vmem:[#allocation5 + $0x324] ss:$16 sps:$4 sm:$0xff]  }
 0x160   :  { %v737_v27 = vadd.f32 %v736_v36, %v6817_v25  ;;  %v738_v28 = vpop.f32.mrb[15].mxu0  ;;  %2923 = vmatmul.mubr.bf16.gmra.mrb[56].mxu0 %v1264_v33  ;;  %3375 = vmatmul.mubr.bf16.gmra.mrb[88].mxu1 %v1264_v33  ;;  %v775_v32 = vadd.f32 %v774_v23, %v6821_v35  ;;  %v776_v34 = vpop.f32.mrb[14].mxu1  ;;  %v1168_v48 = vmax.f32 %v733_v17, 0.0  ;;  %v5981_v17 = vld [vmem:[#allocation5 + $0x304] ss:$16 sps:$4 sm:$0xff]  }
 0x161   :  { %v739_v40 = vadd.f32 %v738_v28, %v6821_v35  ;;  %2992 = vmatpush1.bf16.msra.mxu0 %v5955_v3  ;;  %3444 = vmatpush1.bf16.msra.mxu1 %v5958_v15  ;;  %v1232_v42 = vmax.f32 %v773_v39, 0.0  ;;  %v777_v43 = vadd.f32 %v776_v34, %v6817_v25  ;;  %v778_v46 = vpop.f32.mrb[15].mxu1  ;;  %v1169_v53 = vmax.f32 %v735_v21, 0.0  ;;  %v5984_v36 = vld [vmem:[#allocation5 + $0x30c] ss:$16 sps:$4 sm:$0xff]  }
 0x162   :  { %v1176_v49 = vmax.f32 %v737_v27, 0.0  ;;  %2993 = vmatprep.subr.bf16.mxu0 %v5963_v18  ;;  %3445 = vmatprep.subr.bf16.mxu1 %v5966_v19  ;;  %v1233_v51 = vmax.f32 %v775_v32, 0.0  ;;  %v779_v52 = vadd.f32 %v778_v46, %v6821_v35  ;;  %v5967_v35 = vld [vmem:[#allocation5 + $0x2c0] ss:$16 sps:$4 sm:$0xff]  }
 0x163   :  { %v1177_v54 = vmax.f32 %v739_v40, 0.0  ;;  %v1240_v55 = vmax.f32 %v777_v43, 0.0 }
 0x164   :  { %v1272_v25 = vpack.c.bf16 %v1176_v49, %v1168_v48  ;;  %v1241_v57 = vmax.f32 %v779_v52, 0.0 }
 0x165   :  { %v1273_v60 = vpack.c.bf16 %v1177_v54, %v1169_v53  ;;  %2994 = vmatpush1.bf16.msra.mxu0 %v5961_v22  ;;  %3446 = vmatpush1.bf16.msra.mxu1 %v5964_v29  ;;  %v6884_v63 = vpack.c.bf16 %v1240_v55, %v1232_v42  ;;  %v5982_v42 = vld [vmem:[#allocation5 + $0x308] ss:$16 sps:$4 sm:$0xff]   ;;  %v5985_v55 = vld [vmem:[#allocation5 + $0x320] ss:$16 sps:$4 sm:$0xff]  }
 0x166   :  { %2995 = vmatprep.subr.bf16.mxu0 %v5969_v41  ;;  %3447 = vmatprep.subr.bf16.mxu1 %v5972_v50  ;;  %v6889_v5 = vpack.c.bf16 %v1241_v57, %v1233_v51  ;;  %v815_v7 = vpop.f32.mrb[16].mxu1  ;;  %v5979_v41 = vld [vmem:[#allocation5 + $0x300] ss:$16 sps:$4 sm:$0xff]   ;;  %v5990_v50 = vld [vmem:[#allocation5 + $0x32c] ss:$16 sps:$4 sm:$0xff]  }
 0x167   :  { %2932 = vmatprep.mubr.bf16.mxu0 %v1273_v60  ;;  %3384 = vmatprep.mubr.bf16.mxu1 %v1273_v60  ;;  %v816_v10 = vadd.f32 %v815_v7, %v6874_v56  ;;  %v817_v11 = vpop.f32.mrb[17].mxu1  ;;  %v928_v33 = vpop.f32.mrb[16].mxu0 }
 0x168   :  { %2933 = vmatmul.mubr.bf16.gmra.mrb[60].mxu0 %v1272_v25  ;;  %3385 = vmatmul.mubr.bf16.gmra.mrb[92].mxu1 %v1272_v25  ;;  %v818_v9 = vadd.f32 %v817_v11, %v6879_v58  ;;  %v819_v14 = vpop.f32.mrb[18].mxu1  ;;  %v929_v3 = vadd.f32 %v928_v33, %v6882_v59  ;;  %v930_v15 = vpop.f32.mrb[17].mxu0  ;;  %v5988_v25 = vld [vmem:[#allocation5 + $0x328] ss:$16 sps:$4 sm:$0xff]  }
 0x169   :  { %2996 = vmatpush1.bf16.msra.mxu0 %v5967_v35  ;;  %3448 = vmatpush1.bf16.msra.mxu1 %v5970_v61  ;;  %v1122_v30 = vmax.f32 %v816_v10, 0.0  ;;  %v820_v18 = vadd.f32 %v819_v14, %v6874_v56  ;;  %v821_v19 = vpop.f32.mrb[19].mxu1  ;;  %v931_v6 = vadd.f32 %v930_v15, %v6887_v0  ;;  %v932_v21 = vpop.f32.mrb[18].mxu0 }
 0x16a   :  { %2997 = vmatprep.subr.bf16.mxu0 %v5975_v4  ;;  %2942 = vmatprep.mubr.bf16.mxu0 %v6834_v2  ;;  %v1123_v22 = vmax.f32 %v818_v9, 0.0  ;;  %v822_v39 = vadd.f32 %v821_v19, %v6879_v58  ;;  %v1124_v23 = vmax.f32 %v929_v3, 0.0  ;;  %v933_v27 = vadd.f32 %v932_v21, %v6882_v59  ;;  %v934_v28 = vpop.f32.mrb[19].mxu0  ;;  %v5993_v4 = vld [vmem:[#allocation5 + $0x344] ss:$16 sps:$4 sm:$0xff]  }
 0x16b   :  { %3394 = vmatprep.mubr.bf16.mxu1 %v6834_v2  ;;  %3449 = vmatprep.subr.bf16.mxu1 %v5978_v8  ;;  %v1130_v29 = vmax.f32 %v820_v18, 0.0  ;;  %v1125_v32 = vmax.f32 %v931_v6, 0.0  ;;  %v935_v34 = vadd.f32 %v934_v28, %v6887_v0  ;;  %v5991_v6 = vld [vmem:[#allocation5 + $0x340] ss:$16 sps:$4 sm:$0xff]   ;;  %v5994_v21 = vld [vmem:[#allocation5 + $0x348] ss:$16 sps:$4 sm:$0xff]  }
 0x16c   :  { %v1131_v44 = vmax.f32 %v822_v39, 0.0  ;;  %v1132_v40 = vmax.f32 %v933_v27, 0.0  ;;  %v5999_v39 = vld [vmem:[#allocation5 + $0x364] ss:$16 sps:$4 sm:$0xff]   ;;  %v6002_v28 = vld [vmem:[#allocation5 + $0x36c] ss:$16 sps:$4 sm:$0xff]  }
 0x16d   :  { %2998 = vmatpush1.bf16.msra.mxu0 %v5973_v12  ;;  %3450 = vmatpush1.bf16.msra.mxu1 %v5976_v13  ;;  %v6901_v43 = vpack.c.bf16 %v1130_v29, %v1122_v30  ;;  %v1133_v46 = vmax.f32 %v935_v34, 0.0 }
 0x16e   :  { %2999 = vmatprep.subr.bf16.mxu0 %v5981_v17  ;;  %3451 = vmatprep.subr.bf16.mxu1 %v5984_v36  ;;  %v6903_v48 = vpack.c.bf16 %v1131_v44, %v1123_v22  ;;  %v825_v2 = vpop.f32.mrb[20].mxu1  ;;  %v6905_v49 = vpack.c.bf16 %v1132_v40, %v1124_v23  ;;  %v5997_v40 = vld [vmem:[#allocation5 + $0x360] ss:$16 sps:$4 sm:$0xff]  }
 0x16f   :  { %v826_v51 = vadd.f32 %v825_v2, %v6874_v56  ;;  %v827_v52 = vpop.f32.mrb[21].mxu1  ;;  %v6908_v53 = vpack.c.bf16 %v1133_v46, %v1125_v32  ;;  %v938_v54 = vpop.f32.mrb[20].mxu0 }
 0x170   :  { %2943 = vmatmul.mubr.bf16.gmra.mrb[64].mxu0 %v6831_v62  ;;  %3395 = vmatmul.mubr.bf16.gmra.mrb[96].mxu1 %v6831_v62  ;;  %v828_v57 = vadd.f32 %v827_v52, %v6879_v58  ;;  %v829_v60 = vpop.f32.mrb[22].mxu1  ;;  %v939_v35 = vadd.f32 %v938_v54, %v6882_v59  ;;  %v940_v61 = vpop.f32.mrb[21].mxu0  ;;  %v5996_v62 = vld [vmem:[#allocation5 + $0x34c] ss:$16 sps:$4 sm:$0xff]  }
 0x171   :  { %3000 = vmatpush1.bf16.msra.mxu0 %v5979_v41  ;;  %3452 = vmatpush1.bf16.msra.mxu1 %v5982_v42  ;;  %v1138_v7 = vmax.f32 %v826_v51, 0.0  ;;  %v830_v8 = vadd.f32 %v829_v60, %v6874_v56  ;;  %v831_v10 = vpop.f32.mrb[23].mxu1  ;;  %v941_v11 = vadd.f32 %v940_v61, %v6887_v0  ;;  %v942_v33 = vpop.f32.mrb[22].mxu0  ;;  %v6000_v41 = vld [vmem:[#allocation5 + $0x368] ss:$16 sps:$4 sm:$0xff]  }
 0x172   :  { %3001 = vmatprep.subr.bf16.mxu0 %v5987_v47  ;;  %2952 = vmatprep.mubr.bf16.mxu0 %v6846_v45  ;;  %v1139_v12 = vmax.f32 %v828_v57, 0.0  ;;  %v832_v13 = vadd.f32 %v831_v10, %v6879_v58  ;;  %v1140_v9 = vmax.f32 %v939_v35, 0.0  ;;  %v943_v14 = vadd.f32 %v942_v33, %v6882_v59  ;;  %v944_v3 = vpop.f32.mrb[23].mxu0 }
 0x173   :  { %3404 = vmatprep.mubr.bf16.mxu1 %v6846_v45  ;;  %3453 = vmatprep.subr.bf16.mxu1 %v5990_v50  ;;  %v1146_v15 = vmax.f32 %v830_v8, 0.0  ;;  %v1141_v17 = vmax.f32 %v941_v11, 0.0  ;;  %v945_v30 = vadd.f32 %v944_v3, %v6887_v0  ;;  %v6005_v50 = vld [vmem:[#allocation5 + $0x384] ss:$16 sps:$4 sm:$0xff]  }
 0x174   :  { %v1147_v18 = vmax.f32 %v832_v13, 0.0  ;;  %v1148_v19 = vmax.f32 %v943_v14, 0.0  ;;  %v6011_v14 = vld [vmem:[#allocation5 + $0x3a4] ss:$16 sps:$4 sm:$0xff]  }
 0x175   :  { %3002 = vmatpush1.bf16.msra.mxu0 %v5985_v55  ;;  %3454 = vmatpush1.bf16.msra.mxu1 %v5988_v25  ;;  %v6921_v36 = vpack.c.bf16 %v1146_v15, %v1138_v7  ;;  %v1149_v22 = vmax.f32 %v945_v30, 0.0 }
 0x176   :  { %3003 = vmatprep.subr.bf16.mxu0 %v5993_v4  ;;  %3455 = vmatprep.subr.bf16.mxu1 %v5996_v62  ;;  %v6923_v23 = vpack.c.bf16 %v1147_v18, %v1139_v12  ;;  %v835_v45 = vpop.f32.mrb[24].mxu1  ;;  %v6925_v27 = vpack.c.bf16 %v1148_v19, %v1140_v9  ;;  %v6003_v62 = vld [vmem:[#allocation5 + $0x380] ss:$16 sps:$4 sm:$0xff]   ;;  %v6006_v12 = vld [vmem:[#allocation5 + $0x388] ss:$16 sps:$4 sm:$0xff]  }
 0x177   :  { %v836_v29 = vadd.f32 %v835_v45, %v6874_v56  ;;  %v837_v32 = vpop.f32.mrb[25].mxu1  ;;  %v6928_v34 = vpack.c.bf16 %v1149_v22, %v1141_v17  ;;  %v948_v44 = vpop.f32.mrb[24].mxu0  ;;  %v6014_v17 = vld [vmem:[#allocation5 + $0x3ac] ss:$16 sps:$4 sm:$0xff]   ;;  %v6012_v22 = vld [vmem:[#allocation5 + $0x3a8] ss:$16 sps:$4 sm:$0xff]  }
 0x178   :  { %2953 = vmatmul.mubr.bf16.gmra.mrb[68].mxu0 %v6843_v38  ;;  %3405 = vmatmul.mubr.bf16.gmra.mrb[100].mxu1 %v6843_v38  ;;  %v838_v42 = vadd.f32 %v837_v32, %v6879_v58  ;;  %v839_v46 = vpop.f32.mrb[26].mxu1  ;;  %v949_v47 = vadd.f32 %v948_v44, %v6882_v59  ;;  %v950_v2 = vpop.f32.mrb[25].mxu0  ;;  %v6008_v38 = vld [vmem:[#allocation5 + $0x38c] ss:$16 sps:$4 sm:$0xff]   ;;  %v6017_v32 = vld [vmem:[#allocation5 + $0x3c4] ss:$16 sps:$4 sm:$0xff]  }
 0x179   :  { %3004 = vmatpush1.bf16.msra.mxu0 %v5991_v6  ;;  %3456 = vmatpush1.bf16.msra.mxu1 %v5994_v21  ;;  %v1154_v51 = vmax.f32 %v836_v29, 0.0  ;;  %v840_v52 = vadd.f32 %v839_v46, %v6874_v56  ;;  %v841_v54 = vpop.f32.mrb[27].mxu1  ;;  %v951_v55 = vadd.f32 %v950_v2, %v6887_v0  ;;  %v952_v25 = vpop.f32.mrb[26].mxu0  ;;  %v6009_v21 = vld [vmem:[#allocation5 + $0x3a0] ss:$16 sps:$4 sm:$0xff]  }
 0x17a   :  { %3005 = vmatprep.subr.bf16.mxu0 %v5999_v39  ;;  %2962 = vmatprep.mubr.bf16.mxu0 %v6858_v20  ;;  %v1155_v57 = vmax.f32 %v838_v42, 0.0  ;;  %v842_v60 = vadd.f32 %v841_v54, %v6879_v58  ;;  %v1156_v35 = vmax.f32 %v949_v47, 0.0  ;;  %v953_v61 = vadd.f32 %v952_v25, %v6882_v59  ;;  %v954_v4 = vpop.f32.mrb[27].mxu0 }
 0x17b   :  { %3414 = vmatprep.mubr.bf16.mxu1 %v6858_v20  ;;  %3457 = vmatprep.subr.bf16.mxu1 %v6002_v28  ;;  %v1162_v7 = vmax.f32 %v840_v52, 0.0  ;;  %v1157_v8 = vmax.f32 %v951_v55, 0.0  ;;  %v955_v10 = vadd.f32 %v954_v4, %v6887_v0 }
 0x17c   :  { %v1163_v11 = vmax.f32 %v842_v60, 0.0  ;;  %v1164_v33 = vmax.f32 %v953_v61, 0.0  ;;  %v6015_v60 = vld [vmem:[#allocation5 + $0x3c0] ss:$16 sps:$4 sm:$0xff]  }
 0x17d   :  { %3006 = vmatpush1.bf16.msra.mxu0 %v5997_v40  ;;  %3458 = vmatpush1.bf16.msra.mxu1 %v6000_v41  ;;  %v6941_v13 = vpack.c.bf16 %v1162_v7, %v1154_v51  ;;  %v1165_v9 = vmax.f32 %v955_v10, 0.0  ;;  %v6023_v7 = vld [vmem:[#allocation5 + $0x3e4] ss:$16 sps:$4 sm:$0xff]  }
 0x17e   :  { %3007 = vmatprep.subr.bf16.mxu0 %v6005_v50  ;;  %3459 = vmatprep.subr.bf16.mxu1 %v6008_v38  ;;  %v6943_v3 = vpack.c.bf16 %v1163_v11, %v1155_v57  ;;  %v845_v20 = vpop.f32.mrb[28].mxu1  ;;  %v6945_v15 = vpack.c.bf16 %v1164_v33, %v1156_v35  ;;  %v6018_v35 = vld [vmem:[#allocation5 + $0x3c8] ss:$16 sps:$4 sm:$0xff]   ;;  %v6026_v11 = vld [vmem:[#allocation5 + $0x3ec] ss:$16 sps:$4 sm:$0xff]  }
 0x17f   :  { %v846_v30 = vadd.f32 %v845_v20, %v6874_v56  ;;  %v847_v18 = vpop.f32.mrb[29].mxu1  ;;  %v6948_v19 = vpack.c.bf16 %v1165_v9, %v1157_v8  ;;  %v958_v6 = vpop.f32.mrb[28].mxu0  ;;  %v6024_v20 = vld [vmem:[#allocation5 + $0x3e8] ss:$16 sps:$4 sm:$0xff]  }
 0x180   :  { %2963 = vmatmul.mubr.bf16.gmra.mrb[72].mxu0 %v6855_v16  ;;  %3415 = vmatmul.mubr.bf16.gmra.mrb[104].mxu1 %v6855_v16  ;;  %v848_v39 = vadd.f32 %v847_v18, %v6879_v58  ;;  %v849_v45 = vpop.f32.mrb[30].mxu1  ;;  %v959_v28 = vadd.f32 %v958_v6, %v6882_v59  ;;  %v960_v29 = vpop.f32.mrb[29].mxu0  ;;  %v6020_v16 = vld [vmem:[#allocation5 + $0x3cc] ss:$16 sps:$4 sm:$0xff]  }
 0x181   :  { %3008 = vmatpush1.bf16.msra.mxu0 %v6003_v62  ;;  %3460 = vmatpush1.bf16.msra.mxu1 %v6006_v12  ;;  %v1170_v44 = vmax.f32 %v846_v30, 0.0  ;;  %v850_v40 = vadd.f32 %v849_v45, %v6874_v56  ;;  %v851_v41 = vpop.f32.mrb[31].mxu1  ;;  %v961_v42 = vadd.f32 %v960_v29, %v6887_v0  ;;  %v962_v46 = vpop.f32.mrb[30].mxu0 }
 0x182   :  { %3009 = vmatprep.subr.bf16.mxu0 %v6011_v14  ;;  %2972 = vmatprep.mubr.bf16.mxu0 %v6889_v5  ;;  %v1171_v47 = vmax.f32 %v848_v39, 0.0  ;;  %v852_v2 = vadd.f32 %v851_v41, %v6879_v58  ;;  %v1172_v50 = vmax.f32 %v959_v28, 0.0  ;;  %v963_v51 = vadd.f32 %v962_v46, %v6882_v59  ;;  %v964_v52 = vpop.f32.mrb[31].mxu0  ;;  %v6021_v14 = vld [vmem:[#allocation5 + $0x3e0] ss:$16 sps:$4 sm:$0xff]  }
 0x183   :  { %3424 = vmatprep.mubr.bf16.mxu1 %v6889_v5  ;;  %3461 = vmatprep.subr.bf16.mxu1 %v6014_v17  ;;  %v1178_v54 = vmax.f32 %v850_v40, 0.0  ;;  %v1173_v55 = vmax.f32 %v961_v42, 0.0  ;;  %v965_v25 = vadd.f32 %v964_v52, %v6887_v0  ;;  %v6030_v52 = vld [vmem:[#allocation5 + $0x408] ss:$16 sps:$4 sm:$0xff]  }
 0x184   :  { %v1179_v38 = vmax.f32 %v852_v2, 0.0  ;;  %v1180_v57 = vmax.f32 %v963_v51, 0.0  ;;  %v6027_v51 = vld [vmem:[#allocation5 + $0x400] ss:$16 sps:$4 sm:$0xff]  }
 0x185   :  { %3010 = vmatpush1.bf16.msra.mxu0 %v6009_v21  ;;  %3462 = vmatpush1.bf16.msra.mxu1 %v6012_v22  ;;  %v6961_v61 = vpack.c.bf16 %v1178_v54, %v1170_v44  ;;  %v1181_v4 = vmax.f32 %v965_v25, 0.0  ;;  %v6029_v21 = vld [vmem:[#allocation5 + $0x404] ss:$16 sps:$4 sm:$0xff]  }
 0x186   :  { %3011 = vmatprep.subr.bf16.mxu0 %v6017_v32  ;;  %3463 = vmatprep.subr.bf16.mxu1 %v6020_v16  ;;  %v6963_v8 = vpack.c.bf16 %v1179_v38, %v1171_v47  ;;  %v855_v5 = vpop.f32.mrb[32].mxu1  ;;  %v6965_v10 = vpack.c.bf16 %v1180_v57, %v1172_v50  ;;  %v6035_v25 = vld [vmem:[#allocation5 + $0x424] ss:$16 sps:$4 sm:$0xff]  }
 0x187   :  { %v856_v33 = vadd.f32 %v855_v5, %v6874_v56  ;;  %v857_v62 = vpop.f32.mrb[33].mxu1  ;;  %v6968_v12 = vpack.c.bf16 %v1181_v4, %v1173_v55  ;;  %v968_v9 = vpop.f32.mrb[32].mxu0 }
 0x188   :  { %2973 = vmatmul.mubr.bf16.gmra.mrb[76].mxu0 %v6884_v63  ;;  %3425 = vmatmul.mubr.bf16.gmra.mrb[108].mxu1 %v6884_v63  ;;  %v858_v17 = vadd.f32 %v857_v62, %v6879_v58  ;;  %v859_v30 = vpop.f32.mrb[34].mxu1  ;;  %v969_v18 = vadd.f32 %v968_v9, %v6882_v59  ;;  %v970_v6 = vpop.f32.mrb[33].mxu0  ;;  %v6032_v63 = vld [vmem:[#allocation5 + $0x40c] ss:$16 sps:$4 sm:$0xff]  }
 0x189   :  { %3012 = vmatpush1.bf16.msra.mxu0 %v6015_v60  ;;  %3464 = vmatpush1.bf16.msra.mxu1 %v6018_v35  ;;  %v1186_v22 = vmax.f32 %v856_v33, 0.0  ;;  %v860_v39 = vadd.f32 %v859_v30, %v6874_v56  ;;  %v861_v45 = vpop.f32.mrb[35].mxu1  ;;  %v971_v28 = vadd.f32 %v970_v6, %v6887_v0  ;;  %v972_v29 = vpop.f32.mrb[34].mxu0  ;;  %v6038_v60 = vld [vmem:[#allocation5 + $0x42c] ss:$16 sps:$4 sm:$0xff]  }
 0x18a   :  { %3013 = vmatprep.subr.bf16.mxu0 %v6023_v7  ;;  %3015 = vmatprep.mubr.bf16.mxu0 %v6903_v48  ;;  %v1187_v32 = vmax.f32 %v858_v17, 0.0  ;;  %v862_v44 = vadd.f32 %v861_v45, %v6879_v58  ;;  %v1188_v40 = vmax.f32 %v969_v18, 0.0  ;;  %v973_v41 = vadd.f32 %v972_v29, %v6882_v59  ;;  %v974_v42 = vpop.f32.mrb[35].mxu0  ;;  %v6036_v33 = vld [vmem:[#allocation5 + $0x428] ss:$16 sps:$4 sm:$0xff]  }
 0x18b   :  { %3465 = vmatprep.subr.bf16.mxu1 %v6026_v11  ;;  %3467 = vmatprep.mubr.bf16.mxu1 %v6903_v48  ;;  %v1194_v46 = vmax.f32 %v860_v39, 0.0  ;;  %v1189_v16 = vmax.f32 %v971_v28, 0.0  ;;  %v975_v47 = vadd.f32 %v974_v42, %v6887_v0  ;;  %v6033_v11 = vld [vmem:[#allocation5 + $0x420] ss:$16 sps:$4 sm:$0xff]   ;;  %v6041_v17 = vld [vmem:[#allocation5 + $0x444] ss:$16 sps:$4 sm:$0xff]  }
 0x18c   :  { %v1195_v2 = vmax.f32 %v862_v44, 0.0  ;;  %v1196_v50 = vmax.f32 %v973_v41, 0.0 }
 0x18d   :  { %3014 = vmatpush1.bf16.msra.mxu0 %v6021_v14  ;;  %3466 = vmatpush1.bf16.msra.mxu1 %v6024_v20  ;;  %v6981_v54 = vpack.c.bf16 %v1194_v46, %v1186_v22  ;;  %v1197_v55 = vmax.f32 %v975_v47, 0.0  ;;  %v6039_v46 = vld [vmem:[#allocation5 + $0x440] ss:$16 sps:$4 sm:$0xff]  }
 0x18e   :  { %3096 = vmatprep.subr.bf16.mxu0 %v6029_v21  ;;  %3548 = vmatprep.subr.bf16.mxu1 %v6032_v63  ;;  %v6983_v38 = vpack.c.bf16 %v1195_v2, %v1187_v32  ;;  %v865_v57 = vpop.f32.mrb[36].mxu1  ;;  %v6985_v48 = vpack.c.bf16 %v1196_v50, %v1188_v40  ;;  %v6047_v50 = vld [vmem:[#allocation5 + $0x464] ss:$16 sps:$4 sm:$0xff]  }
 0x18f   :  { %v866_v35 = vadd.f32 %v865_v57, %v6874_v56  ;;  %v867_v4 = vpop.f32.mrb[37].mxu1  ;;  %v6988_v7 = vpack.c.bf16 %v1197_v55, %v1189_v16  ;;  %v978_v5 = vpop.f32.mrb[36].mxu0  ;;  %v6042_v16 = vld [vmem:[#allocation5 + $0x448] ss:$16 sps:$4 sm:$0xff]   ;;  %v6050_v55 = vld [vmem:[#allocation5 + $0x46c] ss:$16 sps:$4 sm:$0xff]  }
 0x190   :  { %3016 = vmatmul.mubr.bf16.vlgmr.msra.gmra.mrb[48].mxu0 %v6901_v43  ;;  %3468 = vmatmul.mubr.bf16.vlgmr.msra.gmra.mrb[80].mxu1 %v6901_v43  ;;  %v868_v62 = vadd.f32 %v867_v4, %v6879_v58  ;;  %v869_v9 = vpop.f32.mrb[38].mxu1  ;;  %v979_v14 = vadd.f32 %v978_v5, %v6882_v59  ;;  %v980_v20 = vpop.f32.mrb[37].mxu0  ;;  %v6044_v43 = vld [vmem:[#allocation5 + $0x44c] ss:$16 sps:$4 sm:$0xff]   ;;  %v6045_v4 = vld [vmem:[#allocation5 + $0x460] ss:$16 sps:$4 sm:$0xff]  }
 0x191   :  { %3097 = vmatpush1.bf16.msra.mxu0 %v6027_v51  ;;  %3549 = vmatpush1.bf16.msra.mxu1 %v6030_v52  ;;  %v1202_v30 = vmax.f32 %v866_v35, 0.0  ;;  %v870_v18 = vadd.f32 %v869_v9, %v6874_v56  ;;  %v871_v6 = vpop.f32.mrb[39].mxu1  ;;  %v981_v21 = vadd.f32 %v980_v20, %v6887_v0  ;;  %v982_v22 = vpop.f32.mrb[38].mxu0  ;;  %v6048_v5 = vld [vmem:[#allocation5 + $0x468] ss:$16 sps:$4 sm:$0xff]  }
 0x192   :  { %3098 = vmatprep.subr.bf16.mxu0 %v6035_v25  ;;  %3025 = vmatprep.mubr.bf16.mxu0 %v6923_v23  ;;  %v1203_v39 = vmax.f32 %v868_v62, 0.0  ;;  %v872_v45 = vadd.f32 %v871_v6, %v6879_v58  ;;  %v1204_v28 = vmax.f32 %v979_v14, 0.0  ;;  %v983_v29 = vadd.f32 %v982_v22, %v6882_v59  ;;  %v984_v63 = vpop.f32.mrb[39].mxu0  ;;  %v6053_v14 = vld [vmem:[#allocation5 + $0x484] ss:$16 sps:$4 sm:$0xff]  }
 0x193   :  { %3477 = vmatprep.mubr.bf16.mxu1 %v6923_v23  ;;  %3550 = vmatprep.subr.bf16.mxu1 %v6038_v60  ;;  %v1210_v32 = vmax.f32 %v870_v18, 0.0  ;;  %v1205_v44 = vmax.f32 %v981_v21, 0.0  ;;  %v985_v40 = vadd.f32 %v984_v63, %v6887_v0 }
 0x194   :  { %v1211_v41 = vmax.f32 %v872_v45, 0.0  ;;  %v1212_v42 = vmax.f32 %v983_v29, 0.0 }
 0x195   :  { %3099 = vmatpush1.bf16.msra.mxu0 %v6033_v11  ;;  %3551 = vmatpush1.bf16.msra.mxu1 %v6036_v33  ;;  %v7001_v47 = vpack.c.bf16 %v1210_v32, %v1202_v30  ;;  %v1213_v2 = vmax.f32 %v985_v40, 0.0  ;;  %v6051_v40 = vld [vmem:[#allocation5 + $0x480] ss:$16 sps:$4 sm:$0xff]  }
 0x196   :  { %3100 = vmatprep.subr.bf16.mxu0 %v6041_v17  ;;  %3552 = vmatprep.subr.bf16.mxu1 %v6044_v43  ;;  %v7003_v51 = vpack.c.bf16 %v1211_v41, %v1203_v39  ;;  %v875_v23 = vpop.f32.mrb[40].mxu1  ;;  %v7005_v52 = vpack.c.bf16 %v1212_v42, %v1204_v28  ;;  %v6054_v41 = vld [vmem:[#allocation5 + $0x488] ss:$16 sps:$4 sm:$0xff]  }
 0x197   :  { %v876_v25 = vadd.f32 %v875_v23, %v6874_v56  ;;  %v877_v57 = vpop.f32.mrb[41].mxu1  ;;  %v7008_v60 = vpack.c.bf16 %v1213_v2, %v1205_v44  ;;  %v988_v35 = vpop.f32.mrb[40].mxu0  ;;  %v6057_v23 = vld [vmem:[#allocation5 + $0x4a0] ss:$16 sps:$4 sm:$0xff]  }
 0x198   :  { %3026 = vmatmul.mubr.bf16.gmra.mrb[52].mxu0 %v6921_v36  ;;  %3478 = vmatmul.mubr.bf16.gmra.mrb[84].mxu1 %v6921_v36  ;;  %v878_v11 = vadd.f32 %v877_v57, %v6879_v58  ;;  %v879_v33 = vpop.f32.mrb[42].mxu1  ;;  %v989_v62 = vadd.f32 %v988_v35, %v6882_v59  ;;  %v990_v9 = vpop.f32.mrb[41].mxu0  ;;  %v6056_v36 = vld [vmem:[#allocation5 + $0x48c] ss:$16 sps:$4 sm:$0xff]  }
 0x199   :  { %3101 = vmatpush1.bf16.msra.mxu0 %v6039_v46  ;;  %3553 = vmatpush1.bf16.msra.mxu1 %v6042_v16  ;;  %v1218_v20 = vmax.f32 %v876_v25, 0.0  ;;  %v880_v17 = vadd.f32 %v879_v33, %v6874_v56  ;;  %v881_v30 = vpop.f32.mrb[43].mxu1  ;;  %v991_v18 = vadd.f32 %v990_v9, %v6887_v0  ;;  %v992_v6 = vpop.f32.mrb[42].mxu0  ;;  %v6059_v16 = vld [vmem:[#allocation5 + $0x4a4] ss:$16 sps:$4 sm:$0xff]  }
 0x19a   :  { %3102 = vmatprep.subr.bf16.mxu0 %v6047_v50  ;;  %3035 = vmatprep.mubr.bf16.mxu0 %v6943_v3  ;;  %v1219_v21 = vmax.f32 %v878_v11, 0.0  ;;  %v882_v22 = vadd.f32 %v881_v30, %v6879_v58  ;;  %v1220_v43 = vmax.f32 %v989_v62, 0.0  ;;  %v993_v39 = vadd.f32 %v992_v6, %v6882_v59  ;;  %v994_v45 = vpop.f32.mrb[43].mxu0  ;;  %v6060_v11 = vld [vmem:[#allocation5 + $0x4a8] ss:$16 sps:$4 sm:$0xff]  }
 0x19b   :  { %3487 = vmatprep.mubr.bf16.mxu1 %v6943_v3  ;;  %3554 = vmatprep.subr.bf16.mxu1 %v6050_v55  ;;  %v1226_v28 = vmax.f32 %v880_v17, 0.0  ;;  %v1221_v29 = vmax.f32 %v991_v18, 0.0  ;;  %v995_v63 = vadd.f32 %v994_v45, %v6887_v0  ;;  %v6062_v55 = vld [vmem:[#allocation5 + $0x4ac] ss:$16 sps:$4 sm:$0xff]   ;;  %v6065_v17 = vld [vmem:[#allocation5 + $0x4c4] ss:$16 sps:$4 sm:$0xff]  }
 0x19c   :  { %v1227_v32 = vmax.f32 %v882_v22, 0.0  ;;  %v1228_v44 = vmax.f32 %v993_v39, 0.0 }
 0x19d   :  { %3103 = vmatpush1.bf16.msra.mxu0 %v6045_v4  ;;  %3555 = vmatpush1.bf16.msra.mxu1 %v6048_v5  ;;  %v7021_v42 = vpack.c.bf16 %v1226_v28, %v1218_v20  ;;  %v1229_v46 = vmax.f32 %v995_v63, 0.0  ;;  %v334_v5 = vsub.s32 6, %v6636_v26  ;;  %v338_v20 = vsub.s32 7, %v6636_v26 }
 0x19e   :  { %3104 = vmatprep.subr.bf16.mxu0 %v6053_v14  ;;  %3556 = vmatprep.subr.bf16.mxu1 %v6056_v36  ;;  %v7023_v2 = vpack.c.bf16 %v1227_v32, %v1219_v21  ;;  %v885_v3 = vpop.f32.mrb[44].mxu1  ;;  %v7025_v50 = vpack.c.bf16 %v1228_v44, %v1220_v43  ;;  %v6397_v32 = vld [vmem:[%s7576_s5] sm:$0xff] }
 0x19f   :  { %v886_v25 = vadd.f32 %v885_v3, %v6874_v56  ;;  %v887_v57 = vpop.f32.mrb[45].mxu1  ;;  %v7028_v35 = vpack.c.bf16 %v1229_v46, %v1221_v29  ;;  %v998_v4 = vpop.f32.mrb[44].mxu0  ;;  %v7046_v44 = vrot.slane %v6397_v32, %v334_v5  ;;  %v6066_v46 = vld [vmem:[#allocation5 + $0x4c8] ss:$16 sps:$4 sm:$0xff]  }
 0x1a0   :  { %3036 = vmatmul.mubr.bf16.gmra.mrb[56].mxu0 %v6941_v13  ;;  %3488 = vmatmul.mubr.bf16.gmra.mrb[88].mxu1 %v6941_v13  ;;  %v888_v33 = vadd.f32 %v887_v57, %v6879_v58  ;;  %v889_v62 = vpop.f32.mrb[46].mxu1  ;;  %v999_v9 = vadd.f32 %v998_v4, %v6882_v59  ;;  %v1000_v14 = vpop.f32.mrb[45].mxu0  ;;  %v6068_v13 = vld [vmem:[#allocation5 + $0x4cc] ss:$16 sps:$4 sm:$0xff]  }
 0x1a1   :  { %3105 = vmatpush1.bf16.msra.mxu0 %v6051_v40  ;;  %3557 = vmatpush1.bf16.msra.mxu1 %v6054_v41  ;;  %v1234_v30 = vmax.f32 %v886_v25, 0.0  ;;  %v890_v18 = vadd.f32 %v889_v62, %v6874_v56  ;;  %v891_v6 = vpop.f32.mrb[47].mxu1  ;;  %v1001_v36 = vadd.f32 %v1000_v14, %v6887_v0  ;;  %v1002_v21 = vpop.f32.mrb[46].mxu0  ;;  %v6074_v57 = vld [vmem:[#allocation5 + $0x4ec] ss:$16 sps:$4 sm:$0xff]  }
 0x1a2   :  { %3106 = vmatprep.subr.bf16.mxu0 %v6059_v16  ;;  %3045 = vmatprep.mubr.bf16.mxu0 %v6963_v8  ;;  %v1235_v22 = vmax.f32 %v888_v33, 0.0  ;;  %v892_v43 = vadd.f32 %v891_v6, %v6879_v58  ;;  %v1236_v39 = vmax.f32 %v999_v9, 0.0  ;;  %v1003_v45 = vadd.f32 %v1002_v21, %v6882_v59  ;;  %v1004_v28 = vpop.f32.mrb[47].mxu0  ;;  %v6063_v59 = vld [vmem:[#allocation5 + $0x4c0] ss:$16 sps:$4 sm:$0xff]  }
 0x1a3   :  { %3497 = vmatprep.mubr.bf16.mxu1 %v6963_v8  ;;  %3558 = vmatprep.subr.bf16.mxu1 %v6062_v55  ;;  %v1242_v29 = vmax.f32 %v890_v18, 0.0  ;;  %v1237_v56 = vmax.f32 %v1001_v36, 0.0  ;;  %v1005_v63 = vadd.f32 %v1004_v28, %v6887_v0  ;;  %v7048_v58 = vrot.slane %v6397_v32, %v338_v20  ;;  %v6071_v0 = vld [vmem:[#allocation5 + $0x4e4] ss:$16 sps:$4 sm:$0xff]   ;;  %v6069_v62 = vld [vmem:[#allocation5 + $0x4e0] ss:$16 sps:$4 sm:$0xff]  }
 0x1a4   :  { %v1243_v40 = vmax.f32 %v892_v43, 0.0  ;;  %v1244_v41 = vmax.f32 %v1003_v45, 0.0  ;;  %v6072_v9 = vld [vmem:[#allocation5 + $0x4e8] ss:$16 sps:$4 sm:$0xff]   ;;  %v6080_v18 = vld [vmem:[#allocation5 + $0x50c] ss:$16 sps:$4 sm:$0xff]  }
 0x1a5   :  { %3107 = vmatpush1.bf16.msra.mxu0 %v6057_v23  ;;  %3559 = vmatpush1.bf16.msra.mxu1 %v6060_v11  ;;  %v7050_v8 = vpack.c.bf16 %v1242_v29, %v1234_v30  ;;  %v1245_v16 = vmax.f32 %v1005_v63, 0.0  ;;  %v6077_v30 = vld [vmem:[#allocation5 + $0x504] ss:$16 sps:$4 sm:$0xff]   ;;  %v6086_v29 = vld [vmem:[#allocation5 + $0x52c] ss:$16 sps:$4 sm:$0xff]  }
 0x1a6   :  { %3108 = vmatprep.subr.bf16.mxu0 %v6065_v17  ;;  %3560 = vmatprep.subr.bf16.mxu1 %v6068_v13  ;;  %v7052_v3 = vpack.c.bf16 %v1243_v40, %v1235_v22  ;;  %v7054_v55 = vpack.c.bf16 %v1244_v41, %v1236_v39  ;;  %v1041_v25 = vpop.f32.mrb[48].mxu1  ;;  %v6075_v13 = vld [vmem:[#allocation5 + $0x500] ss:$16 sps:$4 sm:$0xff]   ;;  %v6078_v22 = vld [vmem:[#allocation5 + $0x508] ss:$16 sps:$4 sm:$0xff]  }
 0x1a7   :  { %v7056_v4 = vpack.c.bf16 %v1245_v16, %v1237_v56  ;;  %v1042_v5 = vadd.f32 %v1041_v25, %v7046_v44  ;;  %v1043_v23 = vpop.f32.mrb[49].mxu1  ;;  %v6083_v39 = vld [vmem:[#allocation5 + $0x524] ss:$16 sps:$4 sm:$0xff]   ;;  %v6081_v40 = vld [vmem:[#allocation5 + $0x520] ss:$16 sps:$4 sm:$0xff]  }
 0x1a8   :  { %3046 = vmatmul.mubr.bf16.gmra.mrb[60].mxu0 %v6961_v61  ;;  %3498 = vmatmul.mubr.bf16.gmra.mrb[92].mxu1 %v6961_v61  ;;  %v1044_v11 = vadd.f32 %v1043_v23, %v7048_v58  ;;  %v1045_v33 = vpop.f32.mrb[50].mxu1  ;;  %v6084_v41 = vld [vmem:[#allocation5 + $0x528] ss:$16 sps:$4 sm:$0xff]   ;;  %v6092_v25 = vld [vmem:[#allocation5 + $0x54c] ss:$16 sps:$4 sm:$0xff]  }
 0x1a9   :  { %3109 = vmatpush1.bf16.msra.mxu0 %v6063_v59  ;;  %3561 = vmatpush1.bf16.msra.mxu1 %v6066_v46  ;;  %v1126_v14 = vmax.f32 %v1042_v5, 0.0  ;;  %v1046_v20 = vadd.f32 %v1045_v33, %v7046_v44  ;;  %v1047_v17 = vpop.f32.mrb[51].mxu1  ;;  %v6090_v33 = vld [vmem:[#allocation5 + $0x548] ss:$16 sps:$4 sm:$0xff]  }
 0x1aa   :  { %3110 = vmatprep.subr.bf16.mxu0 %v6071_v0  ;;  %3055 = vmatprep.mubr.bf16.mxu0 %v6983_v38  ;;  %v1127_v6 = vmax.f32 %v1044_v11, 0.0  ;;  %v1048_v36 = vadd.f32 %v1047_v17, %v7048_v58  ;;  %v6089_v0 = vld [vmem:[#allocation5 + $0x544] ss:$16 sps:$4 sm:$0xff]   ;;  %v6087_v11 = vld [vmem:[#allocation5 + $0x540] ss:$16 sps:$4 sm:$0xff]  }
 0x1ab   :  { %3507 = vmatprep.mubr.bf16.mxu1 %v6983_v38  ;;  %3562 = vmatprep.subr.bf16.mxu1 %v6074_v57  ;;  %v1134_v61 = vmax.f32 %v1046_v20, 0.0  ;;  %v6098_v17 = vld [vmem:[#allocation5 + $0x56c] ss:$16 sps:$4 sm:$0xff]  }
 0x1ac   :  { %v1135_v21 = vmax.f32 %v1048_v36, 0.0  ;;  %v6093_v36 = vld [vmem:[#allocation5 + $0x560] ss:$16 sps:$4 sm:$0xff]  }
 0x1ad   :  { %3111 = vmatpush1.bf16.msra.mxu0 %v6069_v62  ;;  %3563 = vmatpush1.bf16.msra.mxu1 %v6072_v9  ;;  %v7066_v43 = vpack.c.bf16 %v1134_v61, %v1126_v14  ;;  %v6095_v9 = vld [vmem:[#allocation5 + $0x564] ss:$16 sps:$4 sm:$0xff]   ;;  %v6096_v61 = vld [vmem:[#allocation5 + $0x568] ss:$16 sps:$4 sm:$0xff]  }
 0x1ae   :  { %3112 = vmatprep.subr.bf16.mxu0 %v6077_v30  ;;  %3564 = vmatprep.subr.bf16.mxu1 %v6080_v18  ;;  %v7068_v45 = vpack.c.bf16 %v1135_v21, %v1127_v6  ;;  %v1051_v28 = vpop.f32.mrb[52].mxu1 }
 0x1af   :  { %v1052_v56 = vadd.f32 %v1051_v28, %v7046_v44  ;;  %v1053_v63 = vpop.f32.mrb[53].mxu1  ;;  %v6104_v28 = vld [vmem:[#allocation5 + $0x58c] ss:$16 sps:$4 sm:$0xff]  }
 0x1b0   :  { %3056 = vmatmul.mubr.bf16.gmra.mrb[64].mxu0 %v6981_v54  ;;  %3508 = vmatmul.mubr.bf16.gmra.mrb[96].mxu1 %v6981_v54  ;;  %v1054_v38 = vadd.f32 %v1053_v63, %v7048_v58  ;;  %v1055_v32 = vpop.f32.mrb[54].mxu1 }
 0x1b1   :  { %3113 = vmatpush1.bf16.msra.mxu0 %v6075_v13  ;;  %3565 = vmatpush1.bf16.msra.mxu1 %v6078_v22  ;;  %v1142_v59 = vmax.f32 %v1052_v56, 0.0  ;;  %v1056_v46 = vadd.f32 %v1055_v32, %v7046_v44  ;;  %v1057_v16 = vpop.f32.mrb[55].mxu1  ;;  %v6102_v32 = vld [vmem:[#allocation5 + $0x588] ss:$16 sps:$4 sm:$0xff]  }
 0x1b2   :  { %3114 = vmatprep.subr.bf16.mxu0 %v6083_v39  ;;  %3065 = vmatprep.mubr.bf16.mxu0 %v7003_v51  ;;  %v1143_v57 = vmax.f32 %v1054_v38, 0.0  ;;  %v1058_v5 = vadd.f32 %v1057_v16, %v7048_v58  ;;  %v6101_v39 = vld [vmem:[#allocation5 + $0x584] ss:$16 sps:$4 sm:$0xff]   ;;  %v6099_v38 = vld [vmem:[#allocation5 + $0x580] ss:$16 sps:$4 sm:$0xff]  }
 0x1b3   :  { %3517 = vmatprep.mubr.bf16.mxu1 %v7003_v51  ;;  %3566 = vmatprep.subr.bf16.mxu1 %v6086_v29  ;;  %v1150_v54 = vmax.f32 %v1056_v46, 0.0  ;;  %v6110_v16 = vld [vmem:[#allocation5 + $0x5ac] ss:$16 sps:$4 sm:$0xff]  }
 0x1b4   :  { %v1151_v23 = vmax.f32 %v1058_v5, 0.0  ;;  %v6105_v5 = vld [vmem:[#allocation5 + $0x5a0] ss:$16 sps:$4 sm:$0xff]  }
 0x1b5   :  { %3115 = vmatpush1.bf16.msra.mxu0 %v6081_v40  ;;  %3567 = vmatpush1.bf16.msra.mxu1 %v6084_v41  ;;  %v7078_v62 = vpack.c.bf16 %v1150_v54, %v1142_v59  ;;  %v6107_v41 = vld [vmem:[#allocation5 + $0x5a4] ss:$16 sps:$4 sm:$0xff]   ;;  %v6108_v54 = vld [vmem:[#allocation5 + $0x5a8] ss:$16 sps:$4 sm:$0xff]  }
 0x1b6   :  { %3116 = vmatprep.subr.bf16.mxu0 %v6089_v0  ;;  %3568 = vmatprep.subr.bf16.mxu1 %v6092_v25  ;;  %v7080_v14 = vpack.c.bf16 %v1151_v23, %v1143_v57  ;;  %v1061_v20 = vpop.f32.mrb[56].mxu1 }
 0x1b7   :  { %v1062_v30 = vadd.f32 %v1061_v20, %v7046_v44  ;;  %v1063_v18 = vpop.f32.mrb[57].mxu1  ;;  %v6116_v20 = vld [vmem:[#allocation5 + $0x5cc] ss:$16 sps:$4 sm:$0xff]  }
 0x1b8   :  { %3066 = vmatmul.mubr.bf16.gmra.mrb[68].mxu0 %v7001_v47  ;;  %3518 = vmatmul.mubr.bf16.gmra.mrb[100].mxu1 %v7001_v47  ;;  %v1064_v51 = vadd.f32 %v1063_v18, %v7048_v58  ;;  %v1065_v6 = vpop.f32.mrb[58].mxu1 }
 0x1b9   :  { %3117 = vmatpush1.bf16.msra.mxu0 %v6087_v11  ;;  %3569 = vmatpush1.bf16.msra.mxu1 %v6090_v33  ;;  %v1158_v21 = vmax.f32 %v1062_v30, 0.0  ;;  %v1066_v13 = vadd.f32 %v1065_v6, %v7046_v44  ;;  %v1067_v22 = vpop.f32.mrb[59].mxu1  ;;  %v6114_v6 = vld [vmem:[#allocation5 + $0x5c8] ss:$16 sps:$4 sm:$0xff]  }
 0x1ba   :  { %3118 = vmatprep.subr.bf16.mxu0 %v6095_v9  ;;  %3075 = vmatprep.mubr.bf16.mxu0 %v7023_v2  ;;  %v1159_v29 = vmax.f32 %v1064_v51, 0.0  ;;  %v1068_v56 = vadd.f32 %v1067_v22, %v7048_v58  ;;  %v6113_v9 = vld [vmem:[#allocation5 + $0x5c4] ss:$16 sps:$4 sm:$0xff]   ;;  %v6111_v51 = vld [vmem:[#allocation5 + $0x5c0] ss:$16 sps:$4 sm:$0xff]  }
 0x1bb   :  { %3527 = vmatprep.mubr.bf16.mxu1 %v7023_v2  ;;  %3570 = vmatprep.subr.bf16.mxu1 %v6098_v17  ;;  %v1166_v47 = vmax.f32 %v1066_v13, 0.0  ;;  %v6122_v22 = vld [vmem:[#allocation5 + $0x5ec] ss:$16 sps:$4 sm:$0xff]  }
 0x1bc   :  { %v1167_v63 = vmax.f32 %v1068_v56, 0.0  ;;  %v6117_v56 = vld [vmem:[#allocation5 + $0x5e0] ss:$16 sps:$4 sm:$0xff]  }
 0x1bd   :  { %3119 = vmatpush1.bf16.msra.mxu0 %v6093_v36  ;;  %3571 = vmatpush1.bf16.msra.mxu1 %v6096_v61  ;;  %v7090_v40 = vpack.c.bf16 %v1166_v47, %v1158_v21  ;;  %v6119_v61 = vld [vmem:[#allocation5 + $0x5e4] ss:$16 sps:$4 sm:$0xff]   ;;  %v6120_v47 = vld [vmem:[#allocation5 + $0x5e8] ss:$16 sps:$4 sm:$0xff]  }
 0x1be   :  { %3120 = vmatprep.subr.bf16.mxu0 %v6101_v39  ;;  %3572 = vmatprep.subr.bf16.mxu1 %v6104_v28  ;;  %v7092_v59 = vpack.c.bf16 %v1167_v63, %v1159_v29  ;;  %v1071_v46 = vpop.f32.mrb[60].mxu1 }
 0x1bf   :  { %v1072_v0 = vadd.f32 %v1071_v46, %v7046_v44  ;;  %v1073_v25 = vpop.f32.mrb[61].mxu1  ;;  %v6128_v46 = vld [vmem:[#allocation5 + $0x60c] ss:$16 sps:$4 sm:$0xff]  }
 0x1c0   :  { %3076 = vmatmul.mubr.bf16.gmra.mrb[72].mxu0 %v7021_v42  ;;  %3528 = vmatmul.mubr.bf16.gmra.mrb[104].mxu1 %v7021_v42  ;;  %v1074_v2 = vadd.f32 %v1073_v25, %v7048_v58  ;;  %v1075_v57 = vpop.f32.mrb[62].mxu1 }
 0x1c1   :  { %3121 = vmatpush1.bf16.msra.mxu0 %v6099_v38  ;;  %3573 = vmatpush1.bf16.msra.mxu1 %v6102_v32  ;;  %v1174_v23 = vmax.f32 %v1072_v0, 0.0  ;;  %v1076_v11 = vadd.f32 %v1075_v57, %v7046_v44  ;;  %v1077_v33 = vpop.f32.mrb[63].mxu1  ;;  %v6126_v57 = vld [vmem:[#allocation5 + $0x608] ss:$16 sps:$4 sm:$0xff]  }
 0x1c2   :  { %3122 = vmatprep.subr.bf16.mxu0 %v6107_v41  ;;  %3085 = vmatprep.mubr.bf16.mxu0 %v7052_v3  ;;  %v1175_v17 = vmax.f32 %v1074_v2, 0.0  ;;  %v1078_v30 = vadd.f32 %v1077_v33, %v7048_v58  ;;  %v6125_v41 = vld [vmem:[#allocation5 + $0x604] ss:$16 sps:$4 sm:$0xff]   ;;  %v6123_v2 = vld [vmem:[#allocation5 + $0x600] ss:$16 sps:$4 sm:$0xff]  }
 0x1c3   :  { %3537 = vmatprep.mubr.bf16.mxu1 %v7052_v3  ;;  %3574 = vmatprep.subr.bf16.mxu1 %v6110_v16  ;;  %v1182_v42 = vmax.f32 %v1076_v11, 0.0  ;;  %v6134_v33 = vld [vmem:[#allocation5 + $0x62c] ss:$16 sps:$4 sm:$0xff]  }
 0x1c4   :  { %v1183_v18 = vmax.f32 %v1078_v30, 0.0  ;;  %v6129_v30 = vld [vmem:[#allocation5 + $0x620] ss:$16 sps:$4 sm:$0xff]  }
 0x1c5   :  { %3123 = vmatpush1.bf16.msra.mxu0 %v6105_v5  ;;  %3575 = vmatpush1.bf16.msra.mxu1 %v6108_v54  ;;  %v7102_v36 = vpack.c.bf16 %v1182_v42, %v1174_v23  ;;  %v6131_v54 = vld [vmem:[#allocation5 + $0x624] ss:$16 sps:$4 sm:$0xff]   ;;  %v6132_v42 = vld [vmem:[#allocation5 + $0x628] ss:$16 sps:$4 sm:$0xff]  }
 0x1c6   :  { %3124 = vmatprep.subr.bf16.mxu0 %v6113_v9  ;;  %3576 = vmatprep.subr.bf16.mxu1 %v6116_v20  ;;  %v7104_v21 = vpack.c.bf16 %v1183_v18, %v1175_v17  ;;  %v1081_v13 = vpop.f32.mrb[64].mxu1 }
 0x1c7   :  { %v1082_v39 = vadd.f32 %v1081_v13, %v7046_v44  ;;  %v1083_v28 = vpop.f32.mrb[65].mxu1  ;;  %v6140_v13 = vld [vmem:[#allocation5 + $0x64c] ss:$16 sps:$4 sm:$0xff]  }
 0x1c8   :  { %3086 = vmatmul.mubr.bf16.gmra.mrb[76].mxu0 %v7050_v8  ;;  %3538 = vmatmul.mubr.bf16.gmra.mrb[108].mxu1 %v7050_v8  ;;  %v1084_v3 = vadd.f32 %v1083_v28, %v7048_v58  ;;  %v1085_v29 = vpop.f32.mrb[66].mxu1 }
 0x1c9   :  { %3125 = vmatpush1.bf16.msra.mxu0 %v6111_v51  ;;  %3577 = vmatpush1.bf16.msra.mxu1 %v6114_v6  ;;  %v1190_v63 = vmax.f32 %v1082_v39, 0.0  ;;  %v1086_v38 = vadd.f32 %v1085_v29, %v7046_v44  ;;  %v1087_v32 = vpop.f32.mrb[67].mxu1  ;;  %v6138_v29 = vld [vmem:[#allocation5 + $0x648] ss:$16 sps:$4 sm:$0xff]  }
 0x1ca   :  { %3126 = vmatprep.subr.bf16.mxu0 %v6119_v61  ;;  %3128 = vmatprep.mubr.bf16.mxu0 %v6908_v53  ;;  %v1191_v16 = vmax.f32 %v1084_v3, 0.0  ;;  %v1088_v0 = vadd.f32 %v1087_v32, %v7048_v58  ;;  %v6137_v61 = vld [vmem:[#allocation5 + $0x644] ss:$16 sps:$4 sm:$0xff]   ;;  %v6135_v3 = vld [vmem:[#allocation5 + $0x640] ss:$16 sps:$4 sm:$0xff]  }
 0x1cb   :  { %3578 = vmatprep.subr.bf16.mxu1 %v6122_v22  ;;  %3580 = vmatprep.mubr.bf16.mxu1 %v6908_v53  ;;  %v1198_v8 = vmax.f32 %v1086_v38, 0.0  ;;  %v6146_v32 = vld [vmem:[#allocation5 + $0x66c] ss:$16 sps:$4 sm:$0xff]  }
 0x1cc   :  { %v1199_v25 = vmax.f32 %v1088_v0, 0.0  ;;  %v6141_v0 = vld [vmem:[#allocation5 + $0x660] ss:$16 sps:$4 sm:$0xff]  }
 0x1cd   :  { %3127 = vmatpush1.bf16.msra.mxu0 %v6117_v56  ;;  %3579 = vmatpush1.bf16.msra.mxu1 %v6120_v47  ;;  %v7114_v5 = vpack.c.bf16 %v1198_v8, %v1190_v63  ;;  %v6143_v47 = vld [vmem:[#allocation5 + $0x664] ss:$16 sps:$4 sm:$0xff]   ;;  %v6144_v8 = vld [vmem:[#allocation5 + $0x668] ss:$16 sps:$4 sm:$0xff]  }
 0x1ce   :  { %3209 = vmatprep.subr.bf16.mxu0 %v6125_v41  ;;  %3661 = vmatprep.subr.bf16.mxu1 %v6128_v46  ;;  %v7116_v23 = vpack.c.bf16 %v1199_v25, %v1191_v16  ;;  %v1091_v11 = vpop.f32.mrb[68].mxu1 }
 0x1cf   :  { %v1092_v9 = vadd.f32 %v1091_v11, %v7046_v44  ;;  %v1093_v20 = vpop.f32.mrb[69].mxu1  ;;  %v6152_v11 = vld [vmem:[#allocation5 + $0x68c] ss:$16 sps:$4 sm:$0xff]  }
 0x1d0   :  { %3129 = vmatmul.mubr.bf16.vlgmr.msra.gmra.mrb[48].mxu0 %v6905_v49  ;;  %3581 = vmatmul.mubr.bf16.vlgmr.msra.gmra.mrb[80].mxu1 %v6905_v49  ;;  %v1094_v53 = vadd.f32 %v1093_v20, %v7048_v58  ;;  %v1095_v17 = vpop.f32.mrb[70].mxu1 }
 0x1d1   :  { %3210 = vmatpush1.bf16.msra.mxu0 %v6123_v2  ;;  %3662 = vmatpush1.bf16.msra.mxu1 %v6126_v57  ;;  %v1206_v18 = vmax.f32 %v1092_v9, 0.0  ;;  %v1096_v51 = vadd.f32 %v1095_v17, %v7046_v44  ;;  %v1097_v6 = vpop.f32.mrb[71].mxu1  ;;  %v6150_v17 = vld [vmem:[#allocation5 + $0x688] ss:$16 sps:$4 sm:$0xff]  }
 0x1d2   :  { %3211 = vmatprep.subr.bf16.mxu0 %v6131_v54  ;;  %3138 = vmatprep.mubr.bf16.mxu0 %v6928_v34  ;;  %v1207_v22 = vmax.f32 %v1094_v53, 0.0  ;;  %v1098_v39 = vadd.f32 %v1097_v6, %v7048_v58  ;;  %v6149_v54 = vld [vmem:[#allocation5 + $0x684] ss:$16 sps:$4 sm:$0xff]   ;;  %v6147_v53 = vld [vmem:[#allocation5 + $0x680] ss:$16 sps:$4 sm:$0xff]  }
 0x1d3   :  { %3590 = vmatprep.mubr.bf16.mxu1 %v6928_v34  ;;  %3663 = vmatprep.subr.bf16.mxu1 %v6134_v33  ;;  %v1214_v49 = vmax.f32 %v1096_v51, 0.0  ;;  %v6158_v6 = vld [vmem:[#allocation5 + $0x6ac] ss:$16 sps:$4 sm:$0xff]  }
 0x1d4   :  { %v1215_v28 = vmax.f32 %v1098_v39, 0.0  ;;  %v6153_v39 = vld [vmem:[#allocation5 + $0x6a0] ss:$16 sps:$4 sm:$0xff]  }
 0x1d5   :  { %3212 = vmatpush1.bf16.msra.mxu0 %v6129_v30  ;;  %3664 = vmatpush1.bf16.msra.mxu1 %v6132_v42  ;;  %v7126_v56 = vpack.c.bf16 %v1214_v49, %v1206_v18  ;;  %v6155_v42 = vld [vmem:[#allocation5 + $0x6a4] ss:$16 sps:$4 sm:$0xff]   ;;  %v6156_v49 = vld [vmem:[#allocation5 + $0x6a8] ss:$16 sps:$4 sm:$0xff]  }
 0x1d6   :  { %3213 = vmatprep.subr.bf16.mxu0 %v6137_v61  ;;  %3665 = vmatprep.subr.bf16.mxu1 %v6140_v13  ;;  %v7128_v63 = vpack.c.bf16 %v1215_v28, %v1207_v22  ;;  %v1101_v38 = vpop.f32.mrb[72].mxu1 }
 0x1d7   :  { %v1102_v41 = vadd.f32 %v1101_v38, %v7046_v44  ;;  %v1103_v46 = vpop.f32.mrb[73].mxu1  ;;  %v6164_v38 = vld [vmem:[#allocation5 + $0x6cc] ss:$16 sps:$4 sm:$0xff]  }
 0x1d8   :  { %3139 = vmatmul.mubr.bf16.gmra.mrb[52].mxu0 %v6925_v27  ;;  %3591 = vmatmul.mubr.bf16.gmra.mrb[84].mxu1 %v6925_v27  ;;  %v1104_v34 = vadd.f32 %v1103_v46, %v7048_v58  ;;  %v1105_v16 = vpop.f32.mrb[74].mxu1 }
 0x1d9   :  { %3214 = vmatpush1.bf16.msra.mxu0 %v6135_v3  ;;  %3666 = vmatpush1.bf16.msra.mxu1 %v6138_v29  ;;  %v1222_v25 = vmax.f32 %v1102_v41, 0.0  ;;  %v1106_v2 = vadd.f32 %v1105_v16, %v7046_v44  ;;  %v1107_v57 = vpop.f32.mrb[75].mxu1  ;;  %v6162_v16 = vld [vmem:[#allocation5 + $0x6c8] ss:$16 sps:$4 sm:$0xff]  }
 0x1da   :  { %3215 = vmatprep.subr.bf16.mxu0 %v6143_v47  ;;  %3148 = vmatprep.mubr.bf16.mxu0 %v6948_v19  ;;  %v1223_v33 = vmax.f32 %v1104_v34, 0.0  ;;  %v1108_v9 = vadd.f32 %v1107_v57, %v7048_v58  ;;  %v6161_v47 = vld [vmem:[#allocation5 + $0x6c4] ss:$16 sps:$4 sm:$0xff]   ;;  %v6159_v34 = vld [vmem:[#allocation5 + $0x6c0] ss:$16 sps:$4 sm:$0xff]  }
 0x1db   :  { %3600 = vmatprep.mubr.bf16.mxu1 %v6948_v19  ;;  %3667 = vmatprep.subr.bf16.mxu1 %v6146_v32  ;;  %v1230_v27 = vmax.f32 %v1106_v2, 0.0  ;;  %v6173_v2 = vld [vmem:[#allocation5 + $0x704] ss:$16 sps:$4 sm:$0xff]   ;;  %v6176_v57 = vld [vmem:[#allocation5 + $0x70c] ss:$16 sps:$4 sm:$0xff]  }
 0x1dc   :  { %v1231_v20 = vmax.f32 %v1108_v9, 0.0  ;;  %v6177_v9 = vld [vmem:[#allocation5 + $0x720] ss:$16 sps:$4 sm:$0xff]  }
 0x1dd   :  { %3216 = vmatpush1.bf16.msra.mxu0 %v6141_v0  ;;  %3668 = vmatpush1.bf16.msra.mxu1 %v6144_v8  ;;  %v7138_v30 = vpack.c.bf16 %v1230_v27, %v1222_v25  ;;  %v6170_v25 = vld [vmem:[#allocation5 + $0x6ec] ss:$16 sps:$4 sm:$0xff]   ;;  %v6180_v27 = vld [vmem:[#allocation5 + $0x728] ss:$16 sps:$4 sm:$0xff]  }
 0x1de   :  { %3217 = vmatprep.subr.bf16.mxu0 %v6149_v54  ;;  %3669 = vmatprep.subr.bf16.mxu1 %v6152_v11  ;;  %v7140_v18 = vpack.c.bf16 %v1231_v20, %v1223_v33  ;;  %v1111_v51 = vpop.f32.mrb[76].mxu1  ;;  %v6171_v54 = vld [vmem:[#allocation5 + $0x700] ss:$16 sps:$4 sm:$0xff]   ;;  %v6174_v11 = vld [vmem:[#allocation5 + $0x708] ss:$16 sps:$4 sm:$0xff]  }
 0x1df   :  { %v1112_v61 = vadd.f32 %v1111_v51, %v7046_v44  ;;  %v1113_v13 = vpop.f32.mrb[77].mxu1  ;;  %v6179_v33 = vld [vmem:[#allocation5 + $0x724] ss:$16 sps:$4 sm:$0xff]   ;;  %v6188_v20 = vld [vmem:[#allocation5 + $0x74c] ss:$16 sps:$4 sm:$0xff]  }
 0x1e0   :  { %3149 = vmatmul.mubr.bf16.gmra.mrb[56].mxu0 %v6945_v15  ;;  %3601 = vmatmul.mubr.bf16.gmra.mrb[88].mxu1 %v6945_v15  ;;  %v1114_v19 = vadd.f32 %v1113_v13, %v7048_v58  ;;  %v1115_v22 = vpop.f32.mrb[78].mxu1  ;;  %v6189_v51 = vld [vmem:[#allocation5 + $0x760] ss:$16 sps:$4 sm:$0xff]  }
 0x1e1   :  { %3218 = vmatpush1.bf16.msra.mxu0 %v6147_v53  ;;  %3670 = vmatpush1.bf16.msra.mxu1 %v6150_v17  ;;  %v1238_v28 = vmax.f32 %v1112_v61, 0.0  ;;  %v1116_v3 = vadd.f32 %v1115_v22, %v7046_v44  ;;  %v1117_v29 = vpop.f32.mrb[79].mxu1  ;;  %v6167_v44 = vld [vmem:[#allocation5 + $0x6e4] ss:$16 sps:$4 sm:$0xff]   ;;  %v6183_v53 = vld [vmem:[#allocation5 + $0x740] ss:$16 sps:$4 sm:$0xff]  }
 0x1e2   :  { %3219 = vmatprep.subr.bf16.mxu0 %v6155_v42  ;;  %3158 = vmatprep.mubr.bf16.mxu0 %v6968_v12  ;;  %v1239_v32 = vmax.f32 %v1114_v19, 0.0  ;;  %v1118_v41 = vadd.f32 %v1117_v29, %v7048_v58  ;;  %v6168_v58 = vld [vmem:[#allocation5 + $0x6e8] ss:$16 sps:$4 sm:$0xff]   ;;  %v6191_v42 = vld [vmem:[#allocation5 + $0x764] ss:$16 sps:$4 sm:$0xff]  }
 0x1e3   :  { %3610 = vmatprep.mubr.bf16.mxu1 %v6968_v12  ;;  %3671 = vmatprep.subr.bf16.mxu1 %v6158_v6  ;;  %v1246_v15 = vmax.f32 %v1116_v3, 0.0  ;;  %v6165_v12 = vld [vmem:[#allocation5 + $0x6e0] ss:$16 sps:$4 sm:$0xff]   ;;  %v6186_v17 = vld [vmem:[#allocation5 + $0x748] ss:$16 sps:$4 sm:$0xff]  }
 0x1e4   :  { %v1247_v46 = vmax.f32 %v1118_v41, 0.0  ;;  %v6192_v6 = vld [vmem:[#allocation5 + $0x768] ss:$16 sps:$4 sm:$0xff]   ;;  %v6200_v61 = vld [vmem:[#allocation5 + $0x78c] ss:$16 sps:$4 sm:$0xff]  }
 0x1e5   :  { %3220 = vmatpush1.bf16.msra.mxu0 %v6153_v39  ;;  %3672 = vmatpush1.bf16.msra.mxu1 %v6156_v49  ;;  %v7150_v0 = vpack.c.bf16 %v1246_v15, %v1238_v28  ;;  %v6195_v13 = vld [vmem:[#allocation5 + $0x780] ss:$16 sps:$4 sm:$0xff]   ;;  %v6198_v19 = vld [vmem:[#allocation5 + $0x788] ss:$16 sps:$4 sm:$0xff]   ;;  %v6203_v22 = vld [vmem:[#allocation5 + $0x7a4] ss:$16 sps:$4 sm:$0xff]  }
 0x1e6   :  { %3221 = vmatprep.subr.bf16.mxu0 %v6161_v47  ;;  %3673 = vmatprep.subr.bf16.mxu1 %v6164_v38  ;;  %v7152_v8 = vpack.c.bf16 %v1247_v46, %v1239_v32  ;;  %v6201_v39 = vld [vmem:[#allocation5 + $0x7a0] ss:$16 sps:$4 sm:$0xff]   ;;  %v6204_v49 = vld [vmem:[#allocation5 + $0x7a8] ss:$16 sps:$4 sm:$0xff]   ;;  %v6212_v28 = vld [vmem:[#allocation5 + $0x7cc] ss:$16 sps:$4 sm:$0xff]  }
 0x1e7   :  { %v6207_v3 = vld [vmem:[#allocation5 + $0x7c0] ss:$16 sps:$4 sm:$0xff]   ;;  %v6210_v29 = vld [vmem:[#allocation5 + $0x7c8] ss:$16 sps:$4 sm:$0xff]   ;;  %v6215_v47 = vld [vmem:[#allocation5 + $0x7e4] ss:$16 sps:$4 sm:$0xff]  }
 0x1e8   :  { %3159 = vmatmul.mubr.bf16.gmra.mrb[60].mxu0 %v6965_v10  ;;  %3611 = vmatmul.mubr.bf16.gmra.mrb[92].mxu1 %v6965_v10  ;;  %v6182_v10 = vld [vmem:[#allocation5 + $0x72c] ss:$16 sps:$4 sm:$0xff]   ;;  %v6213_v38 = vld [vmem:[#allocation5 + $0x7e0] ss:$16 sps:$4 sm:$0xff]   ;;  %v6216_v32 = vld [vmem:[#allocation5 + $0x7e8] ss:$16 sps:$4 sm:$0xff]  }
 0x1e9   :  { %3222 = vmatpush1.bf16.msra.mxu0 %v6159_v34  ;;  %3674 = vmatpush1.bf16.msra.mxu1 %v6162_v16  ;;  %v6219_v41 = vld [vmem:[#allocation7] ss:$8 sps:$4 sm:$0xff]   ;;  %v6224_v15 = vld [vmem:[#allocation7 + $0x14] ss:$8 sps:$4 sm:$0xff]   ;;  %v6227_v46 = vld [vmem:[#allocation7 + $0x24] ss:$8 sps:$4 sm:$0xff]  }
 0x1ea   :  { %3223 = vmatprep.subr.bf16.mxu0 %v6167_v44  ;;  %3168 = vmatprep.mubr.bf16.mxu0 %v6988_v7  ;;  %v6225_v34 = vld [vmem:[#allocation7 + $0x20] ss:$8 sps:$4 sm:$0xff]   ;;  %v6236_v44 = vld [vmem:[#allocation7 + $0x54] ss:$8 sps:$4 sm:$0xff]  }
 0x1eb   :  { %3620 = vmatprep.mubr.bf16.mxu1 %v6988_v7  ;;  %3675 = vmatprep.subr.bf16.mxu1 %v6170_v25  ;;  %v6185_v7 = vld [vmem:[#allocation5 + $0x744] ss:$16 sps:$4 sm:$0xff]   ;;  %v6231_v16 = vld [vmem:[#allocation7 + $0x40] ss:$8 sps:$4 sm:$0xff]  }
 0x1ec   :  { %v6237_v25 = vld [vmem:[#allocation7 + $0x60] ss:$8 sps:$4 sm:$0xff]  }
 0x1ed   :  { %3224 = vmatpush1.bf16.msra.mxu0 %v6165_v12  ;;  %3676 = vmatpush1.bf16.msra.mxu1 %v6168_v58  ;;  %v6242_v12 = vld [vmem:[#allocation7 + $0x74] ss:$8 sps:$4 sm:$0xff]   ;;  %v6243_v58 = vld [vmem:[#allocation7 + $0x80] ss:$8 sps:$4 sm:$0xff]  }
 0x1ee   :  { %3225 = vmatprep.subr.bf16.mxu0 %v6173_v2  ;;  %3677 = vmatprep.subr.bf16.mxu1 %v6176_v57  ;;  %v6248_v2 = vld [vmem:[#allocation7 + $0x94] ss:$8 sps:$4 sm:$0xff]   ;;  %v6249_v57 = vld [vmem:[#allocation7 + $0xa0] ss:$8 sps:$4 sm:$0xff]  }
 0x1f0   :  { %3169 = vmatmul.mubr.bf16.gmra.mrb[64].mxu0 %v6985_v48  ;;  %3621 = vmatmul.mubr.bf16.gmra.mrb[96].mxu1 %v6985_v48  ;;  %v6194_v48 = vld [vmem:[#allocation5 + $0x76c] ss:$16 sps:$4 sm:$0xff]  }
 0x1f1   :  { %3226 = vmatpush1.bf16.msra.mxu0 %v6171_v54  ;;  %3678 = vmatpush1.bf16.msra.mxu1 %v6174_v11  ;;  %v6254_v54 = vld [vmem:[#allocation7 + $0xb4] ss:$8 sps:$4 sm:$0xff]   ;;  %v6255_v11 = vld [vmem:[#allocation7 + $0xc0] ss:$8 sps:$4 sm:$0xff]  }
 0x1f2   :  { %3227 = vmatprep.subr.bf16.mxu0 %v6179_v33  ;;  %3178 = vmatprep.mubr.bf16.mxu0 %v7008_v60  ;;  %v6260_v33 = vld [vmem:[#allocation7 + $0xd4] ss:$8 sps:$4 sm:$0xff]  }
 0x1f3   :  { %3630 = vmatprep.mubr.bf16.mxu1 %v7008_v60  ;;  %3679 = vmatprep.subr.bf16.mxu1 %v6182_v10  ;;  %v6197_v60 = vld [vmem:[#allocation5 + $0x784] ss:$16 sps:$4 sm:$0xff]   ;;  %v6261_v10 = vld [vmem:[#allocation7 + $0xe0] ss:$8 sps:$4 sm:$0xff]  }
 0x1f5   :  { %3228 = vmatpush1.bf16.msra.mxu0 %v6177_v9  ;;  %3680 = vmatpush1.bf16.msra.mxu1 %v6180_v27  ;;  %v6266_v9 = vld [vmem:[#allocation7 + $0xf4] ss:$8 sps:$4 sm:$0xff]   ;;  %v6264_v27 = vld [vmem:[#allocation7 + $0xf0] ss:$8 sps:$4 sm:$0xff]  }
 0x1f6   :  { %3229 = vmatprep.subr.bf16.mxu0 %v6185_v7  ;;  %3681 = vmatprep.subr.bf16.mxu1 %v6188_v20 }
 0x1f8   :  { %3179 = vmatmul.mubr.bf16.gmra.mrb[68].mxu0 %v7005_v52  ;;  %3631 = vmatmul.mubr.bf16.gmra.mrb[100].mxu1 %v7005_v52  ;;  %v6206_v52 = vld [vmem:[#allocation5 + $0x7ac] ss:$16 sps:$4 sm:$0xff]  }
 0x1f9   :  { %3230 = vmatpush1.bf16.msra.mxu0 %v6183_v53  ;;  %3682 = vmatpush1.bf16.msra.mxu1 %v6186_v17 }
 0x1fa   :  { %3231 = vmatprep.subr.bf16.mxu0 %v6191_v42  ;;  %3188 = vmatprep.mubr.bf16.mxu0 %v7028_v35 }
 0x1fb   :  { %3640 = vmatprep.mubr.bf16.mxu1 %v7028_v35  ;;  %3683 = vmatprep.subr.bf16.mxu1 %v6194_v48  ;;  %v6209_v35 = vld [vmem:[#allocation5 + $0x7c4] ss:$16 sps:$4 sm:$0xff]  }
 0x1fd   :  { %3232 = vmatpush1.bf16.msra.mxu0 %v6189_v51  ;;  %3684 = vmatpush1.bf16.msra.mxu1 %v6192_v6 }
 0x1fe   :  { %3233 = vmatprep.subr.bf16.mxu0 %v6197_v60  ;;  %3685 = vmatprep.subr.bf16.mxu1 %v6200_v61 }
 0x200   :  { %3189 = vmatmul.mubr.bf16.gmra.mrb[72].mxu0 %v7025_v50  ;;  %3641 = vmatmul.mubr.bf16.gmra.mrb[104].mxu1 %v7025_v50  ;;  %v6218_v50 = vld [vmem:[#allocation5 + $0x7ec] ss:$16 sps:$4 sm:$0xff]  }
 0x201   :  { %3234 = vmatpush1.bf16.msra.mxu0 %v6195_v13  ;;  %3686 = vmatpush1.bf16.msra.mxu1 %v6198_v19 }
 0x202   :  { %3235 = vmatprep.subr.bf16.mxu0 %v6203_v22  ;;  %3198 = vmatprep.mubr.bf16.mxu0 %v7056_v4 }
 0x203   :  { %3650 = vmatprep.mubr.bf16.mxu1 %v7056_v4  ;;  %3687 = vmatprep.subr.bf16.mxu1 %v6206_v52  ;;  %v6221_v4 = vld [vmem:[#allocation7 + $0x4] ss:$8 sps:$4 sm:$0xff]  }
 0x205   :  { %3236 = vmatpush1.bf16.msra.mxu0 %v6201_v39  ;;  %3688 = vmatpush1.bf16.msra.mxu1 %v6204_v49  ;;  %v6315_v39 = vld [vmem:[#allocation8 + $0x40] sm:$0xff]  }
 0x206   :  { %3237 = vmatprep.subr.bf16.mxu0 %v6209_v35  ;;  %3689 = vmatprep.subr.bf16.mxu1 %v6212_v28  ;;  %v6316_v49 = vld [vmem:[#allocation8] sm:$0xff]  }
 0x208   :  { %3199 = vmatmul.mubr.bf16.gmra.mrb[76].mxu0 %v7054_v55  ;;  %3651 = vmatmul.mubr.bf16.gmra.mrb[108].mxu1 %v7054_v55  ;;  %v6222_v55 = vld [vmem:[#allocation7 + $0x10] ss:$8 sps:$4 sm:$0xff]  }
 0x209   :  { %3238 = vmatpush1.bf16.msra.mxu0 %v6207_v3  ;;  %3690 = vmatpush1.bf16.msra.mxu1 %v6210_v29  ;;  %v6317_v3 = vld [vmem:[#allocation8 + $0x48] sm:$0xff]  }
 0x20a   :  { %3239 = vmatprep.subr.bf16.mxu0 %v6215_v47  ;;  %3241 = vmatprep.mubr.bf16.mxu0 %v7068_v45 }
 0x20b   :  { %3691 = vmatprep.subr.bf16.mxu1 %v6218_v50  ;;  %3693 = vmatprep.mubr.bf16.mxu1 %v7068_v45  ;;  %v6230_v45 = vld [vmem:[#allocation7 + $0x34] ss:$8 sps:$4 sm:$0xff]  }
 0x20d   :  { %3240 = vmatpush1.bf16.msra.mxu0 %v6213_v38  ;;  %3692 = vmatpush1.bf16.msra.mxu1 %v6216_v32 }
 0x20e   :  { %4266 = vmatprep.subr.bf16.mxu0 %v6221_v4  ;;  %5422 = vmatprep.subr.bf16.mxu1 %v6315_v39 }
 0x210   :  { %3242 = vmatmul.mubr.bf16.vlgmr.msra.gmra.mrb[48].mxu0 %v7066_v43  ;;  %3694 = vmatmul.mubr.bf16.vlgmr.msra.gmra.mrb[80].mxu1 %v7066_v43  ;;  %v6228_v43 = vld [vmem:[#allocation7 + $0x30] ss:$8 sps:$4 sm:$0xff]  }
 0x211   :  { %3251 = vmatprep.mubr.bf16.mxu0 %v7080_v14  ;;  %3703 = vmatprep.mubr.bf16.mxu1 %v7080_v14  ;;  %v6233_v14 = vld [vmem:[#allocation7 + $0x44] ss:$8 sps:$4 sm:$0xff]  }
 0x212   :  { %4267 = vmatpush1.bf16.msra.mxu0 %v6219_v41  ;;  %5423 = vmatpush3.bf16.msra.mxu1 %v6316_v49 }
 0x213   :  { %4268 = vmatprep.subr.bf16.mxu0 %v6224_v15  ;;  %5424 = vmatprep.subr.bf16.mxu1 %v6317_v3  ;;  %v6278_v3 = vld [vmem:[#allocation7 + $0x134] ss:$8 sps:$4 sm:$0xff]  }
 0x216   :  { %4269 = vmatpush1.bf16.msra.mxu0 %v6222_v55  ;;  %v6318_v55 = vld [vmem:[#allocation8 + $0x8] sm:$0xff]  }
 0x217   :  { %4270 = vmatprep.subr.bf16.mxu0 %v6227_v46  ;;  %5425 = vmatpush3.bf16.msra.mxu1 %v6318_v55 }
 0x218   :  { %3252 = vmatmul.mubr.bf16.gmra.mrb[52].mxu0 %v7078_v62  ;;  %3704 = vmatmul.mubr.bf16.gmra.mrb[84].mxu1 %v7078_v62  ;;  %v6234_v62 = vld [vmem:[#allocation7 + $0x50] ss:$8 sps:$4 sm:$0xff]  }
 0x219   :  { %3261 = vmatprep.mubr.bf16.mxu0 %v7092_v59  ;;  %3713 = vmatprep.mubr.bf16.mxu1 %v7092_v59  ;;  %v6239_v59 = vld [vmem:[#allocation7 + $0x64] ss:$8 sps:$4 sm:$0xff]  }
 0x21a   :  { %4271 = vmatpush1.bf16.msra.mxu0 %v6225_v34 }
 0x21b   :  { %4272 = vmatprep.subr.bf16.mxu0 %v6230_v45  ;;  %v6319_v45 = vld [vmem:[#allocation8 + $0x50] sm:$0xff]  }
 0x21c   :  { %5426 = vmatprep.subr.bf16.mxu1 %v6319_v45 }
 0x21e   :  { %4273 = vmatpush1.bf16.msra.mxu0 %v6228_v43 }
 0x21f   :  { %4274 = vmatprep.subr.bf16.mxu0 %v6233_v14 }
 0x220   :  { %3262 = vmatmul.mubr.bf16.gmra.mrb[56].mxu0 %v7090_v40  ;;  %3714 = vmatmul.mubr.bf16.gmra.mrb[88].mxu1 %v7090_v40  ;;  %v6240_v40 = vld [vmem:[#allocation7 + $0x70] ss:$8 sps:$4 sm:$0xff]  }
 0x221   :  { %3271 = vmatprep.mubr.bf16.mxu0 %v7104_v21  ;;  %3723 = vmatprep.mubr.bf16.mxu1 %v7104_v21  ;;  %v6245_v21 = vld [vmem:[#allocation7 + $0x84] ss:$8 sps:$4 sm:$0xff]  }
 0x222   :  { %4275 = vmatpush1.bf16.msra.mxu0 %v6231_v16 }
 0x223   :  { %4276 = vmatprep.subr.bf16.mxu0 %v6236_v44 }
 0x226   :  { %4277 = vmatpush1.bf16.msra.mxu0 %v6234_v62  ;;  %v6267_v62 = vld [vmem:[#allocation7 + $0x100] ss:$8 sps:$4 sm:$0xff]  }
 0x227   :  { %4278 = vmatprep.subr.bf16.mxu0 %v6239_v59 }
 0x228   :  { %3272 = vmatmul.mubr.bf16.gmra.mrb[60].mxu0 %v7102_v36  ;;  %3724 = vmatmul.mubr.bf16.gmra.mrb[92].mxu1 %v7102_v36  ;;  %v6246_v36 = vld [vmem:[#allocation7 + $0x90] ss:$8 sps:$4 sm:$0xff]  }
 0x229   :  { %3281 = vmatprep.mubr.bf16.mxu0 %v7116_v23  ;;  %3733 = vmatprep.mubr.bf16.mxu1 %v7116_v23  ;;  %v6251_v23 = vld [vmem:[#allocation7 + $0xa4] ss:$8 sps:$4 sm:$0xff]  }
 0x22a   :  { %4279 = vmatpush1.bf16.msra.mxu0 %v6237_v25 }
 0x22b   :  { %4280 = vmatprep.subr.bf16.mxu0 %v6242_v12 }
 0x22e   :  { %4281 = vmatpush1.bf16.msra.mxu0 %v6240_v40 }
 0x22f   :  { %4282 = vmatprep.subr.bf16.mxu0 %v6245_v21  ;;  %v6272_v21 = vld [vmem:[#allocation7 + $0x114] ss:$8 sps:$4 sm:$0xff]  }
 0x230   :  { %3282 = vmatmul.mubr.bf16.gmra.mrb[64].mxu0 %v7114_v5  ;;  %3734 = vmatmul.mubr.bf16.gmra.mrb[96].mxu1 %v7114_v5  ;;  %v6252_v5 = vld [vmem:[#allocation7 + $0xb0] ss:$8 sps:$4 sm:$0xff]  }
 0x231   :  { %3291 = vmatprep.mubr.bf16.mxu0 %v7128_v63  ;;  %3743 = vmatprep.mubr.bf16.mxu1 %v7128_v63  ;;  %v6257_v63 = vld [vmem:[#allocation7 + $0xc4] ss:$8 sps:$4 sm:$0xff]  }
 0x232   :  { %4283 = vmatpush1.bf16.msra.mxu0 %v6243_v58 }
 0x233   :  { %4284 = vmatprep.subr.bf16.mxu0 %v6248_v2 }
 0x236   :  { %4285 = vmatpush1.bf16.msra.mxu0 %v6246_v36 }
 0x237   :  { %4286 = vmatprep.subr.bf16.mxu0 %v6251_v23 }
 0x238   :  { %3292 = vmatmul.mubr.bf16.gmra.mrb[68].mxu0 %v7126_v56  ;;  %3744 = vmatmul.mubr.bf16.gmra.mrb[100].mxu1 %v7126_v56  ;;  %v6258_v56 = vld [vmem:[#allocation7 + $0xd0] ss:$8 sps:$4 sm:$0xff]  }
 0x239   :  { %3301 = vmatprep.mubr.bf16.mxu0 %v7140_v18  ;;  %3753 = vmatprep.mubr.bf16.mxu1 %v7140_v18  ;;  %v6263_v18 = vld [vmem:[#allocation7 + $0xe4] ss:$8 sps:$4 sm:$0xff]  }
 0x23a   :  { %4287 = vmatpush1.bf16.msra.mxu0 %v6249_v57  ;;  %v6320_v57 = vld [vmem:[#allocation8 + $0x10] sm:$0xff]  }
 0x23b   :  { %4288 = vmatprep.subr.bf16.mxu0 %v6254_v54  ;;  %5427 = vmatpush3.bf16.msra.mxu1 %v6320_v57 }
 0x23e   :  { %4289 = vmatpush1.bf16.msra.mxu0 %v6252_v5 }
 0x23f   :  { %4290 = vmatprep.subr.bf16.mxu0 %v6257_v63 }
 0x240   :  { %3302 = vmatmul.mubr.bf16.gmra.mrb[72].mxu0 %v7138_v30  ;;  %3754 = vmatmul.mubr.bf16.gmra.mrb[104].mxu1 %v7138_v30  ;;  %v6269_v30 = vld [vmem:[#allocation7 + $0x104] ss:$8 sps:$4 sm:$0xff]  }
 0x241   :  { %3311 = vmatprep.mubr.bf16.mxu0 %v7152_v8  ;;  %3763 = vmatprep.mubr.bf16.mxu1 %v7152_v8  ;;  %v1568_v8 = vld [vmem:[%s7578_s7] sm:$0xf] }
 0x242   :  { %4291 = vmatpush1.bf16.msra.mxu0 %v6255_v11  ;;  %v7208_v7 = vrot.slane %v1568_v8, %v6639_v31  ;;  %v7215_v20 = vrot.slane %v1568_v8, %v6813_v1  ;;  %v7219_v53 = vrot.slane %v1568_v8, %v322_v37 }
 0x243   :  { %4292 = vmatprep.subr.bf16.mxu0 %v6260_v33  ;;  %v6321_v33 = vld [vmem:[#allocation8 + $0x58] sm:$0xff]  }
 0x244   :  { %5428 = vmatprep.subr.bf16.mxu1 %v6321_v33 }
 0x246   :  { %4293 = vmatpush1.bf16.msra.mxu0 %v6258_v56 }
 0x247   :  { %4294 = vmatprep.subr.bf16.mxu0 %v6263_v18 }
 0x248   :  { %3312 = vmatmul.mubr.bf16.gmra.mrb[76].mxu0 %v7150_v0  ;;  %3764 = vmatmul.mubr.bf16.gmra.mrb[108].mxu1 %v7150_v0  ;;  %v7212_v0 = vrot.slane %v1568_v8, %v318_v24 }
 0x24a   :  { %4295 = vmatpush1.bf16.msra.mxu0 %v6261_v10  ;;  %v6270_v10 = vld [vmem:[#allocation7 + $0x110] ss:$8 sps:$4 sm:$0xff]  }
 0x24b   :  { %4296 = vmatprep.subr.bf16.mxu0 %v6266_v9 }
 0x24e   :  { %4297 = vmatpush1.bf16.msra.mxu0 %v6264_v27 }
 0x24f   :  { %4379 = vmatprep.subr.bf16.mxu0 %v6269_v30 }
 0x2e3   :  { %v3243_v17 = vpop.f32.mrb[48].mxu0  ;;  %v3695_v42 = vpop.f32.mrb[80].mxu1 }
 0x2e4   :  { %v5502_v48 = vadd.f32 %v3243_v17, %v7208_v7  ;;  %v5534_v51 = vadd.f32 %v3695_v42, %v7212_v0  ;;  %v3245_v6 = vpop.f32.mrb[49].mxu0  ;;  %v3697_v60 = vpop.f32.mrb[81].mxu1  ;;  %v6275_v17 = vld [vmem:[#allocation7 + $0x124] ss:$8 sps:$4 sm:$0xff]  }
 0x2e5   :  { %v5503_v61 = vadd.f32 %v3245_v6, %v7215_v20  ;;  %v5535_v24 = vadd.f32 %v3697_v60, %v7219_v53  ;;  %v3247_v13 = vpop.f32.mrb[50].mxu0  ;;  %v3699_v19 = vpop.f32.mrb[82].mxu1  ;;  %v6322_v60 = vld [vmem:[#allocation8 + $0x18] sm:$0xff]  }
 0x2e6   :  { %v5504_v22 = vadd.f32 %v3247_v13, %v7208_v7  ;;  %v5536_v26 = vadd.f32 %v3699_v19, %v7212_v0  ;;  %v3249_v37 = vpop.f32.mrb[51].mxu0  ;;  %v3701_v52 = vpop.f32.mrb[83].mxu1  ;;  %v3774_v29 = vmax.f32 %v5502_v48, 0.0  ;;  %v3776_v47 = vmax.f32 %v5534_v51, 0.0  ;;  %v6323_v13 = vld [vmem:[#allocation8 + $0x60] sm:$0xff]   ;;  %5429 = vmatpush3.bf16.msra.mxu1 %v6322_v60 }
 0x2e7   :  { %v5505_v35 = vadd.f32 %v3249_v37, %v7215_v20  ;;  %v5537_v28 = vadd.f32 %v3701_v52, %v7219_v53  ;;  %v3775_v32 = vmax.f32 %v5503_v61, 0.0  ;;  %v3777_v4 = vmax.f32 %v5535_v24, 0.0  ;;  %v6273_v52 = vld [vmem:[#allocation7 + $0x120] ss:$8 sps:$4 sm:$0xff]   ;;  %5430 = vmatprep.subr.bf16.mxu1 %v6323_v13 }
 0x2e8   :  { %v3778_v50 = vmax.f32 %v5504_v22, 0.0  ;;  %v3780_v38 = vmax.f32 %v5536_v26, 0.0 }
 0x2e9   :  { %v3779_v41 = vmax.f32 %v5505_v35, 0.0  ;;  %v3781_v15 = vmax.f32 %v5537_v28, 0.0 }
 0x2ea   :  { %v3838_v46 = vpack.c.bf16 %v3778_v50, %v3774_v29  ;;  %v7229_v34 = vpack.c.bf16 %v3780_v38, %v3776_v47 }
 0x2eb   :  { %v3839_v43 = vpack.c.bf16 %v3779_v41, %v3775_v32  ;;  %v7231_v14 = vpack.c.bf16 %v3781_v15, %v3777_v4  ;;  %v3253_v16 = vpop.f32.mrb[52].mxu0  ;;  %v3705_v44 = vpop.f32.mrb[84].mxu1  ;;  %v6324_v32 = vld [vmem:[#allocation8 + $0x20] sm:$0xff]  }
 0x2ec   :  { %v5506_v59 = vadd.f32 %v3253_v16, %v7208_v7  ;;  %v5538_v25 = vadd.f32 %v3705_v44, %v7212_v0  ;;  %v3255_v12 = vpop.f32.mrb[53].mxu0  ;;  %v3707_v40 = vpop.f32.mrb[85].mxu1  ;;  %v6276_v16 = vld [vmem:[#allocation7 + $0x130] ss:$8 sps:$4 sm:$0xff]   ;;  %5431 = vmatpush3.bf16.msra.mxu1 %v6324_v32 }
 0x2ed   :  { %v5507_v58 = vadd.f32 %v3255_v12, %v7215_v20  ;;  %v5539_v2 = vadd.f32 %v3707_v40, %v7219_v53  ;;  %v3257_v36 = vpop.f32.mrb[54].mxu0  ;;  %v3709_v23 = vpop.f32.mrb[86].mxu1  ;;  %4298 = vmatprep.mubr.bf16.mxu0 %v3839_v43  ;;  %v6281_v12 = vld [vmem:[#allocation7 + $0x144] ss:$8 sps:$4 sm:$0xff]  }
 0x2ee   :  { %v5508_v54 = vadd.f32 %v3257_v36, %v7208_v7  ;;  %v5540_v5 = vadd.f32 %v3709_v23, %v7212_v0  ;;  %v3259_v63 = vpop.f32.mrb[55].mxu0  ;;  %v3711_v11 = vpop.f32.mrb[87].mxu1  ;;  %4299 = vmatmul.mubr.bf16.vlgmr.msra.gmra.mrb[80].mxu0 %v3838_v46  ;;  %v3782_v9 = vmax.f32 %v5506_v59, 0.0  ;;  %v3784_v27 = vmax.f32 %v5538_v25, 0.0  ;;  %v6325_v46 = vld [vmem:[#allocation8 + $0x68] sm:$0xff]  }
 0x2ef   :  { %v5509_v56 = vadd.f32 %v3259_v63, %v7215_v20  ;;  %v5541_v18 = vadd.f32 %v3711_v11, %v7219_v53  ;;  %4380 = vmatpush1.bf16.msra.mxu0 %v6267_v62  ;;  %v3783_v42 = vmax.f32 %v5507_v58, 0.0  ;;  %v3785_v48 = vmax.f32 %v5539_v2, 0.0  ;;  %v6326_v36 = vld [vmem:[#allocation8 + $0x28] sm:$0xff]   ;;  %5432 = vmatprep.subr.bf16.mxu1 %v6325_v46 }
 0x2f0   :  { %v3786_v30 = vmax.f32 %v5508_v54, 0.0  ;;  %v3788_v8 = vmax.f32 %v5540_v5, 0.0  ;;  %4381 = vmatprep.subr.bf16.mxu0 %v6272_v21  ;;  %v6327_v54 = vld [vmem:[#allocation8 + $0x70] sm:$0xff]   ;;  %5433 = vmatpush3.bf16.msra.mxu1 %v6326_v36  ;;  %v6285_v46 = vld [vmem:[#allocation7 + $0x160] ss:$8 sps:$4 sm:$0xff]  }
 0x2f1   :  { %v3787_v51 = vmax.f32 %v5509_v56, 0.0  ;;  %v3789_v6 = vmax.f32 %v5541_v18, 0.0  ;;  %v6279_v56 = vld [vmem:[#allocation7 + $0x140] ss:$8 sps:$4 sm:$0xff]   ;;  %5434 = vmatprep.subr.bf16.mxu1 %v6327_v54 }
 0x2f2   :  { %v3842_v61 = vpack.c.bf16 %v3786_v30, %v3782_v9  ;;  %v7241_v24 = vpack.c.bf16 %v3788_v8, %v3784_v27  ;;  %v6284_v30 = vld [vmem:[#allocation7 + $0x154] ss:$8 sps:$4 sm:$0xff]  }
 0x2f3   :  { %v3843_v19 = vpack.c.bf16 %v3787_v51, %v3783_v42  ;;  %v7243_v22 = vpack.c.bf16 %v3789_v6, %v3785_v48  ;;  %4382 = vmatpush1.bf16.msra.mxu0 %v6270_v10  ;;  %v3263_v26 = vpop.f32.mrb[56].mxu0  ;;  %v3715_v37 = vpop.f32.mrb[88].mxu1  ;;  %v6328_v51 = vld [vmem:[#allocation8 + $0x30] sm:$0xff]  }
 0x2f4   :  { %v5510_v39 = vadd.f32 %v3263_v26, %v7208_v7  ;;  %v5542_v49 = vadd.f32 %v3715_v37, %v7212_v0  ;;  %v3265_v35 = vpop.f32.mrb[57].mxu0  ;;  %v3717_v28 = vpop.f32.mrb[89].mxu1  ;;  %4383 = vmatprep.subr.bf16.mxu0 %v6275_v17  ;;  %v6282_v37 = vld [vmem:[#allocation7 + $0x150] ss:$8 sps:$4 sm:$0xff]   ;;  %5435 = vmatpush3.bf16.msra.mxu1 %v6328_v51 }
 0x2f5   :  { %v5511_v29 = vadd.f32 %v3265_v35, %v7215_v20  ;;  %v5543_v47 = vadd.f32 %v3717_v28, %v7219_v53  ;;  %v3267_v50 = vpop.f32.mrb[58].mxu0  ;;  %v3719_v38 = vpop.f32.mrb[90].mxu1  ;;  %4308 = vmatprep.mubr.bf16.mxu0 %v3843_v19  ;;  %v6287_v28 = vld [vmem:[#allocation7 + $0x164] ss:$8 sps:$4 sm:$0xff]  }
 0x2f6   :  { %v5512_v4 = vadd.f32 %v3267_v50, %v7208_v7  ;;  %v5544_v41 = vadd.f32 %v3719_v38, %v7212_v0  ;;  %v3269_v15 = vpop.f32.mrb[59].mxu0  ;;  %v3721_v55 = vpop.f32.mrb[91].mxu1  ;;  %4309 = vmatmul.mubr.bf16.gmra.mrb[84].mxu0 %v3842_v61  ;;  %v3790_v44 = vmax.f32 %v5510_v39, 0.0  ;;  %v3792_v62 = vmax.f32 %v5542_v49, 0.0 }
 0x2f7   :  { %v5513_v45 = vadd.f32 %v3269_v15, %v7215_v20  ;;  %v5545_v43 = vadd.f32 %v3721_v55, %v7219_v53  ;;  %4384 = vmatpush1.bf16.msra.mxu0 %v6273_v52  ;;  %v3791_v40 = vmax.f32 %v5511_v29, 0.0  ;;  %v3793_v21 = vmax.f32 %v5543_v47, 0.0 }
 0x2f8   :  { %v3794_v59 = vmax.f32 %v5512_v4, 0.0  ;;  %v3796_v25 = vmax.f32 %v5544_v41, 0.0  ;;  %4385 = vmatprep.subr.bf16.mxu0 %v6278_v3 }
 0x2f9   :  { %v3795_v58 = vmax.f32 %v5513_v45, 0.0  ;;  %v3797_v2 = vmax.f32 %v5545_v43, 0.0 }
 0x2fa   :  { %v3846_v23 = vpack.c.bf16 %v3794_v59, %v3790_v44  ;;  %v7253_v57 = vpack.c.bf16 %v3796_v25, %v3792_v62  ;;  %v6290_v62 = vld [vmem:[#allocation7 + $0x174] ss:$8 sps:$4 sm:$0xff]  }
 0x2fb   :  { %v3847_v5 = vpack.c.bf16 %v3795_v58, %v3791_v40  ;;  %v7255_v63 = vpack.c.bf16 %v3797_v2, %v3793_v21  ;;  %4386 = vmatpush1.bf16.msra.mxu0 %v6276_v16  ;;  %v3273_v11 = vpop.f32.mrb[60].mxu0  ;;  %v3725_v33 = vpop.f32.mrb[92].mxu1 }
 0x2fc   :  { %v5514_v18 = vadd.f32 %v3273_v11, %v7208_v7  ;;  %v5546_v10 = vadd.f32 %v3725_v33, %v7212_v0  ;;  %v3275_v9 = vpop.f32.mrb[61].mxu0  ;;  %v3727_v27 = vpop.f32.mrb[93].mxu1  ;;  %4387 = vmatprep.subr.bf16.mxu0 %v6281_v12 }
 0x2fd   :  { %v5515_v8 = vadd.f32 %v3275_v9, %v7215_v20  ;;  %v5547_v17 = vadd.f32 %v3727_v27, %v7219_v53  ;;  %v3277_v42 = vpop.f32.mrb[62].mxu0  ;;  %v3729_v48 = vpop.f32.mrb[94].mxu1  ;;  %4318 = vmatprep.mubr.bf16.mxu0 %v3847_v5  ;;  %v6288_v5 = vld [vmem:[#allocation7 + $0x170] ss:$8 sps:$4 sm:$0xff]  }
 0x2fe   :  { %v5516_v6 = vadd.f32 %v3277_v42, %v7208_v7  ;;  %v5548_v60 = vadd.f32 %v3729_v48, %v7212_v0  ;;  %v3279_v61 = vpop.f32.mrb[63].mxu0  ;;  %v3731_v13 = vpop.f32.mrb[95].mxu1  ;;  %4319 = vmatmul.mubr.bf16.gmra.mrb[88].mxu0 %v3846_v23  ;;  %v3798_v52 = vmax.f32 %v5514_v18, 0.0  ;;  %v3800_v39 = vmax.f32 %v5546_v10, 0.0  ;;  %v6293_v10 = vld [vmem:[#allocation7 + $0x184] ss:$8 sps:$4 sm:$0xff]  }
 0x2ff   :  { %v5517_v19 = vadd.f32 %v3279_v61, %v7215_v20  ;;  %v5549_v26 = vadd.f32 %v3731_v13, %v7219_v53  ;;  %4388 = vmatpush1.bf16.msra.mxu0 %v6279_v56  ;;  %v3799_v3 = vmax.f32 %v5515_v8, 0.0  ;;  %v3801_v29 = vmax.f32 %v5547_v17, 0.0  ;;  %v6291_v61 = vld [vmem:[#allocation7 + $0x180] ss:$8 sps:$4 sm:$0xff]  }
 0x300   :  { %v3802_v49 = vmax.f32 %v5516_v6, 0.0  ;;  %v3804_v35 = vmax.f32 %v5548_v60, 0.0  ;;  %4389 = vmatprep.subr.bf16.mxu0 %v6284_v30 }
 0x301   :  { %v3803_v47 = vmax.f32 %v5517_v19, 0.0  ;;  %v3805_v50 = vmax.f32 %v5549_v26, 0.0 }
 0x302   :  { %v3850_v38 = vpack.c.bf16 %v3802_v49, %v3798_v52  ;;  %v7265_v32 = vpack.c.bf16 %v3804_v35, %v3800_v39  ;;  %v6296_v52 = vld [vmem:[#allocation7 + $0x194] ss:$8 sps:$4 sm:$0xff]  }
 0x303   :  { %v3851_v4 = vpack.c.bf16 %v3803_v47, %v3799_v3  ;;  %v7267_v41 = vpack.c.bf16 %v3805_v50, %v3801_v29  ;;  %4390 = vmatpush1.bf16.msra.mxu0 %v6282_v37  ;;  %v3283_v15 = vpop.f32.mrb[64].mxu0  ;;  %v3735_v55 = vpop.f32.mrb[96].mxu1 }
 0x304   :  { %v5518_v45 = vadd.f32 %v3283_v15, %v7208_v7  ;;  %v5550_v43 = vadd.f32 %v3735_v55, %v7212_v0  ;;  %v3285_v16 = vpop.f32.mrb[65].mxu0  ;;  %v3737_v44 = vpop.f32.mrb[97].mxu1  ;;  %4391 = vmatprep.subr.bf16.mxu0 %v6287_v28  ;;  %v6294_v15 = vld [vmem:[#allocation7 + $0x190] ss:$8 sps:$4 sm:$0xff]  }
 0x305   :  { %v5519_v59 = vadd.f32 %v3285_v16, %v7215_v20  ;;  %v5551_v25 = vadd.f32 %v3737_v44, %v7219_v53  ;;  %v3287_v12 = vpop.f32.mrb[66].mxu0  ;;  %v3739_v40 = vpop.f32.mrb[98].mxu1  ;;  %4328 = vmatprep.mubr.bf16.mxu0 %v3851_v4  ;;  %v6299_v16 = vld [vmem:[#allocation7 + $0x1a4] ss:$8 sps:$4 sm:$0xff]  }
 0x306   :  { %v5520_v21 = vadd.f32 %v3287_v12, %v7208_v7  ;;  %v5552_v58 = vadd.f32 %v3739_v40, %v7212_v0  ;;  %v3289_v2 = vpop.f32.mrb[67].mxu0  ;;  %v3741_v36 = vpop.f32.mrb[99].mxu1  ;;  %4329 = vmatmul.mubr.bf16.gmra.mrb[92].mxu0 %v3850_v38  ;;  %v3806_v11 = vmax.f32 %v5518_v45, 0.0  ;;  %v3808_v33 = vmax.f32 %v5550_v43, 0.0 }
 0x307   :  { %v5521_v23 = vadd.f32 %v3289_v2, %v7215_v20  ;;  %v5553_v54 = vadd.f32 %v3741_v36, %v7219_v53  ;;  %4392 = vmatpush1.bf16.msra.mxu0 %v6285_v46  ;;  %v3807_v9 = vmax.f32 %v5519_v59, 0.0  ;;  %v3809_v27 = vmax.f32 %v5551_v25, 0.0 }
 0x308   :  { %v3810_v56 = vmax.f32 %v5520_v21, 0.0  ;;  %v3812_v18 = vmax.f32 %v5552_v58, 0.0  ;;  %4393 = vmatprep.subr.bf16.mxu0 %v6290_v62 }
 0x309   :  { %v3811_v30 = vmax.f32 %v5521_v23, 0.0  ;;  %v3813_v8 = vmax.f32 %v5553_v54, 0.0  ;;  %v6297_v23 = vld [vmem:[#allocation7 + $0x1a0] ss:$8 sps:$4 sm:$0xff]  }
 0x30a   :  { %v3854_v17 = vpack.c.bf16 %v3810_v56, %v3806_v11  ;;  %v7277_v42 = vpack.c.bf16 %v3812_v18, %v3808_v33  ;;  %v6302_v56 = vld [vmem:[#allocation7 + $0x1b4] ss:$8 sps:$4 sm:$0xff]  }
 0x30b   :  { %v3855_v48 = vpack.c.bf16 %v3811_v30, %v3807_v9  ;;  %v7279_v51 = vpack.c.bf16 %v3813_v8, %v3809_v27  ;;  %4394 = vmatpush1.bf16.msra.mxu0 %v6288_v5  ;;  %v3293_v6 = vpop.f32.mrb[68].mxu0  ;;  %v3745_v60 = vpop.f32.mrb[100].mxu1 }
 0x30c   :  { %v5522_v13 = vadd.f32 %v3293_v6, %v7208_v7  ;;  %v5554_v19 = vadd.f32 %v3745_v60, %v7212_v0  ;;  %v3295_v26 = vpop.f32.mrb[69].mxu0  ;;  %v3747_v37 = vpop.f32.mrb[101].mxu1  ;;  %4395 = vmatprep.subr.bf16.mxu0 %v6293_v10 }
 0x30d   :  { %v5523_v39 = vadd.f32 %v3295_v26, %v7215_v20  ;;  %v5555_v49 = vadd.f32 %v3747_v37, %v7219_v53  ;;  %v3297_v35 = vpop.f32.mrb[70].mxu0  ;;  %v3749_v28 = vpop.f32.mrb[102].mxu1  ;;  %4338 = vmatprep.mubr.bf16.mxu0 %v3855_v48 }
 0x30e   :  { %v5524_v3 = vadd.f32 %v3297_v35, %v7208_v7  ;;  %v5556_v29 = vadd.f32 %v3749_v28, %v7212_v0  ;;  %v3299_v47 = vpop.f32.mrb[71].mxu0  ;;  %v3751_v50 = vpop.f32.mrb[103].mxu1  ;;  %4339 = vmatmul.mubr.bf16.gmra.mrb[96].mxu0 %v3854_v17  ;;  %v3814_v55 = vmax.f32 %v5522_v13, 0.0  ;;  %v3816_v46 = vmax.f32 %v5554_v19, 0.0 }
 0x30f   :  { %v5525_v38 = vadd.f32 %v3299_v47, %v7215_v20  ;;  %v5557_v4 = vadd.f32 %v3751_v50, %v7219_v53  ;;  %4396 = vmatpush1.bf16.msra.mxu0 %v6291_v61  ;;  %v3815_v44 = vmax.f32 %v5523_v39, 0.0  ;;  %v3817_v62 = vmax.f32 %v5555_v49, 0.0  ;;  %v6300_v61 = vld [vmem:[#allocation7 + $0x1b0] ss:$8 sps:$4 sm:$0xff]  }
 0x310   :  { %v3818_v45 = vmax.f32 %v5524_v3, 0.0  ;;  %v3820_v43 = vmax.f32 %v5556_v29, 0.0  ;;  %4397 = vmatprep.subr.bf16.mxu0 %v6296_v52  ;;  %v6305_v52 = vld [vmem:[#allocation7 + $0x1c4] ss:$8 sps:$4 sm:$0xff]  }
 0x311   :  { %v3819_v59 = vmax.f32 %v5525_v38, 0.0  ;;  %v3821_v25 = vmax.f32 %v5557_v4, 0.0 }
 0x312   :  { %v3858_v12 = vpack.c.bf16 %v3818_v45, %v3814_v55  ;;  %v7289_v40 = vpack.c.bf16 %v3820_v43, %v3816_v46 }
 0x313   :  { %v3859_v21 = vpack.c.bf16 %v3819_v59, %v3815_v44  ;;  %v7291_v58 = vpack.c.bf16 %v3821_v25, %v3817_v62  ;;  %4398 = vmatpush1.bf16.msra.mxu0 %v6294_v15  ;;  %v3303_v2 = vpop.f32.mrb[72].mxu0  ;;  %v3755_v36 = vpop.f32.mrb[104].mxu1  ;;  %v6303_v15 = vld [vmem:[#allocation7 + $0x1c0] ss:$8 sps:$4 sm:$0xff]  }
 0x314   :  { %v5526_v54 = vadd.f32 %v3303_v2, %v7208_v7  ;;  %v5558_v5 = vadd.f32 %v3755_v36, %v7212_v0  ;;  %v3305_v11 = vpop.f32.mrb[73].mxu0  ;;  %v3757_v33 = vpop.f32.mrb[105].mxu1  ;;  %4399 = vmatprep.subr.bf16.mxu0 %v6299_v16  ;;  %v6308_v16 = vld [vmem:[#allocation7 + $0x1d4] ss:$8 sps:$4 sm:$0xff]  }
 0x315   :  { %v5527_v18 = vadd.f32 %v3305_v11, %v7215_v20  ;;  %v5559_v10 = vadd.f32 %v3757_v33, %v7219_v53  ;;  %v3307_v9 = vpop.f32.mrb[74].mxu0  ;;  %v3759_v27 = vpop.f32.mrb[106].mxu1  ;;  %4348 = vmatprep.mubr.bf16.mxu0 %v3859_v21 }
 0x316   :  { %v5528_v30 = vadd.f32 %v3307_v9, %v7208_v7  ;;  %v5560_v8 = vadd.f32 %v3759_v27, %v7212_v0  ;;  %v3309_v17 = vpop.f32.mrb[75].mxu0  ;;  %v3761_v48 = vpop.f32.mrb[107].mxu1  ;;  %4349 = vmatmul.mubr.bf16.gmra.mrb[100].mxu0 %v3858_v12  ;;  %v3822_v13 = vmax.f32 %v5526_v54, 0.0  ;;  %v3824_v19 = vmax.f32 %v5558_v5, 0.0  ;;  %v6306_v5 = vld [vmem:[#allocation7 + $0x1d0] ss:$8 sps:$4 sm:$0xff]  }
 0x317   :  { %v5529_v6 = vadd.f32 %v3309_v17, %v7215_v20  ;;  %v5561_v60 = vadd.f32 %v3761_v48, %v7219_v53  ;;  %4400 = vmatpush1.bf16.msra.mxu0 %v6297_v23  ;;  %v3823_v39 = vmax.f32 %v5527_v18, 0.0  ;;  %v3825_v49 = vmax.f32 %v5559_v10, 0.0  ;;  %v6311_v10 = vld [vmem:[#allocation7 + $0x1e4] ss:$8 sps:$4 sm:$0xff]  }
 0x318   :  { %v3826_v26 = vmax.f32 %v5528_v30, 0.0  ;;  %v3828_v37 = vmax.f32 %v5560_v8, 0.0  ;;  %4401 = vmatprep.subr.bf16.mxu0 %v6302_v56 }
 0x319   :  { %v3827_v35 = vmax.f32 %v5529_v6, 0.0  ;;  %v3829_v28 = vmax.f32 %v5561_v60, 0.0  ;;  %v6312_v6 = vld [vmem:[#allocation7 + $0x1f0] ss:$8 sps:$4 sm:$0xff]  }
 0x31a   :  { %v3862_v3 = vpack.c.bf16 %v3826_v26, %v3822_v13  ;;  %v7301_v29 = vpack.c.bf16 %v3828_v37, %v3824_v19  ;;  %v111_v13 = vld [vmem:[%s7571_s0 + $0x30] sm:$0xff]  ;;  %v113_v26 = vld [vmem:[%s7571_s0 + $0x40] sm:$0xff] }
 0x31b   :  { %v3863_v47 = vpack.c.bf16 %v3827_v35, %v3823_v39  ;;  %v3865_v50 = vpack.c.bf16 %v3829_v28, %v3825_v49  ;;  %4402 = vmatpush1.bf16.msra.mxu0 %v6300_v61  ;;  %v3313_v38 = vpop.f32.mrb[76].mxu0  ;;  %v3765_v4 = vpop.f32.mrb[108].mxu1  ;;  %v140_v19 = vsel %vm121_vm0, %v111_v13, 0.0  ;;  %v146_v37 = vsel %vm121_vm0, %v113_v26, 0.0 }
 0x31c   :  { %v5530_v55 = vadd.f32 %v3313_v38, %v7208_v7  ;;  %v5562_v46 = vadd.f32 %v3765_v4, %v7212_v0  ;;  %v3315_v45 = vpop.f32.mrb[77].mxu0  ;;  %v3767_v43 = vpop.f32.mrb[109].mxu1  ;;  %4403 = vmatprep.subr.bf16.mxu0 %v6305_v52  ;;  %v3934_v52 = vld [vmem:[%s7580_s9] sm:$0x3] }
 0x31d   :  { %v5531_v44 = vadd.f32 %v3315_v45, %v7215_v20  ;;  %v5563_v62 = vadd.f32 %v3767_v43, %v7219_v53  ;;  %v3317_v59 = vpop.f32.mrb[78].mxu0  ;;  %v3769_v25 = vpop.f32.mrb[110].mxu1  ;;  %4358 = vmatprep.mubr.bf16.mxu0 %v3863_v47  ;;  %v7360_v39 = vrot.slane %v3934_v52, %v6639_v31  ;;  %v7363_v49 = vrot.slane %v3934_v52, %v6813_v1 }
 0x31e   :  { %v5532_v12 = vadd.f32 %v3317_v59, %v7208_v7  ;;  %v5564_v21 = vadd.f32 %v3769_v25, %v7212_v0  ;;  %v3319_v2 = vpop.f32.mrb[79].mxu0  ;;  %v3771_v36 = vpop.f32.mrb[111].mxu1  ;;  %4359 = vmatmul.mubr.bf16.gmra.mrb[104].mxu0 %v3862_v3  ;;  %v3830_v11 = vmax.f32 %v5530_v55, 0.0  ;;  %v3832_v33 = vmax.f32 %v5562_v46, 0.0 }
 0x31f   :  { %v5533_v23 = vadd.f32 %v3319_v2, %v7215_v20  ;;  %v5565_v54 = vadd.f32 %v3771_v36, %v7219_v53  ;;  %4404 = vmatpush1.bf16.msra.mxu0 %v6303_v15  ;;  %v3831_v9 = vmax.f32 %v5531_v44, 0.0  ;;  %v3833_v27 = vmax.f32 %v5563_v62, 0.0  ;;  %v6309_v20 = vld [vmem:[#allocation7 + $0x1e0] ss:$8 sps:$4 sm:$0xff]   ;;  %v6314_v53 = vld [vmem:[#allocation7 + $0x1f4] ss:$8 sps:$4 sm:$0xff]  }
 0x320   :  { %v3834_v56 = vmax.f32 %v5532_v12, 0.0  ;;  %v3836_v18 = vmax.f32 %v5564_v21, 0.0  ;;  %4405 = vmatprep.subr.bf16.mxu0 %v6308_v16 }
 0x321   :  { %v3835_v7 = vmax.f32 %v5533_v23, 0.0  ;;  %v3837_v30 = vmax.f32 %v5565_v54, 0.0 }
 0x322   :  { %v3866_v0 = vpack.c.bf16 %v3834_v56, %v3830_v11  ;;  %v3868_v8 = vpack.c.bf16 %v3836_v18, %v3832_v33 }
 0x323   :  { %v3867_v17 = vpack.c.bf16 %v3835_v7, %v3831_v9  ;;  %v3869_v48 = vpack.c.bf16 %v3837_v30, %v3833_v27  ;;  %4406 = vmatpush1.bf16.msra.mxu0 %v6306_v5 }
 0x324   :  { %4407 = vmatprep.subr.bf16.mxu0 %v6311_v10 }
 0x325   :  { %4368 = vmatprep.mubr.bf16.mxu0 %v3867_v17 }
 0x326   :  { %4369 = vmatmul.mubr.bf16.gmra.mrb[108].mxu0 %v3866_v0 }
 0x327   :  { %4408 = vmatpush1.bf16.msra.mxu0 %v6309_v20  ;;  %4411 = vmatprep.mubr.bf16.mxu0 %v7231_v14  ;;  %v6330_v14 = vld [vmem:[#allocation8 + $0x38] sm:$0xff]  }
 0x328   :  { %4409 = vmatprep.subr.bf16.mxu0 %v6314_v53 }
 0x32b   :  { %4410 = vmatpush1.bf16.msra.mxu0 %v6312_v6 }
 0x32e   :  { %4412 = vmatmul.mubr.bf16.vlgmr.msra.gmra.mrb[80].mxu0 %v7229_v34  ;;  %v6329_v34 = vld [vmem:[#allocation8 + $0x78] sm:$0xff]  }
 0x32f   :  { %4421 = vmatprep.mubr.bf16.mxu0 %v7243_v22  ;;  %5436 = vmatprep.subr.bf16.mxu1 %v6329_v34  ;;  %v107_v22 = vld [vmem:[%s7571_s0 + $0x10] sm:$0xff] }
 0x330   :  { %5437 = vmatpush3.bf16.msra.mxu1 %v6330_v14 }
 0x336   :  { %4422 = vmatmul.mubr.bf16.gmra.mrb[84].mxu0 %v7241_v24  ;;  %v105_v24 = vld [vmem:[%s7571_s0] sm:$0xff] }
 0x337   :  { %4431 = vmatprep.mubr.bf16.mxu0 %v7255_v63  ;;  %v122_v63 = vsel %vm121_vm0, %v105_v24, 0.0 }
 0x338   :  { %123 = vadd.xlane.f32.xlu0 %v122_v63 }
 0x33e   :  { %4432 = vmatmul.mubr.bf16.gmra.mrb[88].mxu0 %v7253_v57  ;;  %v106_v57 = vld [vmem:[%s7571_s0 + $0x8] sm:$0xff] }
 0x33f   :  { %4441 = vmatprep.mubr.bf16.mxu0 %v7267_v41  ;;  %v108_v41 = vld [vmem:[%s7571_s0 + $0x18] sm:$0xff] }
 0x346   :  { %4442 = vmatmul.mubr.bf16.gmra.mrb[92].mxu0 %v7265_v32  ;;  %v125_v32 = vsel %vm121_vm0, %v106_v57, 0.0 }
 0x347   :  { %4451 = vmatprep.mubr.bf16.mxu0 %v7279_v51  ;;  %126 = vadd.xlane.f32.xlu1 %v125_v32  ;;  %v131_v51 = vsel %vm121_vm0, %v108_v41, 0.0 }
 0x34b   :  { %132 = vadd.xlane.f32.xlu1 %v131_v51 }
 0x34e   :  { %4452 = vmatmul.mubr.bf16.gmra.mrb[96].mxu0 %v7277_v42  ;;  %v128_v42 = vsel %vm121_vm0, %v107_v22, 0.0 }
 0x34f   :  { %4461 = vmatprep.mubr.bf16.mxu0 %v7291_v58  ;;  %v110_v58 = vld [vmem:[%s7571_s0 + $0x28] sm:$0xff]  ;;  %129 = vadd.xlane.f32.xlu0 %v128_v42 }
 0x350   :  { %v137_v61 = vsel %vm121_vm0, %v110_v58, 0.0 }
 0x351   :  { %138 = vadd.xlane.f32.xlu1 %v137_v61 }
 0x356   :  { %4462 = vmatmul.mubr.bf16.gmra.mrb[100].mxu0 %v7289_v40  ;;  %v109_v40 = vld [vmem:[%s7571_s0 + $0x20] sm:$0xff] }
 0x357   :  { %4471 = vmatprep.mubr.bf16.mxu0 %v3865_v50  ;;  %v134_v60 = vsel %vm121_vm0, %v109_v40, 0.0 }
 0x358   :  { %135 = vadd.xlane.f32.xlu0 %v134_v60 }
 0x35c   :  { %141 = vadd.xlane.f32.xlu0 %v140_v19 }
 0x35e   :  { %4472 = vmatmul.mubr.bf16.gmra.mrb[104].mxu0 %v7301_v29 }
 0x35f   :  { %4481 = vmatprep.mubr.bf16.mxu0 %v3869_v48 }
 0x360   :  { %147 = vadd.xlane.f32.xlu0 %v146_v37 }
 0x366   :  { %4482 = vmatmul.mubr.bf16.gmra.mrb[108].mxu0 %v3868_v8 }
 0x401   :  { %v4413_v35 = vpop.f32.mrb[80].mxu0 }
 0x402   :  { %v5566_v28 = vadd.f32 %v4413_v35, %v7360_v39  ;;  %v4415_v3 = vpop.f32.mrb[81].mxu0 }
 0x403   :  { %v5567_v29 = vadd.f32 %v4415_v3, %v7363_v49  ;;  %v4417_v47 = vpop.f32.mrb[82].mxu0 }
 0x404   :  { %v5568_v50 = vadd.f32 %v4417_v47, %v7360_v39  ;;  %v4419_v38 = vpop.f32.mrb[83].mxu0  ;;  %v4492_v15 = vmax.f32 %v5566_v28, 0.0 }
 0x405   :  { %v5569_v4 = vadd.f32 %v4419_v38, %v7363_v49  ;;  %v4493_v46 = vmax.f32 %v5567_v29, 0.0 }
 0x406   :  { %v4494_v55 = vmax.f32 %v5568_v50, 0.0 }
 0x407   :  { %v4495_v31 = vmax.f32 %v5569_v4, 0.0 }
 0x408   :  { %v4524_v45 = vpack.c.bf16 %v4494_v55, %v4492_v15 }
 0x409   :  { %v4525_v43 = vpack.c.bf16 %v4495_v31, %v4493_v46  ;;  %v4423_v1 = vpop.f32.mrb[84].mxu0 }
 0x40a   :  { %v5570_v16 = vadd.f32 %v4423_v1, %v7360_v39  ;;  %v4425_v44 = vpop.f32.mrb[85].mxu0 }
 0x40b   :  { %v5571_v62 = vadd.f32 %v4425_v44, %v7363_v49  ;;  %v4427_v59 = vpop.f32.mrb[86].mxu0  ;;  %4707 = vmatprep.mubr.bf16.mxu1 %v4525_v43 }
 0x40c   :  { %v5572_v25 = vadd.f32 %v4427_v59, %v7360_v39  ;;  %v4429_v12 = vpop.f32.mrb[87].mxu0  ;;  %4708 = vmatmul.mubr.bf16.vlgmr.msra.gmra.mrb[112].mxu1 %v4524_v45  ;;  %v4496_v2 = vmax.f32 %v5570_v16, 0.0 }
 0x40d   :  { %v5573_v21 = vadd.f32 %v4429_v12, %v7363_v49  ;;  %v4497_v23 = vmax.f32 %v5571_v62, 0.0 }
 0x40e   :  { %v4498_v36 = vmax.f32 %v5572_v25, 0.0 }
 0x40f   :  { %v4499_v54 = vmax.f32 %v5573_v21, 0.0 }
 0x410   :  { %v4526_v5 = vpack.c.bf16 %v4498_v36, %v4496_v2 }
 0x411   :  { %v4527_v11 = vpack.c.bf16 %v4499_v54, %v4497_v23  ;;  %v4433_v33 = vpop.f32.mrb[88].mxu0 }
 0x412   :  { %v5574_v56 = vadd.f32 %v4433_v33, %v7360_v39  ;;  %v4435_v18 = vpop.f32.mrb[89].mxu0 }
 0x413   :  { %v5575_v10 = vadd.f32 %v4435_v18, %v7363_v49  ;;  %v4437_v9 = vpop.f32.mrb[90].mxu0  ;;  %4715 = vmatprep.mubr.bf16.mxu1 %v4527_v11 }
 0x414   :  { %v5576_v27 = vadd.f32 %v4437_v9, %v7360_v39  ;;  %v4439_v7 = vpop.f32.mrb[91].mxu0  ;;  %4716 = vmatmul.mubr.bf16.gmra.mrb[116].mxu1 %v4526_v5  ;;  %v4500_v0 = vmax.f32 %v5574_v56, 0.0 }
 0x415   :  { %v5577_v30 = vadd.f32 %v4439_v7, %v7363_v49  ;;  %v4501_v17 = vmax.f32 %v5575_v10, 0.0 }
 0x416   :  { %v4502_v8 = vmax.f32 %v5576_v27, 0.0 }
 0x417   :  { %v4503_v48 = vmax.f32 %v5577_v30, 0.0 }
 0x418   :  { %v4528_v20 = vpack.c.bf16 %v4502_v8, %v4500_v0 }
 0x419   :  { %v4529_v53 = vpack.c.bf16 %v4503_v48, %v4501_v17  ;;  %v4443_v6 = vpop.f32.mrb[92].mxu0 }
 0x41a   :  { %v5578_v34 = vadd.f32 %v4443_v6, %v7360_v39  ;;  %v4445_v14 = vpop.f32.mrb[93].mxu0 }
 0x41b   :  { %v5579_v24 = vadd.f32 %v4445_v14, %v7363_v49  ;;  %v4447_v22 = vpop.f32.mrb[94].mxu0  ;;  %4723 = vmatprep.mubr.bf16.mxu1 %v4529_v53 }
 0x41c   :  { %v5580_v57 = vadd.f32 %v4447_v22, %v7360_v39  ;;  %v4449_v63 = vpop.f32.mrb[95].mxu0  ;;  %4724 = vmatmul.mubr.bf16.gmra.mrb[120].mxu1 %v4528_v20  ;;  %v4504_v41 = vmax.f32 %v5578_v34, 0.0 }
 0x41d   :  { %v5581_v32 = vadd.f32 %v4449_v63, %v7363_v49  ;;  %v4505_v51 = vmax.f32 %v5579_v24, 0.0 }
 0x41e   :  { %v4506_v42 = vmax.f32 %v5580_v57, 0.0 }
 0x41f   :  { %v4507_v40 = vmax.f32 %v5581_v32, 0.0 }
 0x420   :  { %v4530_v58 = vpack.c.bf16 %v4506_v42, %v4504_v41  ;;  %v112_v41 = vld [vmem:[%s7571_s0 + $0x38] sm:$0xff] }
 0x421   :  { %v4531_v60 = vpack.c.bf16 %v4507_v40, %v4505_v51  ;;  %v4453_v61 = vpop.f32.mrb[96].mxu0  ;;  %v143_v42 = vsel %vm121_vm0, %v112_v41, 0.0  ;;  %v114_v51 = vld [vmem:[%s7571_s0 + $0x48] sm:$0xff]  ;;  %v117_v40 = vld [vmem:[%s7571_s0 + $0x60] sm:$0xff] }
 0x422   :  { %v5582_v13 = vadd.f32 %v4453_v61, %v7360_v39  ;;  %v4455_v19 = vpop.f32.mrb[97].mxu0  ;;  %144 = vadd.xlane.f32.xlu1 %v143_v42  ;;  %v116_v61 = vld [vmem:[%s7571_s0 + $0x58] sm:$0xff] }
 0x423   :  { %v5583_v26 = vadd.f32 %v4455_v19, %v7363_v49  ;;  %v4457_v37 = vpop.f32.mrb[98].mxu0  ;;  %4731 = vmatprep.mubr.bf16.mxu1 %v4531_v60  ;;  %v158_v60 = vsel %vm121_vm0, %v117_v40, 0.0  ;;  %v118_v19 = vld [vmem:[%s7571_s0 + $0x68] sm:$0xff] }
 0x424   :  { %v5584_v52 = vadd.f32 %v4457_v37, %v7360_v39  ;;  %v4459_v35 = vpop.f32.mrb[99].mxu0  ;;  %4732 = vmatmul.mubr.bf16.gmra.mrb[124].mxu1 %v4530_v58  ;;  %v4508_v3 = vmax.f32 %v5582_v13, 0.0  ;;  %v149_v58 = vsel %vm121_vm0, %v114_v51, 0.0  ;;  %v155_v13 = vsel %vm121_vm0, %v116_v61, 0.0 }
 0x425   :  { %v5585_v28 = vadd.f32 %v4459_v35, %v7363_v49  ;;  %v4509_v47 = vmax.f32 %v5583_v26, 0.0  ;;  %v161_v26 = vsel %vm121_vm0, %v118_v19, 0.0 }
 0x426   :  { %v4510_v29 = vmax.f32 %v5584_v52, 0.0  ;;  %150 = vadd.xlane.f32.xlu1 %v149_v58  ;;  %v7424_v52 = vld [vmem:[%s7582_s11] ss:$0 sm:$0xff] }
 0x427   :  { %v4511_v50 = vmax.f32 %v5585_v28, 0.0 }
 0x428   :  { %v4532_v38 = vpack.c.bf16 %v4510_v29, %v4508_v3 }
 0x429   :  { %v4533_v4 = vpack.c.bf16 %v4511_v50, %v4509_v47  ;;  %v4463_v15 = vpop.f32.mrb[100].mxu0 }
 0x42a   :  { %v5586_v55 = vadd.f32 %v4463_v15, %v7360_v39  ;;  %v4465_v46 = vpop.f32.mrb[101].mxu0  ;;  %156 = vadd.xlane.f32.xlu1 %v155_v13 }
 0x42b   :  { %v5587_v31 = vadd.f32 %v4465_v46, %v7363_v49  ;;  %v4467_v45 = vpop.f32.mrb[102].mxu0  ;;  %4739 = vmatprep.mubr.bf16.mxu1 %v4533_v4 }
 0x42c   :  { %v5588_v43 = vadd.f32 %v4467_v45, %v7360_v39  ;;  %v4469_v1 = vpop.f32.mrb[103].mxu0  ;;  %4740 = vmatmul.mubr.bf16.gmra.mrb[128].mxu1 %v4532_v38  ;;  %v4512_v44 = vmax.f32 %v5586_v55, 0.0  ;;  %v7430_v38 = vld [vmem:[%s7583_s12] ss:$0 sm:$0xff] }
 0x42d   :  { %v5589_v16 = vadd.f32 %v4469_v1, %v7363_v49  ;;  %v4513_v59 = vmax.f32 %v5587_v31, 0.0 }
 0x42e   :  { %v4514_v62 = vmax.f32 %v5588_v43, 0.0  ;;  %162 = vadd.xlane.f32.xlu1 %v161_v26 }
 0x42f   :  { %v4515_v25 = vmax.f32 %v5589_v16, 0.0 }
 0x430   :  { %v4534_v12 = vpack.c.bf16 %v4514_v62, %v4512_v44 }
 0x431   :  { %v4535_v21 = vpack.c.bf16 %v4515_v25, %v4513_v59  ;;  %v4473_v2 = vpop.f32.mrb[104].mxu0 }
 0x432   :  { %v5590_v36 = vadd.f32 %v4473_v2, %v7360_v39  ;;  %v4475_v23 = vpop.f32.mrb[105].mxu0 }
 0x433   :  { %v5591_v54 = vadd.f32 %v4475_v23, %v7363_v49  ;;  %v4477_v5 = vpop.f32.mrb[106].mxu0  ;;  %4747 = vmatprep.mubr.bf16.mxu1 %v4535_v21 }
 0x434   :  { %v5592_v11 = vadd.f32 %v4477_v5, %v7360_v39  ;;  %v4479_v33 = vpop.f32.mrb[107].mxu0  ;;  %4748 = vmatmul.mubr.bf16.gmra.mrb[132].mxu1 %v4534_v12  ;;  %v4516_v18 = vmax.f32 %v5590_v36, 0.0 }
 0x435   :  { %v5593_v56 = vadd.f32 %v4479_v33, %v7363_v49  ;;  %v4517_v9 = vmax.f32 %v5591_v54, 0.0 }
 0x436   :  { %v4518_v10 = vmax.f32 %v5592_v11, 0.0 }
 0x437   :  { %v4519_v27 = vmax.f32 %v5593_v56, 0.0 }
 0x438   :  { %v4536_v7 = vpack.c.bf16 %v4518_v10, %v4516_v18 }
 0x439   :  { %v4537_v30 = vpack.c.bf16 %v4519_v27, %v4517_v9  ;;  %v4483_v0 = vpop.f32.mrb[108].mxu0 }
 0x43a   :  { %v5594_v8 = vadd.f32 %v4483_v0, %v7360_v39  ;;  %v4485_v17 = vpop.f32.mrb[109].mxu0 }
 0x43b   :  { %v5595_v48 = vadd.f32 %v4485_v17, %v7363_v49  ;;  %v4487_v20 = vpop.f32.mrb[110].mxu0  ;;  %4755 = vmatprep.mubr.bf16.mxu1 %v4537_v30 }
 0x43c   :  { %v5596_v53 = vadd.f32 %v4487_v20, %v7360_v39  ;;  %v4489_v6 = vpop.f32.mrb[111].mxu0  ;;  %4756 = vmatmul.mubr.bf16.gmra.mrb[136].mxu1 %v4536_v7  ;;  %v4520_v14 = vmax.f32 %v5594_v8, 0.0  ;;  %v115_v39 = vld [vmem:[%s7571_s0 + $0x50] sm:$0xff] }
 0x43d   :  { %v5597_v34 = vadd.f32 %v4489_v6, %v7363_v49  ;;  %v4521_v22 = vmax.f32 %v5595_v48, 0.0  ;;  %v152_v49 = vsel %vm121_vm0, %v115_v39, 0.0 }
 0x43e   :  { %v4522_v24 = vmax.f32 %v5596_v53, 0.0  ;;  %153 = vadd.xlane.f32.xlu0 %v152_v49 }
 0x43f   :  { %v4523_v57 = vmax.f32 %v5597_v34, 0.0 }
 0x440   :  { %v4538_v63 = vpack.c.bf16 %v4522_v24, %v4520_v14 }
 0x441   :  { %v4539_v32 = vpack.c.bf16 %v4523_v57, %v4521_v22 }
 0x442   :  { %159 = vadd.xlane.f32.xlu0 %v158_v60 }
 0x443   :  { %4763 = vmatprep.mubr.bf16.mxu1 %v4539_v32 }
 0x444   :  { %4764 = vmatmul.mubr.bf16.gmra.mrb[140].mxu1 %v4538_v63 }
 0x4df   :  { %v5438_v37 = vpop.f32.mrb[112].mxu1 }
 0x4e0   :  { %v5439_v35 = vpop.f32.mrb[113].mxu1 }
 0x4e1   :  { %v5440_v28 = vadd.f32 %v5439_v35, %v5438_v37  ;;  %v5441_v3 = vpop.f32.mrb[114].mxu1 }
 0x4e2   :  { %v5442_v29 = vpop.f32.mrb[115].mxu1 }
 0x4e3   :  { %v4710_v47 = vadd.f32 %v5440_v28, %v7424_v52  ;;  %v5443_v50 = vadd.f32 %v5442_v29, %v5441_v3 }
 0x4e5   :  { %v4772_v4 = vmax.f32 %v4710_v47, 0.0  ;;  %v4713_v15 = vadd.f32 %v5443_v50, %v7424_v52 }
 0x4e7   :  { %v4773_v55 = vmax.f32 %v4713_v15, 0.0  ;;  %v5444_v46 = vpop.f32.mrb[116].mxu1  ;;  %v4795_v31 = vmul.f32 %v7430_v38, %v4772_v4 }
 0x4e8   :  { %v5445_v45 = vpop.f32.mrb[117].mxu1 }
 0x4e9   :  { %v5446_v43 = vadd.f32 %v5445_v45, %v5444_v46  ;;  %v5447_v1 = vpop.f32.mrb[118].mxu1  ;;  %4811 = vadd.xlane.f32.xlu0 %v4795_v31  ;;  %v4796_v59 = vmul.f32 %v7430_v38, %v4773_v55 }
 0x4ea   :  { %v5448_v16 = vpop.f32.mrb[119].mxu1 }
 0x4eb   :  { %v4718_v44 = vadd.f32 %v5446_v43, %v7424_v52  ;;  %v5449_v62 = vadd.f32 %v5448_v16, %v5447_v1 }
 0x4ed   :  { %v4774_v25 = vmax.f32 %v4718_v44, 0.0  ;;  %v4721_v12 = vadd.f32 %v5449_v62, %v7424_v52  ;;  %4813 = vadd.xlane.f32.xlu0 %v4796_v59 }
 0x4ef   :  { %v4775_v21 = vmax.f32 %v4721_v12, 0.0  ;;  %v5450_v2 = vpop.f32.mrb[120].mxu1  ;;  %v4797_v36 = vmul.f32 %v7430_v38, %v4774_v25 }
 0x4f0   :  { %v5451_v23 = vpop.f32.mrb[121].mxu1 }
 0x4f1   :  { %v5452_v54 = vadd.f32 %v5451_v23, %v5450_v2  ;;  %v5453_v5 = vpop.f32.mrb[122].mxu1  ;;  %4815 = vadd.xlane.f32.xlu1 %v4797_v36  ;;  %v4798_v18 = vmul.f32 %v7430_v38, %v4775_v21 }
 0x4f2   :  { %v5454_v11 = vpop.f32.mrb[123].mxu1 }
 0x4f3   :  { %v4726_v33 = vadd.f32 %v5452_v54, %v7424_v52  ;;  %v5455_v56 = vadd.f32 %v5454_v11, %v5453_v5 }
 0x4f5   :  { %v4776_v10 = vmax.f32 %v4726_v33, 0.0  ;;  %v4729_v9 = vadd.f32 %v5455_v56, %v7424_v52  ;;  %4817 = vadd.xlane.f32.xlu1 %v4798_v18 }
 0x4f7   :  { %v4777_v27 = vmax.f32 %v4729_v9, 0.0  ;;  %v5456_v7 = vpop.f32.mrb[124].mxu1  ;;  %v4799_v30 = vmul.f32 %v7430_v38, %v4776_v10 }
 0x4f8   :  { %v5457_v0 = vpop.f32.mrb[125].mxu1 }
 0x4f9   :  { %v5458_v8 = vadd.f32 %v5457_v0, %v5456_v7  ;;  %v5459_v17 = vpop.f32.mrb[126].mxu1  ;;  %4819 = vadd.xlane.f32.xlu0 %v4799_v30  ;;  %v4800_v48 = vmul.f32 %v7430_v38, %v4777_v27  ;;  %v119_v27 = vld [vmem:[%s7571_s0 + $0x70] sm:$0xff]  ;;  %v120_v30 = vld [vmem:[%s7571_s0 + $0x78] sm:$0xff] }
 0x4fa   :  { %v5460_v20 = vpop.f32.mrb[127].mxu1  ;;  %v164_v0 = vsel %vm121_vm0, %v119_v27, 0.0 }
 0x4fb   :  { %v4734_v53 = vadd.f32 %v5458_v8, %v7424_v52  ;;  %v5461_v6 = vadd.f32 %v5460_v20, %v5459_v17  ;;  %4821 = vadd.xlane.f32.xlu1 %v4800_v48  ;;  %v167_v8 = vsel %vm121_vm0, %v120_v30, 0.0  ;;  %v127_v48 = vpop.xlane.xlu1 %126 }
 0x4fd   :  { %v4778_v34 = vmax.f32 %v4734_v53, 0.0  ;;  %v4737_v14 = vadd.f32 %v5461_v6, %v7424_v52 }
 0x4ff   :  { %v4779_v24 = vmax.f32 %v4737_v14, 0.0  ;;  %v5462_v22 = vpop.f32.mrb[128].mxu1  ;;  %v4801_v57 = vmul.f32 %v7430_v38, %v4778_v34  ;;  %v133_v53 = vpop.xlane.xlu1 %132 }
 0x500   :  { %v5463_v63 = vpop.f32.mrb[129].mxu1 }
 0x501   :  { %v5464_v32 = vadd.f32 %v5463_v63, %v5462_v22  ;;  %v5465_v41 = vpop.f32.mrb[130].mxu1  ;;  %4823 = vadd.xlane.f32.xlu0 %v4801_v57  ;;  %v4802_v39 = vmul.f32 %v7430_v38, %v4779_v24 }
 0x502   :  { %v5466_v42 = vpop.f32.mrb[131].mxu1 }
 0x503   :  { %v4742_v49 = vadd.f32 %v5464_v32, %v7424_v52  ;;  %v5467_v51 = vadd.f32 %v5466_v42, %v5465_v41  ;;  %4825 = vadd.xlane.f32.xlu1 %v4802_v39  ;;  %v139_v34 = vpop.xlane.xlu1 %138  ;;  %v7481_v32 = vld [vmem:[#allocation2] ss:$0 sm:$0xff] }
 0x505   :  { %v4780_v40 = vmax.f32 %v4742_v49, 0.0  ;;  %v4745_v58 = vadd.f32 %v5467_v51, %v7424_v52 }
 0x507   :  { %v4781_v60 = vmax.f32 %v4745_v58, 0.0  ;;  %v5468_v61 = vpop.f32.mrb[132].mxu1  ;;  %v4803_v13 = vmul.f32 %v7430_v38, %v4780_v40 }
 0x508   :  { %v5469_v19 = vpop.f32.mrb[133].mxu1 }
 0x509   :  { %v5470_v26 = vadd.f32 %v5469_v19, %v5468_v61  ;;  %v5471_v37 = vpop.f32.mrb[134].mxu1  ;;  %4827 = vadd.xlane.f32.xlu0 %v4803_v13  ;;  %v4804_v35 = vmul.f32 %v7430_v38, %v4781_v60 }
 0x50a   :  { %v5472_v28 = vpop.f32.mrb[135].mxu1 }
 0x50b   :  { %v4750_v3 = vadd.f32 %v5470_v26, %v7424_v52  ;;  %v5473_v29 = vadd.f32 %v5472_v28, %v5471_v37  ;;  %4829 = vadd.xlane.f32.xlu1 %v4804_v35 }
 0x50d   :  { %v4782_v47 = vmax.f32 %v4750_v3, 0.0  ;;  %v4753_v50 = vadd.f32 %v5473_v29, %v7424_v52 }
 0x50f   :  { %v4783_v4 = vmax.f32 %v4753_v50, 0.0  ;;  %v5474_v15 = vpop.f32.mrb[136].mxu1  ;;  %v4805_v55 = vmul.f32 %v7430_v38, %v4782_v47 }
 0x510   :  { %v5475_v46 = vpop.f32.mrb[137].mxu1 }
 0x511   :  { %v5476_v31 = vadd.f32 %v5475_v46, %v5474_v15  ;;  %v5477_v45 = vpop.f32.mrb[138].mxu1  ;;  %4831 = vadd.xlane.f32.xlu0 %v4805_v55  ;;  %v4806_v43 = vmul.f32 %v7430_v38, %v4783_v4 }
 0x512   :  { %v5478_v1 = vpop.f32.mrb[139].mxu1 }
 0x513   :  { %v4758_v16 = vadd.f32 %v5476_v31, %v7424_v52  ;;  %v5479_v44 = vadd.f32 %v5478_v1, %v5477_v45  ;;  %4833 = vadd.xlane.f32.xlu1 %v4806_v43 }
 0x515   :  { %v4784_v62 = vmax.f32 %v4758_v16, 0.0  ;;  %v4761_v59 = vadd.f32 %v5479_v44, %v7424_v52 }
 0x517   :  { %v4785_v25 = vmax.f32 %v4761_v59, 0.0  ;;  %v5480_v12 = vpop.f32.mrb[140].mxu1  ;;  %v4807_v21 = vmul.f32 %v7430_v38, %v4784_v62 }
 0x518   :  { %v5481_v2 = vpop.f32.mrb[141].mxu1 }
 0x519   :  { %v5482_v36 = vadd.f32 %v5481_v2, %v5480_v12  ;;  %v5483_v23 = vpop.f32.mrb[142].mxu1  ;;  %4835 = vadd.xlane.f32.xlu0 %v4807_v21  ;;  %v4808_v54 = vmul.f32 %v7430_v38, %v4785_v25 }
 0x51a   :  { %v5484_v5 = vpop.f32.mrb[143].mxu1 }
 0x51b   :  { %v4766_v11 = vadd.f32 %v5482_v36, %v7424_v52  ;;  %v5485_v33 = vadd.f32 %v5484_v5, %v5483_v23  ;;  %4837 = vadd.xlane.f32.xlu1 %v4808_v54 }
 0x51d   :  { %v4786_v56 = vmax.f32 %v4766_v11, 0.0  ;;  %v4769_v18 = vadd.f32 %v5485_v33, %v7424_v52  ;;  %v124_v52 = vpop.xlane.xlu0 %123 }
 0x51f   :  { %v4787_v10 = vmax.f32 %v4769_v18, 0.0  ;;  %v4809_v9 = vmul.f32 %v7430_v38, %v4786_v56 }
 0x521   :  { %4839 = vadd.xlane.f32.xlu0 %v4809_v9  ;;  %v4810_v7 = vmul.f32 %v7430_v38, %v4787_v10  ;;  %v130_v17 = vpop.xlane.xlu0 %129  ;;  %v145_v38 = vpop.xlane.xlu1 %144 }
 0x523   :  { %4841 = vadd.xlane.f32.xlu1 %v4810_v7 }
 0x525   :  { %165 = vadd.xlane.f32.xlu0 %v164_v0  ;;  %v136_v20 = vpop.xlane.xlu0 %135  ;;  %v7475_v22 = vpop.xlane.xlu1 %150 }
 0x527   :  { %168 = vadd.xlane.f32.xlu1 %v167_v8 }
 0x529   :  { %v142_v6 = vpop.xlane.xlu0 %141  ;;  %v7479_v63 = vpop.xlane.xlu1 %156 }
 0x52d   :  { %v7471_v14 = vpop.xlane.xlu0 %147  ;;  %v7484_v42 = vpop.xlane.xlu1 %162 }
 0x531   :  { %v7473_v24 = vpop.xlane.xlu0 %153 }
 0x535   :  { %v7477_v57 = vpop.xlane.xlu0 %159 }
 0x576   :  { %v4812_v41 = vpop.xlane.xlu0 %4811 }
 0x577   :  { %v4850_v39 = vadd.f32 %v7481_v32, %v4812_v41 }
 0x579   :  { %v4866_v49 = vadd.f32 %v4850_v39, %v124_v52 }
 0x57a   :  { %v4814_v51 = vpop.xlane.xlu0 %4813 }
 0x57b   :  { %v5406_v40 = vmul.f32 -1.442695, %v4866_v49  ;;  %v4851_v58 = vadd.f32 %v7481_v32, %v4814_v51 }
 0x57d   :  { %6333 = vpow2.f32 %v5406_v40  ;;  %v4867_v60 = vadd.f32 %v4851_v58, %v127_v48 }
 0x57e   :  { %v4816_v61 = vpop.xlane.xlu1 %4815 }
 0x57f   :  { %v5407_v13 = vmul.f32 -1.442695, %v4867_v60  ;;  %v4852_v19 = vadd.f32 %v7481_v32, %v4816_v61 }
 0x581   :  { %6335 = vpow2.f32 %v5407_v13  ;;  %v4868_v26 = vadd.f32 %v4852_v19, %v130_v17 }
 0x582   :  { %v4818_v37 = vpop.xlane.xlu1 %4817 }
 0x583   :  { %v5408_v35 = vmul.f32 -1.442695, %v4868_v26  ;;  %v4853_v28 = vadd.f32 %v7481_v32, %v4818_v37 }
 0x585   :  { %6337 = vpow2.f32 %v5408_v35  ;;  %v4869_v3 = vadd.f32 %v4853_v28, %v133_v53 }
 0x586   :  { %v4820_v29 = vpop.xlane.xlu0 %4819 }
 0x587   :  { %v6334_v47 = vpop.eup %6333  ;;  %v5409_v50 = vmul.f32 -1.442695, %v4869_v3  ;;  %v4854_v4 = vadd.f32 %v7481_v32, %v4820_v29 }
 0x588   :  { %v4930_v15 = vadd.f32 1.0, %v6334_v47  ;;  %v4822_v55 = vpop.xlane.xlu1 %4821 }
 0x589   :  { %6339 = vpow2.f32 %v5409_v50  ;;  %v4870_v46 = vadd.f32 %v4854_v4, %v136_v20  ;;  %v4855_v31 = vadd.f32 %v7481_v32, %v4822_v55 }
 0x58a   :  { %6341 = vrcp.f32 %v4930_v15 }
 0x58b   :  { %v6336_v45 = vpop.eup %6335  ;;  %v5410_v43 = vmul.f32 -1.442695, %v4870_v46  ;;  %v4871_v1 = vadd.f32 %v4855_v31, %v139_v34 }
 0x58c   :  { %v4931_v16 = vadd.f32 1.0, %v6336_v45 }
 0x58d   :  { %6343 = vpow2.f32 %v5410_v43  ;;  %v5411_v44 = vmul.f32 -1.442695, %v4871_v1 }
 0x58e   :  { %6345 = vrcp.f32 %v4931_v16  ;;  %v4824_v62 = vpop.xlane.xlu0 %4823 }
 0x58f   :  { %v6338_v59 = vpop.eup %6337  ;;  %6347 = vpow2.f32 %v5411_v44  ;;  %v4856_v25 = vadd.f32 %v7481_v32, %v4824_v62 }
 0x590   :  { %v4932_v12 = vadd.f32 1.0, %v6338_v59  ;;  %v4826_v21 = vpop.xlane.xlu1 %4825 }
 0x591   :  { %v4872_v2 = vadd.f32 %v4856_v25, %v142_v6  ;;  %v4857_v36 = vadd.f32 %v7481_v32, %v4826_v21 }
 0x592   :  { %6349 = vrcp.f32 %v4932_v12 }
 0x593   :  { %v6340_v23 = vpop.eup %6339  ;;  %v5412_v54 = vmul.f32 -1.442695, %v4872_v2  ;;  %v4873_v5 = vadd.f32 %v4857_v36, %v145_v38 }
 0x594   :  { %v6342_v11 = vpop.eup %6341  ;;  %v4933_v33 = vadd.f32 1.0, %v6340_v23 }
 0x595   :  { %4979 = vst.msk [vmem:[%s7585_s14] sm:$0xff] %vm4978_vm1, %v6342_v11  ;;  %6351 = vpow2.f32 %v5412_v54  ;;  %v5413_v56 = vmul.f32 -1.442695, %v4873_v5 }
 0x596   :  { %6353 = vrcp.f32 %v4933_v33  ;;  %v4828_v18 = vpop.xlane.xlu0 %4827 }
 0x597   :  { %v6344_v10 = vpop.eup %6343  ;;  %6355 = vpow2.f32 %v5413_v56  ;;  %v4858_v9 = vadd.f32 %v7481_v32, %v4828_v18 }
 0x598   :  { %v6346_v27 = vpop.eup %6345  ;;  %v4934_v7 = vadd.f32 1.0, %v6344_v10  ;;  %v4830_v30 = vpop.xlane.xlu1 %4829 }
 0x599   :  { %v6348_v0 = vpop.eup %6347  ;;  %4980 = vst.msk [vmem:[%s7585_s14 + $0x8] sm:$0xff] %vm4978_vm1, %v6346_v27  ;;  %v4874_v8 = vadd.f32 %v4858_v9, %v7471_v14  ;;  %v4859_v52 = vadd.f32 %v7481_v32, %v4830_v30 }
 0x59a   :  { %6357 = vrcp.f32 %v4934_v7  ;;  %v4935_v17 = vadd.f32 1.0, %v6348_v0 }
 0x59b   :  { %v5414_v48 = vmul.f32 -1.442695, %v4874_v8  ;;  %v4875_v20 = vadd.f32 %v4859_v52, %v7475_v22 }
 0x59c   :  { %v6350_v53 = vpop.eup %6349  ;;  %6359 = vrcp.f32 %v4935_v17 }
 0x59d   :  { %4981 = vst.msk [vmem:[%s7585_s14 + $0x10] sm:$0xff] %vm4978_vm1, %v6350_v53  ;;  %6361 = vpow2.f32 %v5414_v48  ;;  %v5415_v6 = vmul.f32 -1.442695, %v4875_v20 }
 0x59e   :  { %v4832_v34 = vpop.xlane.xlu0 %4831 }
 0x59f   :  { %v6352_v38 = vpop.eup %6351  ;;  %6363 = vpow2.f32 %v5415_v6  ;;  %v4860_v14 = vadd.f32 %v7481_v32, %v4832_v34 }
 0x5a0   :  { %v6354_v41 = vpop.eup %6353  ;;  %v4936_v39 = vadd.f32 1.0, %v6352_v38  ;;  %v4834_v49 = vpop.xlane.xlu1 %4833 }
 0x5a1   :  { %v6356_v51 = vpop.eup %6355  ;;  %4982 = vst.msk [vmem:[%s7585_s14 + $0x18] sm:$0xff] %vm4978_vm1, %v6354_v41  ;;  %v4876_v22 = vadd.f32 %v4860_v14, %v7473_v24  ;;  %v4861_v40 = vadd.f32 %v7481_v32, %v4834_v49 }
 0x5a2   :  { %6365 = vrcp.f32 %v4936_v39  ;;  %v4937_v58 = vadd.f32 1.0, %v6356_v51 }
 0x5a3   :  { %v5416_v60 = vmul.f32 -1.442695, %v4876_v22  ;;  %v4877_v61 = vadd.f32 %v4861_v40, %v7479_v63 }
 0x5a4   :  { %v6358_v13 = vpop.eup %6357  ;;  %6367 = vrcp.f32 %v4937_v58 }
 0x5a5   :  { %4983 = vst.msk [vmem:[%s7585_s14 + $0x20] sm:$0xff] %vm4978_vm1, %v6358_v13  ;;  %6369 = vpow2.f32 %v5416_v60  ;;  %v5417_v19 = vmul.f32 -1.442695, %v4877_v61 }
 0x5a6   :  { %v6360_v26 = vpop.eup %6359  ;;  %v4836_v37 = vpop.xlane.xlu0 %4835 }
 0x5a7   :  { %v6362_v35 = vpop.eup %6361  ;;  %4984 = vst.msk [vmem:[%s7585_s14 + $0x28] sm:$0xff] %vm4978_vm1, %v6360_v26  ;;  %6371 = vpow2.f32 %v5417_v19  ;;  %v4862_v24 = vadd.f32 %v7481_v32, %v4836_v37 }
 0x5a8   :  { %v4938_v63 = vadd.f32 1.0, %v6362_v35  ;;  %v4838_v28 = vpop.xlane.xlu1 %4837 }
 0x5a9   :  { %v6364_v3 = vpop.eup %6363  ;;  %v4878_v29 = vadd.f32 %v4862_v24, %v7477_v57  ;;  %v4863_v47 = vadd.f32 %v7481_v32, %v4838_v28 }
 0x5aa   :  { %6373 = vrcp.f32 %v4938_v63  ;;  %v4939_v50 = vadd.f32 1.0, %v6364_v3 }
 0x5ab   :  { %v5418_v4 = vmul.f32 -1.442695, %v4878_v29  ;;  %v4879_v15 = vadd.f32 %v4863_v47, %v7484_v42 }
 0x5ac   :  { %v6366_v55 = vpop.eup %6365  ;;  %6375 = vrcp.f32 %v4939_v50 }
 0x5ad   :  { %4985 = vst.msk [vmem:[%s7585_s14 + $0x30] sm:$0xff] %vm4978_vm1, %v6366_v55  ;;  %6377 = vpow2.f32 %v5418_v4  ;;  %v5419_v46 = vmul.f32 -1.442695, %v4879_v15 }
 0x5ae   :  { %v6368_v31 = vpop.eup %6367  ;;  %v4840_v45 = vpop.xlane.xlu0 %4839 }
 0x5af   :  { %v6370_v43 = vpop.eup %6369  ;;  %4986 = vst.msk [vmem:[%s7585_s14 + $0x38] sm:$0xff] %vm4978_vm1, %v6368_v31  ;;  %6379 = vpow2.f32 %v5419_v46  ;;  %v4864_v16 = vadd.f32 %v7481_v32, %v4840_v45 }
 0x5b0   :  { %v4940_v57 = vadd.f32 1.0, %v6370_v43  ;;  %v4842_v42 = vpop.xlane.xlu1 %4841 }
 0x5b1   :  { %v6372_v1 = vpop.eup %6371  ;;  %v4865_v59 = vadd.f32 %v7481_v32, %v4842_v42 }
 0x5b2   :  { %6381 = vrcp.f32 %v4940_v57  ;;  %v4941_v44 = vadd.f32 1.0, %v6372_v1  ;;  %v166_v62 = vpop.xlane.xlu0 %165 }
 0x5b3   :  { %v4880_v25 = vadd.f32 %v4864_v16, %v166_v62 }
 0x5b4   :  { %v6374_v12 = vpop.eup %6373  ;;  %6383 = vrcp.f32 %v4941_v44  ;;  %v169_v21 = vpop.xlane.xlu1 %168 }
 0x5b5   :  { %4987 = vst.msk [vmem:[%s7585_s14 + $0x40] sm:$0xff] %vm4978_vm1, %v6374_v12  ;;  %v5420_v2 = vmul.f32 -1.442695, %v4880_v25  ;;  %v4881_v36 = vadd.f32 %v4865_v59, %v169_v21 }
 0x5b6   :  { %v6376_v23 = vpop.eup %6375 }
 0x5b7   :  { %v6378_v54 = vpop.eup %6377  ;;  %4988 = vst.msk [vmem:[%s7585_s14 + $0x48] sm:$0xff] %vm4978_vm1, %v6376_v23  ;;  %6385 = vpow2.f32 %v5420_v2  ;;  %v5421_v32 = vmul.f32 -1.442695, %v4881_v36 }
 0x5b8   :  { %v4942_v5 = vadd.f32 1.0, %v6378_v54 }
 0x5b9   :  { %v6380_v11 = vpop.eup %6379  ;;  %6387 = vpow2.f32 %v5421_v32 }
 0x5ba   :  { %6389 = vrcp.f32 %v4942_v5  ;;  %v4943_v33 = vadd.f32 1.0, %v6380_v11 }
 0x5bc   :  { %v6382_v56 = vpop.eup %6381  ;;  %6391 = vrcp.f32 %v4943_v33 }
 0x5bd   :  { %4989 = vst.msk [vmem:[%s7585_s14 + $0x50] sm:$0xff] %vm4978_vm1, %v6382_v56 }
 0x5be   :  { %v6384_v18 = vpop.eup %6383 }
 0x5bf   :  { %4990 = vst.msk [vmem:[%s7585_s14 + $0x58] sm:$0xff] %vm4978_vm1, %v6384_v18 }
 0x5c1   :  { %v6386_v10 = vpop.eup %6385 }
 0x5c2   :  { %v4944_v9 = vadd.f32 1.0, %v6386_v10 }
 0x5c3   :  { %v6388_v27 = vpop.eup %6387 }
 0x5c4   :  { %v6390_v7 = vpop.eup %6389  ;;  %6393 = vrcp.f32 %v4944_v9  ;;  %v4945_v30 = vadd.f32 1.0, %v6388_v27 }
 0x5c5   :  { %4991 = vst.msk [vmem:[%s7585_s14 + $0x60] sm:$0xff] %vm4978_vm1, %v6390_v7 }
 0x5c6   :  { %v6392_v0 = vpop.eup %6391  ;;  %6395 = vrcp.f32 %v4945_v30 }
 0x5c7   :  { %4992 = vst.msk [vmem:[%s7585_s14 + $0x68] sm:$0xff] %vm4978_vm1, %v6392_v0 }
 0x5ce   :  { %v6394_v8 = vpop.eup %6393 }
 0x5cf   :  { %4993 = vst.msk [vmem:[%s7585_s14 + $0x70] sm:$0xff] %vm4978_vm1, %v6394_v8 }
 0x5d0   :  { %v6396_v52 = vpop.eup %6395 }
 0x5d1   :  { %4994 = vst.msk [vmem:[%s7585_s14 + $0x78] sm:$0xff] %vm4978_vm1, %v6396_v52 }
 0x5d2   :  { %4999 = vsyncpa [#allocation4], 1 }
 0x5d3   :  { %5000 = vsyncpa [#allocation6], 1 }
 0x5d4   :  { %5001 = vsyncpa [#allocation9], 1 }

</bundles_post_ra>
